<compile_context>
chip_gen: v6e
topology: v6e:2x2x1
jax: 0.10.0
libtpu: 0.0.40
codegen_flags: <defaults>
</compile_context>

<pallas_src>
import functools

import jax
import jax.numpy as jnp
import numpy as np
from jax import lax
from jax.experimental import pallas as pl
from jax.experimental.pallas import tpu as pltpu

_NEG_INF = -10000.0
_B_TILE = 128          # batch examples per grid step (lane axis)


# ----------------------------------------------------------------------------
# Kernels
# ----------------------------------------------------------------------------
def _emission_kernel(x_ref, w_ref, b_ref, out_ref):
    """hidden2tag: one (TM, H) x (H, T_pad) MXU pass per grid step."""
    out_ref[...] = (jnp.dot(x_ref[...], w_ref[...],
                            preferred_element_type=jnp.float32)
                    + b_ref[...]).astype(out_ref.dtype)


def _loop(n, body, init, unroll_threshold=32):
    """Fully unroll short static loops; fall back to fori_loop otherwise."""
    if n <= unroll_threshold:
        carry = init
        for i in range(n):
            carry = body(i, carry)
        return carry
    return lax.fori_loop(0, n, body, init)


def _viterbi_kernel(start_tag, stop_tag,
                    em_ref, len_ref, trans_ref, stop_ref,
                    path_ref, score_ref, bp_ref):
    """One grid step == one tile of 128 examples (batch on lanes, tags on sublanes).

    em_ref    : (L, T, Bt)  emission scores, transposed so batch is lane-dense
    len_ref   : (1, Bt)     sequence lengths (0 for padded examples)
    trans_ref : (T, T)      CRF transitions [next, prev]
    stop_ref  : (T, 1)      transitions[STOP_TAG, :] as a column
    path_ref  : (L, Bt)     int32 decoded best paths (output)
    score_ref : (1, Bt)     float32 best-path scores (output)
    bp_ref    : (L, T, Bt)  int32 backpointers (VMEM scratch, never leaves chip)
    """
    L, T, B = em_ref.shape
    lens = len_ref[...]                                     # (1, B) int32
    trans = trans_ref[...]                                  # (T, T)

    # Hoisted, loop-invariant broadcasts: tcols[p][n, b] = trans[n, p].
    tcols = [jnp.broadcast_to(trans[:, p:p + 1], (T, B)) for p in range(T)]
    stop_b = jnp.broadcast_to(stop_ref[...], (T, B))        # stop_b[n, b] = trans[STOP, n]

    tag_iota = lax.broadcasted_iota(jnp.int32, (T, B), 0)
    fv0 = jnp.where(tag_iota == start_tag,
                    jnp.float32(0.0), jnp.float32(_NEG_INF))

    # ---- forward recurrence --------------------------------------------------
    def fwd_body(step, fv):
        # next_tag_var[n, p, b] = fv[p, b] + trans[n, p]; reduce over p with a
        # short compare chain (first max wins, matching argmax tie-breaking).
        best = fv[0:1, :] + tcols[0]                        # (T, B)
        best_idx = jnp.zeros((T, B), jnp.int32)
        for p in range(1, T):
            cand = fv[p:p + 1, :] + tcols[p]
            upd = cand > best
            best = jnp.where(upd, cand, best)
            best_idx = jnp.where(upd, jnp.int32(p), best_idx)
        new_fv = best + em_ref[step]                        # (T, B)
        active = step < lens                                # (1, B)
        bp_ref[step] = jnp.where(active, best_idx, jnp.int32(stop_tag))
        return jnp.where(active, new_fv, fv)

    fv = _loop(L, fwd_body, fv0)

    # ---- terminal step: max / argmax over tags (sublane compare chain) -------
    term = fv + stop_b
    best_s = term[0:1, :]
    best_i = jnp.zeros((1, B), jnp.int32)
    for t in range(1, T):
        row = term[t:t + 1, :]
        upd = row > best_s
        best_s = jnp.where(upd, row, best_s)
        best_i = jnp.where(upd, jnp.int32(t), best_i)
    score_ref[...] = best_s

    # ---- on-device backtracking ----------------------------------------------
    def bwd_body(k, cur):
        j = (L - 1) - k
        if isinstance(j, int):
            jp = min(j + 1, L - 1)
        else:
            jp = jnp.minimum(j + 1, L - 1)
        bprow = bp_ref[jp]                                  # (T, B)
        g = bprow[0:1, :]
        for t in range(1, T):                               # per-lane gather via select chain
            g = jnp.where(cur == t, bprow[t:t + 1, :], g)
        new_cur = jnp.where(j < lens - 1, g, cur)
        out_row = jnp.where(j <= lens - 1, new_cur, jnp.int32(stop_tag))
        path_ref[pl.ds(j, 1), :] = out_row
        return new_cur

    _loop(L, bwd_body, best_i)


# ----------------------------------------------------------------------------
# Device-side wrapper (one jit: emission matmul -> layout plumbing -> Viterbi)
# ----------------------------------------------------------------------------
@functools.partial(jax.jit, static_argnames=("start_tag", "stop_tag"))
def _viterbi_device(feats, lengths, w, b, transitions, *, start_tag, stop_tag):
    B, L, H = feats.shape
    T = transitions.shape[0]
    T_PAD = ((T + 127) // 128) * 128
    B_pad = ((B + _B_TILE - 1) // _B_TILE) * _B_TILE

    feats = feats.astype(jnp.float32)
    feats_p = jnp.pad(feats, ((0, B_pad - B), (0, 0), (0, 0)))
    lens_p = jnp.pad(lengths.astype(jnp.int32), (0, B_pad - B))

    w_pad = jnp.zeros((H, T_PAD), jnp.float32).at[:, :T].set(w.astype(jnp.float32))
    b_pad = jnp.zeros((1, T_PAD), jnp.float32).at[0, :T].set(b.astype(jnp.float32))

    # ---- emission scores: one lane-dense MXU matmul over all tokens ---------
    M = B_pad * L
    TM = 512
    while M % TM:
        TM //= 2
    x2d = feats_p.reshape(M, H)

    emissions = pl.pallas_call(
        _emission_kernel,
        out_shape=jax.ShapeDtypeStruct((M, T_PAD), jnp.float32),
        grid=(M // TM,),
        in_specs=[pl.BlockSpec((TM, H), lambda i: (i, 0)),
                  pl.BlockSpec((H, T_PAD), lambda i: (0, 0)),
                  pl.BlockSpec((1, T_PAD), lambda i: (0, 0))],
        out_specs=pl.BlockSpec((TM, T_PAD), lambda i: (i, 0)),
        compiler_params=pltpu.CompilerParams(
            dimension_semantics=("parallel",),
            vmem_limit_bytes=32 * 1024 * 1024),
    )(x2d, w_pad, b_pad)

    # Layout plumbing (outside the kernel): (M, T_PAD) -> (L, T, B_pad) so the
    # batch axis is lane-dense inside the recurrence.
    em_t = emissions[:, :T].reshape(B_pad, L, T).transpose(1, 2, 0)
    lens2d = lens_p.reshape(1, B_pad)
    trans = transitions.astype(jnp.float32)
    stop_col = trans[stop_tag, :].reshape(T, 1)

    kernel = functools.partial(_viterbi_kernel, start_tag, stop_tag)
    paths_t, scores2d = pl.pallas_call(
        kernel,
        out_shape=(jax.ShapeDtypeStruct((L, B_pad), jnp.int32),
                   jax.ShapeDtypeStruct((1, B_pad), jnp.float32)),
        grid=(B_pad // _B_TILE,),
        in_specs=[pl.BlockSpec((L, T, _B_TILE), lambda bt: (0, 0, bt)),
                  pl.BlockSpec((1, _B_TILE), lambda bt: (0, bt)),
                  pl.BlockSpec((T, T), lambda bt: (0, 0)),
                  pl.BlockSpec((T, 1), lambda bt: (0, 0))],
        out_specs=(pl.BlockSpec((L, _B_TILE), lambda bt: (0, bt)),
                   pl.BlockSpec((1, _B_TILE), lambda bt: (0, bt))),
        scratch_shapes=[pltpu.VMEM((L, T, _B_TILE), jnp.int32)],
        compiler_params=pltpu.CompilerParams(
            dimension_semantics=("parallel",),
            vmem_limit_bytes=32 * 1024 * 1024),
    )(em_t, lens2d, trans, stop_col)

    path_scores = scores2d[0, :B]       # (B,)
    best_paths = paths_t[:, :B].T       # (B, L)
    return path_scores, best_paths


def viterbi_decode_pallas(feats, lengths, w, b, transitions, start_tag, stop_tag):
    """hidden2tag + Viterbi decode entirely on device; host only slices per-example lists."""
    B = feats.shape[0]
    lengths = jnp.asarray(lengths, jnp.int32)
    scores_dev, paths_dev = _viterbi_device(
        feats, lengths, w, b, transitions,
        start_tag=int(start_tag), stop_tag=int(stop_tag))
    jax.block_until_ready((scores_dev, paths_dev))

    scores_h = jax.device_get(scores_dev)        # (B,)
    paths_h = jax.device_get(paths_dev)          # (B, L)
    lens_h = jax.device_get(lengths)

    path_scores = [float(scores_h[i]) for i in range(B)]
    best_paths = [[int(t) for t in paths_h[i, :int(lens_h[i])]] for i in range(B)]
    return path_scores, best_paths


# ----------------------------------------------------------------------------
# Module
# ----------------------------------------------------------------------------
class BertCrfPallas:
    """JAX/Pallas equivalent of BERT_CRF.forward (BERT encoder stubbed)."""

    def __init__(self, tagset_size, hidden=32, key=jax.random.PRNGKey(0)):
        self.tagset_size = tagset_size + 2
        self.START_TAG = tagset_size
        self.STOP_TAG = tagset_size + 1
        self.hidden = hidden

        k_w, k_b, k_t = jax.random.split(key, 3)
        T = self.tagset_size
        # hidden2tag = nn.Linear(hidden, T)
        bound = 1.0 / float(np.sqrt(hidden))
        self.w = jax.random.uniform(k_w, (hidden, T), jnp.float32, -bound, bound)
        self.b = jax.random.uniform(k_b, (T,), jnp.float32, -bound, bound)
        # transitions = randn(T, T); transitions[START, :] = -1e4; transitions[:, STOP] = -1e4
        trans = jax.random.normal(k_t, (T, T), jnp.float32)
        trans = trans.at[self.START_TAG, :].set(_NEG_INF)
        trans = trans.at[:, self.STOP_TAG].set(_NEG_INF)
        self.transitions = trans

    def forward(self, feats, lengths):
        # feats plays the role of the BERT encoder output (B, L, hidden).
        return viterbi_decode_pallas(
            feats, lengths, self.w, self.b, self.transitions,
            self.START_TAG, self.STOP_TAG)


# ----------------------------------------------------------------------------
# NumPy reference (mirrors BERT_CRF._viterbi_decode) for a correctness check
# ----------------------------------------------------------------------------
def _viterbi_reference_numpy(feats, lengths, w, b, trans, start_tag, stop_tag):
    feats = np.asarray(feats, np.float32)
    w = np.asarray(w, np.float32)
    b = np.asarray(b, np.float32)
    trans = np.asarray(trans, np.float32)
    lengths = np.asarray(lengths)
    scores = feats @ w + b                                  # (B, L, T)
    B, L, T = scores.shape
    fv = np.full((B, T), _NEG_INF, np.float32)
    fv[:, start_tag] = 0.0
    bp = np.full((B, L, T), stop_tag, np.int64)
    for step in range(L):
        for i in range(B):
            if lengths[i] > step:
                ntv = fv[i][None, :] + trans                # [next, prev]
                bp[i, step] = ntv.argmax(-1)
                fv[i] = ntv.max(-1) + scores[i, step]
    term = fv + trans[stop_tag]
    path_scores, best_paths = [], []
    for i in range(B):
        t = int(term[i].argmax())
        path = [t]
        path_scores.append(float(term[i, t]))
        for j in range(int(lengths[i]) - 1, 0, -1):
            t = int(bp[i, j, t])
            path.append(t)
        path.reverse()
        best_paths.append(path)
    return path_scores, best_paths, scores


def _path_score_numpy(path, emit, trans, start_tag, stop_tag):
    s = trans[path[0], start_tag] + emit[0, path[0]]
    for l in range(1, len(path)):
        s += trans[path[l], path[l - 1]] + emit[l, path[l]]
    s += trans[stop_tag, path[-1]]
    return float(s)


if __name__ == "__main__":
    key = jax.random.PRNGKey(0)
    k_model, k_feats = jax.random.split(key)

    B, L, H = 2, 8, 32
    tagset_size = 6                     # -> T = tagset_size + 2 = 8

    model = BertCrfPallas(tagset_size, hidden=H, key=k_model)

    # Deterministic stand-in for the BERT encoder output (see TODO above).
    feats = jax.random.normal(k_feats, (B, L, H), jnp.float32)
    lengths = jnp.array([8, 5], dtype=jnp.int32)   # sorted descending, like reference

    path_scores, best_paths = model.forward(feats, lengths)

    # Structural checks (mirror the reference semantics).
    assert len(path_scores) == B
    assert all(len(p) == int(lengths[i]) for i, p in enumerate(best_paths))

    # Correctness check against the pure-NumPy reference.
    ref_scores, ref_paths, emit_np = _viterbi_reference_numpy(
        feats, lengths, model.w, model.b, model.transitions,
        model.START_TAG, model.STOP_TAG)
    trans_np = np.asarray(model.transitions, np.float32)
    assert np.allclose(np.array(path_scores), np.array(ref_scores),
                       rtol=1e-3, atol=5e-2), (path_scores, ref_scores)
    for i in range(B):
        rescored = _path_score_numpy(best_paths[i], emit_np[i], trans_np,
                                     model.START_TAG, model.STOP_TAG)
        assert abs(rescored - path_scores[i]) < 5e-2, (i, rescored, path_scores[i])

    print("KERNEL_OK")
</pallas_src>

<mosaic_0001>
module attributes {stable_mosaic.version = 11 : i64} {
  func.func @_emission_kernel(%arg0: i32, %arg1: memref<512x32xf32, #tpu.memory_space<vmem>>, %arg2: memref<32x128xf32, #tpu.memory_space<vmem>>, %arg3: memref<1x128xf32, #tpu.memory_space<vmem>>, %arg4: memref<512x128xf32, #tpu.memory_space<vmem>>) attributes {dimension_semantics = [#tpu.dimension_semantics<parallel>], iteration_bounds = array<i64: 2>, scalar_prefetch = 0 : i64, scratch_operands = 0 : i64, tpu.core_type = #tpu.core_type<tc>, window_params = [{transform_indices = @transform_0, window_bounds = array<i64: 512, 32>}, {pipeline_mode = #tpu.pipeline_mode<synchronous>, transform_indices = @transform_1, window_bounds = array<i64: 32, 128>}, {pipeline_mode = #tpu.pipeline_mode<synchronous>, transform_indices = @transform_2, window_bounds = array<i64: 1, 128>}, {transform_indices = @transform_3, window_bounds = array<i64: 512, 128>}]} {
    %c0 = arith.constant 0 : index
    %c0_0 = arith.constant 0 : index
    %0 = vector.load %arg1[%c0, %c0_0] : memref<512x32xf32, #tpu.memory_space<vmem>>, vector<512x32xf32>
    %c0_1 = arith.constant 0 : index
    %c0_2 = arith.constant 0 : index
    %1 = vector.load %arg2[%c0_1, %c0_2] : memref<32x128xf32, #tpu.memory_space<vmem>>, vector<32x128xf32>
    %cst = arith.constant dense<0.000000e+00> : vector<512x128xf32>
    %2 = tpu.matmul %0, %1, %cst {dimension_numbers = #tpu.dot_dimension_numbers<[1], [0], [0], [1], [0, 0, 1, 1], [], []>} : vector<512x32xf32>, vector<32x128xf32>, vector<512x128xf32> -> vector<512x128xf32>
    %c0_3 = arith.constant 0 : index
    %c0_4 = arith.constant 0 : index
    %3 = vector.load %arg3[%c0_3, %c0_4] : memref<1x128xf32, #tpu.memory_space<vmem>>, vector<1x128xf32>
    %4 = vector.broadcast %3 : vector<1x128xf32> to vector<512x128xf32>
    %5 = arith.addf %2, %4 : vector<512x128xf32>
    %c0_5 = arith.constant 0 : index
    %c0_6 = arith.constant 0 : index
    %6 = vector.load %arg4[%c0_5, %c0_6] : memref<512x128xf32, #tpu.memory_space<vmem>>, vector<512x128xf32>
    tpu.vector_store %arg4[%c0_5, %c0_6], %5 {strides = array<i32>} : memref<512x128xf32, #tpu.memory_space<vmem>>, vector<512x128xf32>,
    return
  }
  func.func @transform_0(%arg0: i32) -> (i32, i32) {
    %c0_i32 = arith.constant 0 : i32
    %c0_i32_0 = arith.constant 0 : i32
    return %arg0, %c0_i32 : i32, i32
  }
  func.func @transform_1(%arg0: i32) -> (i32, i32) {
    %c0_i32 = arith.constant 0 : i32
    %c0_i32_0 = arith.constant 0 : i32
    %c0_i32_1 = arith.constant 0 : i32
    return %c0_i32, %c0_i32_0 : i32, i32
  }
  func.func @transform_2(%arg0: i32) -> (i32, i32) {
    %c0_i32 = arith.constant 0 : i32
    %c0_i32_0 = arith.constant 0 : i32
    %c0_i32_1 = arith.constant 0 : i32
    return %c0_i32, %c0_i32_0 : i32, i32
  }
  func.func @transform_3(%arg0: i32) -> (i32, i32) {
    %c0_i32 = arith.constant 0 : i32
    %c0_i32_0 = arith.constant 0 : i32
    return %arg0, %c0_i32 : i32, i32
  }
}

module attributes {stable_mosaic.version = 11 : i64} {
  func.func @_viterbi_kernel(%arg0: i32, %arg1: memref<8x8x128xf32, #tpu.memory_space<vmem>>, %arg2: memref<1x128xi32, #tpu.memory_space<vmem>>, %arg3: memref<8x8xf32, #tpu.memory_space<vmem>>, %arg4: memref<8x1xf32, #tpu.memory_space<vmem>>, %arg5: memref<8x128xi32, #tpu.memory_space<vmem>>, %arg6: memref<1x128xf32, #tpu.memory_space<vmem>>, %arg7: memref<8x8x128xi32, #tpu.memory_space<vmem>>) attributes {dimension_semantics = [#tpu.dimension_semantics<parallel>], iteration_bounds = array<i64: 1>, scalar_prefetch = 0 : i64, scratch_operands = 1 : i64, tpu.core_type = #tpu.core_type<tc>, window_params = [{transform_indices = @transform_0, window_bounds = array<i64: 8, 8, 128>}, {transform_indices = @transform_1, window_bounds = array<i64: 1, 128>}, {pipeline_mode = #tpu.pipeline_mode<synchronous>, transform_indices = @transform_2, window_bounds = array<i64: 8, 8>}, {pipeline_mode = #tpu.pipeline_mode<synchronous>, transform_indices = @transform_3, window_bounds = array<i64: 8, 1>}, {transform_indices = @transform_4, window_bounds = array<i64: 8, 128>}, {transform_indices = @transform_5, window_bounds = array<i64: 1, 128>}]} {
    %c0 = arith.constant 0 : index
    %c0_0 = arith.constant 0 : index
    %0 = vector.load %arg2[%c0, %c0_0] : memref<1x128xi32, #tpu.memory_space<vmem>>, vector<1x128xi32>
    %c0_1 = arith.constant 0 : index
    %c0_2 = arith.constant 0 : index
    %1 = vector.load %arg3[%c0_1, %c0_2] : memref<8x8xf32, #tpu.memory_space<vmem>>, vector<8x8xf32>
    %2 = vector.extract_strided_slice %1 {offsets = [0, 0], sizes = [8, 1], strides = [1, 1]} : vector<8x8xf32> to vector<8x1xf32>
    %3 = vector.shape_cast %2 : vector<8x1xf32> to vector<8x1xf32>
    %4 = vector.broadcast %3 : vector<8x1xf32> to vector<8x128xf32>
    %5 = vector.extract_strided_slice %1 {offsets = [0, 1], sizes = [8, 1], strides = [1, 1]} : vector<8x8xf32> to vector<8x1xf32>
    %6 = vector.shape_cast %5 : vector<8x1xf32> to vector<8x1xf32>
    %7 = vector.broadcast %6 : vector<8x1xf32> to vector<8x128xf32>
    %8 = vector.extract_strided_slice %1 {offsets = [0, 2], sizes = [8, 1], strides = [1, 1]} : vector<8x8xf32> to vector<8x1xf32>
    %9 = vector.shape_cast %8 : vector<8x1xf32> to vector<8x1xf32>
    %10 = vector.broadcast %9 : vector<8x1xf32> to vector<8x128xf32>
    %11 = vector.extract_strided_slice %1 {offsets = [0, 3], sizes = [8, 1], strides = [1, 1]} : vector<8x8xf32> to vector<8x1xf32>
    %12 = vector.shape_cast %11 : vector<8x1xf32> to vector<8x1xf32>
    %13 = vector.broadcast %12 : vector<8x1xf32> to vector<8x128xf32>
    %14 = vector.extract_strided_slice %1 {offsets = [0, 4], sizes = [8, 1], strides = [1, 1]} : vector<8x8xf32> to vector<8x1xf32>
    %15 = vector.shape_cast %14 : vector<8x1xf32> to vector<8x1xf32>
    %16 = vector.broadcast %15 : vector<8x1xf32> to vector<8x128xf32>
    %17 = vector.extract_strided_slice %1 {offsets = [0, 5], sizes = [8, 1], strides = [1, 1]} : vector<8x8xf32> to vector<8x1xf32>
    %18 = vector.shape_cast %17 : vector<8x1xf32> to vector<8x1xf32>
    %19 = vector.broadcast %18 : vector<8x1xf32> to vector<8x128xf32>
    %20 = vector.extract_strided_slice %1 {offsets = [0, 6], sizes = [8, 1], strides = [1, 1]} : vector<8x8xf32> to vector<8x1xf32>
    %21 = vector.shape_cast %20 : vector<8x1xf32> to vector<8x1xf32>
    %22 = vector.broadcast %21 : vector<8x1xf32> to vector<8x128xf32>
    %23 = vector.extract_strided_slice %1 {offsets = [0, 7], sizes = [8, 1], strides = [1, 1]} : vector<8x8xf32> to vector<8x1xf32>
    %24 = vector.shape_cast %23 : vector<8x1xf32> to vector<8x1xf32>
    %25 = vector.broadcast %24 : vector<8x1xf32> to vector<8x128xf32>
    %c0_3 = arith.constant 0 : index
    %c0_4 = arith.constant 0 : index
    %26 = vector.load %arg4[%c0_3, %c0_4] : memref<8x1xf32, #tpu.memory_space<vmem>>, vector<8x1xf32>
    %27 = vector.shape_cast %26 : vector<8x1xf32> to vector<8x1xf32>
    %28 = vector.broadcast %27 : vector<8x1xf32> to vector<8x128xf32>
    %29 = tpu.iota {dimensions = array<i32: 0>} : vector<8x128xi32>
    %c6_i32 = arith.constant 6 : i32
    %30 = vector.broadcast %c6_i32 : i32 to vector<8x128xi32>
    %31 = arith.cmpi eq, %29, %30 : vector<8x128xi32>
    %cst = arith.constant 0.000000e+00 : f32
    %cst_5 = arith.constant -1.000000e+04 : f32
    %32 = vector.broadcast %cst : f32 to vector<8x128xf32>
    %33 = vector.broadcast %cst_5 : f32 to vector<8x128xf32>
    %34 = arith.select %31, %32, %33 : vector<8x128xi1>, vector<8x128xf32>
    %35 = vector.extract_strided_slice %34 {offsets = [0, 0], sizes = [1, 128], strides = [1, 1]} : vector<8x128xf32> to vector<1x128xf32>
    %36 = vector.broadcast %35 : vector<1x128xf32> to vector<8x128xf32>
    %37 = arith.addf %36, %4 : vector<8x128xf32>
    %c0_i32 = arith.constant 0 : i32
    %38 = vector.broadcast %c0_i32 : i32 to vector<8x128xi32>
    %39 = vector.extract_strided_slice %34 {offsets = [1, 0], sizes = [1, 128], strides = [1, 1]} : vector<8x128xf32> to vector<1x128xf32>
    %40 = vector.broadcast %39 : vector<1x128xf32> to vector<8x128xf32>
    %41 = arith.addf %40, %7 : vector<8x128xf32>
    %42 = arith.cmpf ogt, %41, %37 : vector<8x128xf32>
    %43 = arith.select %42, %41, %37 : vector<8x128xi1>, vector<8x128xf32>
    %c1_i32 = arith.constant 1 : i32
    %44 = vector.broadcast %c1_i32 : i32 to vector<8x128xi32>
    %45 = arith.select %42, %44, %38 : vector<8x128xi1>, vector<8x128xi32>
    %46 = vector.extract_strided_slice %34 {offsets = [2, 0], sizes = [1, 128], strides = [1, 1]} : vector<8x128xf32> to vector<1x128xf32>
    %47 = vector.broadcast %46 : vector<1x128xf32> to vector<8x128xf32>
    %48 = arith.addf %47, %10 : vector<8x128xf32>
    %49 = arith.cmpf ogt, %48, %43 : vector<8x128xf32>
    %50 = arith.select %49, %48, %43 : vector<8x128xi1>, vector<8x128xf32>
    %c2_i32 = arith.constant 2 : i32
    %51 = vector.broadcast %c2_i32 : i32 to vector<8x128xi32>
    %52 = arith.select %49, %51, %45 : vector<8x128xi1>, vector<8x128xi32>
    %53 = vector.extract_strided_slice %34 {offsets = [3, 0], sizes = [1, 128], strides = [1, 1]} : vector<8x128xf32> to vector<1x128xf32>
    %54 = vector.broadcast %53 : vector<1x128xf32> to vector<8x128xf32>
    %55 = arith.addf %54, %13 : vector<8x128xf32>
    %56 = arith.cmpf ogt, %55, %50 : vector<8x128xf32>
    %57 = arith.select %56, %55, %50 : vector<8x128xi1>, vector<8x128xf32>
    %c3_i32 = arith.constant 3 : i32
    %58 = vector.broadcast %c3_i32 : i32 to vector<8x128xi32>
    %59 = arith.select %56, %58, %52 : vector<8x128xi1>, vector<8x128xi32>
    %60 = vector.extract_strided_slice %34 {offsets = [4, 0], sizes = [1, 128], strides = [1, 1]} : vector<8x128xf32> to vector<1x128xf32>
    %61 = vector.broadcast %60 : vector<1x128xf32> to vector<8x128xf32>
    %62 = arith.addf %61, %16 : vector<8x128xf32>
    %63 = arith.cmpf ogt, %62, %57 : vector<8x128xf32>
    %64 = arith.select %63, %62, %57 : vector<8x128xi1>, vector<8x128xf32>
    %c4_i32 = arith.constant 4 : i32
    %65 = vector.broadcast %c4_i32 : i32 to vector<8x128xi32>
    %66 = arith.select %63, %65, %59 : vector<8x128xi1>, vector<8x128xi32>
    %67 = vector.extract_strided_slice %34 {offsets = [5, 0], sizes = [1, 128], strides = [1, 1]} : vector<8x128xf32> to vector<1x128xf32>
    %68 = vector.broadcast %67 : vector<1x128xf32> to vector<8x128xf32>
    %69 = arith.addf %68, %19 : vector<8x128xf32>
    %70 = arith.cmpf ogt, %69, %64 : vector<8x128xf32>
    %71 = arith.select %70, %69, %64 : vector<8x128xi1>, vector<8x128xf32>
    %c5_i32 = arith.constant 5 : i32
    %72 = vector.broadcast %c5_i32 : i32 to vector<8x128xi32>
    %73 = arith.select %70, %72, %66 : vector<8x128xi1>, vector<8x128xi32>
    %74 = vector.extract_strided_slice %34 {offsets = [6, 0], sizes = [1, 128], strides = [1, 1]} : vector<8x128xf32> to vector<1x128xf32>
    %75 = vector.broadcast %74 : vector<1x128xf32> to vector<8x128xf32>
    %76 = arith.addf %75, %22 : vector<8x128xf32>
    %77 = arith.cmpf ogt, %76, %71 : vector<8x128xf32>
    %78 = arith.select %77, %76, %71 : vector<8x128xi1>, vector<8x128xf32>
    %c6_i32_6 = arith.constant 6 : i32
    %79 = vector.broadcast %c6_i32_6 : i32 to vector<8x128xi32>
    %80 = arith.select %77, %79, %73 : vector<8x128xi1>, vector<8x128xi32>
    %81 = vector.extract_strided_slice %34 {offsets = [7, 0], sizes = [1, 128], strides = [1, 1]} : vector<8x128xf32> to vector<1x128xf32>
    %82 = vector.broadcast %81 : vector<1x128xf32> to vector<8x128xf32>
    %83 = arith.addf %82, %25 : vector<8x128xf32>
    %84 = arith.cmpf ogt, %83, %78 : vector<8x128xf32>
    %85 = arith.select %84, %83, %78 : vector<8x128xi1>, vector<8x128xf32>
    %c7_i32 = arith.constant 7 : i32
    %86 = vector.broadcast %c7_i32 : i32 to vector<8x128xi32>
    %87 = arith.select %84, %86, %80 : vector<8x128xi1>, vector<8x128xi32>
    %c0_7 = arith.constant 0 : index
    %c0_8 = arith.constant 0 : index
    %c0_9 = arith.constant 0 : index
    %88 = vector.load %arg1[%c0_7, %c0_8, %c0_9] : memref<8x8x128xf32, #tpu.memory_space<vmem>>, vector<1x8x128xf32>
    %89 = vector.shape_cast %88 : vector<1x8x128xf32> to vector<8x128xf32>
    %90 = arith.addf %85, %89 : vector<8x128xf32>
    %c0_i32_10 = arith.constant 0 : i32
    %91 = vector.broadcast %c0_i32_10 : i32 to vector<1x128xi32>
    %92 = arith.cmpi sgt, %0, %91 : vector<1x128xi32>
    %c7_i32_11 = arith.constant 7 : i32
    %93 = vector.shape_cast %92 : vector<1x128xi1> to vector<1x128xi1>
    %94 = vector.broadcast %93 : vector<1x128xi1> to vector<8x128xi1>
    %95 = vector.broadcast %c7_i32_11 : i32 to vector<8x128xi32>
    %96 = arith.select %94, %87, %95 : vector<8x128xi1>, vector<8x128xi32>
    %c0_12 = arith.constant 0 : index
    %c0_13 = arith.constant 0 : index
    %c0_14 = arith.constant 0 : index
    %97 = vector.load %arg7[%c0_12, %c0_13, %c0_14] : memref<8x8x128xi32, #tpu.memory_space<vmem>>, vector<1x8x128xi32>
    %98 = vector.shape_cast %97 : vector<1x8x128xi32> to vector<8x128xi32>
    %99 = vector.shape_cast %96 : vector<8x128xi32> to vector<1x8x128xi32>
    tpu.vector_store %arg7[%c0_12, %c0_13, %c0_14], %99 {strides = array<i32>} : memref<8x8x128xi32, #tpu.memory_space<vmem>>, vector<1x8x128xi32>,
    %100 = vector.shape_cast %92 : vector<1x128xi1> to vector<1x128xi1>
    %101 = vector.broadcast %100 : vector<1x128xi1> to vector<8x128xi1>
    %102 = arith.select %101, %90, %34 : vector<8x128xi1>, vector<8x128xf32>
    %103 = vector.extract_strided_slice %102 {offsets = [0, 0], sizes = [1, 128], strides = [1, 1]} : vector<8x128xf32> to vector<1x128xf32>
    %104 = vector.broadcast %103 : vector<1x128xf32> to vector<8x128xf32>
    %105 = arith.addf %104, %4 : vector<8x128xf32>
    %c0_i32_15 = arith.constant 0 : i32
    %106 = vector.broadcast %c0_i32_15 : i32 to vector<8x128xi32>
    %107 = vector.extract_strided_slice %102 {offsets = [1, 0], sizes = [1, 128], strides = [1, 1]} : vector<8x128xf32> to vector<1x128xf32>
    %108 = vector.broadcast %107 : vector<1x128xf32> to vector<8x128xf32>
    %109 = arith.addf %108, %7 : vector<8x128xf32>
    %110 = arith.cmpf ogt, %109, %105 : vector<8x128xf32>
    %111 = arith.select %110, %109, %105 : vector<8x128xi1>, vector<8x128xf32>
    %c1_i32_16 = arith.constant 1 : i32
    %112 = vector.broadcast %c1_i32_16 : i32 to vector<8x128xi32>
    %113 = arith.select %110, %112, %106 : vector<8x128xi1>, vector<8x128xi32>
    %114 = vector.extract_strided_slice %102 {offsets = [2, 0], sizes = [1, 128], strides = [1, 1]} : vector<8x128xf32> to vector<1x128xf32>
    %115 = vector.broadcast %114 : vector<1x128xf32> to vector<8x128xf32>
    %116 = arith.addf %115, %10 : vector<8x128xf32>
    %117 = arith.cmpf ogt, %116, %111 : vector<8x128xf32>
    %118 = arith.select %117, %116, %111 : vector<8x128xi1>, vector<8x128xf32>
    %c2_i32_17 = arith.constant 2 : i32
    %119 = vector.broadcast %c2_i32_17 : i32 to vector<8x128xi32>
    %120 = arith.select %117, %119, %113 : vector<8x128xi1>, vector<8x128xi32>
    %121 = vector.extract_strided_slice %102 {offsets = [3, 0], sizes = [1, 128], strides = [1, 1]} : vector<8x128xf32> to vector<1x128xf32>
    %122 = vector.broadcast %121 : vector<1x128xf32> to vector<8x128xf32>
    %123 = arith.addf %122, %13 : vector<8x128xf32>
    %124 = arith.cmpf ogt, %123, %118 : vector<8x128xf32>
    %125 = arith.select %124, %123, %118 : vector<8x128xi1>, vector<8x128xf32>
    %c3_i32_18 = arith.constant 3 : i32
    %126 = vector.broadcast %c3_i32_18 : i32 to vector<8x128xi32>
    %127 = arith.select %124, %126, %120 : vector<8x128xi1>, vector<8x128xi32>
    %128 = vector.extract_strided_slice %102 {offsets = [4, 0], sizes = [1, 128], strides = [1, 1]} : vector<8x128xf32> to vector<1x128xf32>
    %129 = vector.broadcast %128 : vector<1x128xf32> to vector<8x128xf32>
    %130 = arith.addf %129, %16 : vector<8x128xf32>
    %131 = arith.cmpf ogt, %130, %125 : vector<8x128xf32>
    %132 = arith.select %131, %130, %125 : vector<8x128xi1>, vector<8x128xf32>
    %c4_i32_19 = arith.constant 4 : i32
    %133 = vector.broadcast %c4_i32_19 : i32 to vector<8x128xi32>
    %134 = arith.select %131, %133, %127 : vector<8x128xi1>, vector<8x128xi32>
    %135 = vector.extract_strided_slice %102 {offsets = [5, 0], sizes = [1, 128], strides = [1, 1]} : vector<8x128xf32> to vector<1x128xf32>
    %136 = vector.broadcast %135 : vector<1x128xf32> to vector<8x128xf32>
    %137 = arith.addf %136, %19 : vector<8x128xf32>
    %138 = arith.cmpf ogt, %137, %132 : vector<8x128xf32>
    %139 = arith.select %138, %137, %132 : vector<8x128xi1>, vector<8x128xf32>
    %c5_i32_20 = arith.constant 5 : i32
    %140 = vector.broadcast %c5_i32_20 : i32 to vector<8x128xi32>
    %141 = arith.select %138, %140, %134 : vector<8x128xi1>, vector<8x128xi32>
    %142 = vector.extract_strided_slice %102 {offsets = [6, 0], sizes = [1, 128], strides = [1, 1]} : vector<8x128xf32> to vector<1x128xf32>
    %143 = vector.broadcast %142 : vector<1x128xf32> to vector<8x128xf32>
    %144 = arith.addf %143, %22 : vector<8x128xf32>
    %145 = arith.cmpf ogt, %144, %139 : vector<8x128xf32>
    %146 = arith.select %145, %144, %139 : vector<8x128xi1>, vector<8x128xf32>
    %c6_i32_21 = arith.constant 6 : i32
    %147 = vector.broadcast %c6_i32_21 : i32 to vector<8x128xi32>
    %148 = arith.select %145, %147, %141 : vector<8x128xi1>, vector<8x128xi32>
    %149 = vector.extract_strided_slice %102 {offsets = [7, 0], sizes = [1, 128], strides = [1, 1]} : vector<8x128xf32> to vector<1x128xf32>
    %150 = vector.broadcast %149 : vector<1x128xf32> to vector<8x128xf32>
    %151 = arith.addf %150, %25 : vector<8x128xf32>
    %152 = arith.cmpf ogt, %151, %146 : vector<8x128xf32>
    %153 = arith.select %152, %151, %146 : vector<8x128xi1>, vector<8x128xf32>
    %c7_i32_22 = arith.constant 7 : i32
    %154 = vector.broadcast %c7_i32_22 : i32 to vector<8x128xi32>
    %155 = arith.select %152, %154, %148 : vector<8x128xi1>, vector<8x128xi32>
    %c1 = arith.constant 1 : index
    %c0_23 = arith.constant 0 : index
    %c0_24 = arith.constant 0 : index
    %156 = vector.load %arg1[%c1, %c0_23, %c0_24] : memref<8x8x128xf32, #tpu.memory_space<vmem>>, vector<1x8x128xf32>
    %157 = vector.shape_cast %156 : vector<1x8x128xf32> to vector<8x128xf32>
    %158 = arith.addf %153, %157 : vector<8x128xf32>
    %c1_i32_25 = arith.constant 1 : i32
    %159 = vector.broadcast %c1_i32_25 : i32 to vector<1x128xi32>
    %160 = arith.cmpi sgt, %0, %159 : vector<1x128xi32>
    %c7_i32_26 = arith.constant 7 : i32
    %161 = vector.shape_cast %160 : vector<1x128xi1> to vector<1x128xi1>
    %162 = vector.broadcast %161 : vector<1x128xi1> to vector<8x128xi1>
    %163 = vector.broadcast %c7_i32_26 : i32 to vector<8x128xi32>
    %164 = arith.select %162, %155, %163 : vector<8x128xi1>, vector<8x128xi32>
    %c1_27 = arith.constant 1 : index
    %c0_28 = arith.constant 0 : index
    %c0_29 = arith.constant 0 : index
    %165 = vector.load %arg7[%c1_27, %c0_28, %c0_29] : memref<8x8x128xi32, #tpu.memory_space<vmem>>, vector<1x8x128xi32>
    %166 = vector.shape_cast %165 : vector<1x8x128xi32> to vector<8x128xi32>
    %167 = vector.shape_cast %164 : vector<8x128xi32> to vector<1x8x128xi32>
    tpu.vector_store %arg7[%c1_27, %c0_28, %c0_29], %167 {strides = array<i32>} : memref<8x8x128xi32, #tpu.memory_space<vmem>>, vector<1x8x128xi32>,
    %168 = vector.shape_cast %160 : vector<1x128xi1> to vector<1x128xi1>
    %169 = vector.broadcast %168 : vector<1x128xi1> to vector<8x128xi1>
    %170 = arith.select %169, %158, %102 : vector<8x128xi1>, vector<8x128xf32>
    %171 = vector.extract_strided_slice %170 {offsets = [0, 0], sizes = [1, 128], strides = [1, 1]} : vector<8x128xf32> to vector<1x128xf32>
    %172 = vector.broadcast %171 : vector<1x128xf32> to vector<8x128xf32>
    %173 = arith.addf %172, %4 : vector<8x128xf32>
    %c0_i32_30 = arith.constant 0 : i32
    %174 = vector.broadcast %c0_i32_30 : i32 to vector<8x128xi32>
    %175 = vector.extract_strided_slice %170 {offsets = [1, 0], sizes = [1, 128], strides = [1, 1]} : vector<8x128xf32> to vector<1x128xf32>
    %176 = vector.broadcast %175 : vector<1x128xf32> to vector<8x128xf32>
    %177 = arith.addf %176, %7 : vector<8x128xf32>
    %178 = arith.cmpf ogt, %177, %173 : vector<8x128xf32>
    %179 = arith.select %178, %177, %173 : vector<8x128xi1>, vector<8x128xf32>
    %c1_i32_31 = arith.constant 1 : i32
    %180 = vector.broadcast %c1_i32_31 : i32 to vector<8x128xi32>
    %181 = arith.select %178, %180, %174 : vector<8x128xi1>, vector<8x128xi32>
    %182 = vector.extract_strided_slice %170 {offsets = [2, 0], sizes = [1, 128], strides = [1, 1]} : vector<8x128xf32> to vector<1x128xf32>
    %183 = vector.broadcast %182 : vector<1x128xf32> to vector<8x128xf32>
    %184 = arith.addf %183, %10 : vector<8x128xf32>
    %185 = arith.cmpf ogt, %184, %179 : vector<8x128xf32>
    %186 = arith.select %185, %184, %179 : vector<8x128xi1>, vector<8x128xf32>
    %c2_i32_32 = arith.constant 2 : i32
    %187 = vector.broadcast %c2_i32_32 : i32 to vector<8x128xi32>
    %188 = arith.select %185, %187, %181 : vector<8x128xi1>, vector<8x128xi32>
    %189 = vector.extract_strided_slice %170 {offsets = [3, 0], sizes = [1, 128], strides = [1, 1]} : vector<8x128xf32> to vector<1x128xf32>
    %190 = vector.broadcast %189 : vector<1x128xf32> to vector<8x128xf32>
    %191 = arith.addf %190, %13 : vector<8x128xf32>
    %192 = arith.cmpf ogt, %191, %186 : vector<8x128xf32>
    %193 = arith.select %192, %191, %186 : vector<8x128xi1>, vector<8x128xf32>
    %c3_i32_33 = arith.constant 3 : i32
    %194 = vector.broadcast %c3_i32_33 : i32 to vector<8x128xi32>
    %195 = arith.select %192, %194, %188 : vector<8x128xi1>, vector<8x128xi32>
    %196 = vector.extract_strided_slice %170 {offsets = [4, 0], sizes = [1, 128], strides = [1, 1]} : vector<8x128xf32> to vector<1x128xf32>
    %197 = vector.broadcast %196 : vector<1x128xf32> to vector<8x128xf32>
    %198 = arith.addf %197, %16 : vector<8x128xf32>
    %199 = arith.cmpf ogt, %198, %193 : vector<8x128xf32>
    %200 = arith.select %199, %198, %193 : vector<8x128xi1>, vector<8x128xf32>
    %c4_i32_34 = arith.constant 4 : i32
    %201 = vector.broadcast %c4_i32_34 : i32 to vector<8x128xi32>
    %202 = arith.select %199, %201, %195 : vector<8x128xi1>, vector<8x128xi32>
    %203 = vector.extract_strided_slice %170 {offsets = [5, 0], sizes = [1, 128], strides = [1, 1]} : vector<8x128xf32> to vector<1x128xf32>
    %204 = vector.broadcast %203 : vector<1x128xf32> to vector<8x128xf32>
    %205 = arith.addf %204, %19 : vector<8x128xf32>
    %206 = arith.cmpf ogt, %205, %200 : vector<8x128xf32>
    %207 = arith.select %206, %205, %200 : vector<8x128xi1>, vector<8x128xf32>
    %c5_i32_35 = arith.constant 5 : i32
    %208 = vector.broadcast %c5_i32_35 : i32 to vector<8x128xi32>
    %209 = arith.select %206, %208, %202 : vector<8x128xi1>, vector<8x128xi32>
    %210 = vector.extract_strided_slice %170 {offsets = [6, 0], sizes = [1, 128], strides = [1, 1]} : vector<8x128xf32> to vector<1x128xf32>
    %211 = vector.broadcast %210 : vector<1x128xf32> to vector<8x128xf32>
    %212 = arith.addf %211, %22 : vector<8x128xf32>
    %213 = arith.cmpf ogt, %212, %207 : vector<8x128xf32>
    %214 = arith.select %213, %212, %207 : vector<8x128xi1>, vector<8x128xf32>
    %c6_i32_36 = arith.constant 6 : i32
    %215 = vector.broadcast %c6_i32_36 : i32 to vector<8x128xi32>
    %216 = arith.select %213, %215, %209 : vector<8x128xi1>, vector<8x128xi32>
    %217 = vector.extract_strided_slice %170 {offsets = [7, 0], sizes = [1, 128], strides = [1, 1]} : vector<8x128xf32> to vector<1x128xf32>
    %218 = vector.broadcast %217 : vector<1x128xf32> to vector<8x128xf32>
    %219 = arith.addf %218, %25 : vector<8x128xf32>
    %220 = arith.cmpf ogt, %219, %214 : vector<8x128xf32>
    %221 = arith.select %220, %219, %214 : vector<8x128xi1>, vector<8x128xf32>
    %c7_i32_37 = arith.constant 7 : i32
    %222 = vector.broadcast %c7_i32_37 : i32 to vector<8x128xi32>
    %223 = arith.select %220, %222, %216 : vector<8x128xi1>, vector<8x128xi32>
    %c2 = arith.constant 2 : index
    %c0_38 = arith.constant 0 : index
    %c0_39 = arith.constant 0 : index
    %224 = vector.load %arg1[%c2, %c0_38, %c0_39] : memref<8x8x128xf32, #tpu.memory_space<vmem>>, vector<1x8x128xf32>
    %225 = vector.shape_cast %224 : vector<1x8x128xf32> to vector<8x128xf32>
    %226 = arith.addf %221, %225 : vector<8x128xf32>
    %c2_i32_40 = arith.constant 2 : i32
    %227 = vector.broadcast %c2_i32_40 : i32 to vector<1x128xi32>
    %228 = arith.cmpi sgt, %0, %227 : vector<1x128xi32>
    %c7_i32_41 = arith.constant 7 : i32
    %229 = vector.shape_cast %228 : vector<1x128xi1> to vector<1x128xi1>
    %230 = vector.broadcast %229 : vector<1x128xi1> to vector<8x128xi1>
    %231 = vector.broadcast %c7_i32_41 : i32 to vector<8x128xi32>
    %232 = arith.select %230, %223, %231 : vector<8x128xi1>, vector<8x128xi32>
    %c2_42 = arith.constant 2 : index
    %c0_43 = arith.constant 0 : index
    %c0_44 = arith.constant 0 : index
    %233 = vector.load %arg7[%c2_42, %c0_43, %c0_44] : memref<8x8x128xi32, #tpu.memory_space<vmem>>, vector<1x8x128xi32>
    %234 = vector.shape_cast %233 : vector<1x8x128xi32> to vector<8x128xi32>
    %235 = vector.shape_cast %232 : vector<8x128xi32> to vector<1x8x128xi32>
    tpu.vector_store %arg7[%c2_42, %c0_43, %c0_44], %235 {strides = array<i32>} : memref<8x8x128xi32, #tpu.memory_space<vmem>>, vector<1x8x128xi32>,
    %236 = vector.shape_cast %228 : vector<1x128xi1> to vector<1x128xi1>
    %237 = vector.broadcast %236 : vector<1x128xi1> to vector<8x128xi1>
    %238 = arith.select %237, %226, %170 : vector<8x128xi1>, vector<8x128xf32>
    %239 = vector.extract_strided_slice %238 {offsets = [0, 0], sizes = [1, 128], strides = [1, 1]} : vector<8x128xf32> to vector<1x128xf32>
    %240 = vector.broadcast %239 : vector<1x128xf32> to vector<8x128xf32>
    %241 = arith.addf %240, %4 : vector<8x128xf32>
    %c0_i32_45 = arith.constant 0 : i32
    %242 = vector.broadcast %c0_i32_45 : i32 to vector<8x128xi32>
    %243 = vector.extract_strided_slice %238 {offsets = [1, 0], sizes = [1, 128], strides = [1, 1]} : vector<8x128xf32> to vector<1x128xf32>
    %244 = vector.broadcast %243 : vector<1x128xf32> to vector<8x128xf32>
    %245 = arith.addf %244, %7 : vector<8x128xf32>
    %246 = arith.cmpf ogt, %245, %241 : vector<8x128xf32>
    %247 = arith.select %246, %245, %241 : vector<8x128xi1>, vector<8x128xf32>
    %c1_i32_46 = arith.constant 1 : i32
    %248 = vector.broadcast %c1_i32_46 : i32 to vector<8x128xi32>
    %249 = arith.select %246, %248, %242 : vector<8x128xi1>, vector<8x128xi32>
    %250 = vector.extract_strided_slice %238 {offsets = [2, 0], sizes = [1, 128], strides = [1, 1]} : vector<8x128xf32> to vector<1x128xf32>
    %251 = vector.broadcast %250 : vector<1x128xf32> to vector<8x128xf32>
    %252 = arith.addf %251, %10 : vector<8x128xf32>
    %253 = arith.cmpf ogt, %252, %247 : vector<8x128xf32>
    %254 = arith.select %253, %252, %247 : vector<8x128xi1>, vector<8x128xf32>
    %c2_i32_47 = arith.constant 2 : i32
    %255 = vector.broadcast %c2_i32_47 : i32 to vector<8x128xi32>
    %256 = arith.select %253, %255, %249 : vector<8x128xi1>, vector<8x128xi32>
    %257 = vector.extract_strided_slice %238 {offsets = [3, 0], sizes = [1, 128], strides = [1, 1]} : vector<8x128xf32> to vector<1x128xf32>
    %258 = vector.broadcast %257 : vector<1x128xf32> to vector<8x128xf32>
    %259 = arith.addf %258, %13 : vector<8x128xf32>
    %260 = arith.cmpf ogt, %259, %254 : vector<8x128xf32>
    %261 = arith.select %260, %259, %254 : vector<8x128xi1>, vector<8x128xf32>
    %c3_i32_48 = arith.constant 3 : i32
    %262 = vector.broadcast %c3_i32_48 : i32 to vector<8x128xi32>
    %263 = arith.select %260, %262, %256 : vector<8x128xi1>, vector<8x128xi32>
    %264 = vector.extract_strided_slice %238 {offsets = [4, 0], sizes = [1, 128], strides = [1, 1]} : vector<8x128xf32> to vector<1x128xf32>
    %265 = vector.broadcast %264 : vector<1x128xf32> to vector<8x128xf32>
    %266 = arith.addf %265, %16 : vector<8x128xf32>
    %267 = arith.cmpf ogt, %266, %261 : vector<8x128xf32>
    %268 = arith.select %267, %266, %261 : vector<8x128xi1>, vector<8x128xf32>
    %c4_i32_49 = arith.constant 4 : i32
    %269 = vector.broadcast %c4_i32_49 : i32 to vector<8x128xi32>
    %270 = arith.select %267, %269, %263 : vector<8x128xi1>, vector<8x128xi32>
    %271 = vector.extract_strided_slice %238 {offsets = [5, 0], sizes = [1, 128], strides = [1, 1]} : vector<8x128xf32> to vector<1x128xf32>
    %272 = vector.broadcast %271 : vector<1x128xf32> to vector<8x128xf32>
    %273 = arith.addf %272, %19 : vector<8x128xf32>
    %274 = arith.cmpf ogt, %273, %268 : vector<8x128xf32>
    %275 = arith.select %274, %273, %268 : vector<8x128xi1>, vector<8x128xf32>
    %c5_i32_50 = arith.constant 5 : i32
    %276 = vector.broadcast %c5_i32_50 : i32 to vector<8x128xi32>
    %277 = arith.select %274, %276, %270 : vector<8x128xi1>, vector<8x128xi32>
    %278 = vector.extract_strided_slice %238 {offsets = [6, 0], sizes = [1, 128], strides = [1, 1]} : vector<8x128xf32> to vector<1x128xf32>
    %279 = vector.broadcast %278 : vector<1x128xf32> to vector<8x128xf32>
    %280 = arith.addf %279, %22 : vector<8x128xf32>
    %281 = arith.cmpf ogt, %280, %275 : vector<8x128xf32>
    %282 = arith.select %281, %280, %275 : vector<8x128xi1>, vector<8x128xf32>
    %c6_i32_51 = arith.constant 6 : i32
    %283 = vector.broadcast %c6_i32_51 : i32 to vector<8x128xi32>
    %284 = arith.select %281, %283, %277 : vector<8x128xi1>, vector<8x128xi32>
    %285 = vector.extract_strided_slice %238 {offsets = [7, 0], sizes = [1, 128], strides = [1, 1]} : vector<8x128xf32> to vector<1x128xf32>
    %286 = vector.broadcast %285 : vector<1x128xf32> to vector<8x128xf32>
    %287 = arith.addf %286, %25 : vector<8x128xf32>
    %288 = arith.cmpf ogt, %287, %282 : vector<8x128xf32>
    %289 = arith.select %288, %287, %282 : vector<8x128xi1>, vector<8x128xf32>
    %c7_i32_52 = arith.constant 7 : i32
    %290 = vector.broadcast %c7_i32_52 : i32 to vector<8x128xi32>
    %291 = arith.select %288, %290, %284 : vector<8x128xi1>, vector<8x128xi32>
    %c3 = arith.constant 3 : index
    %c0_53 = arith.constant 0 : index
    %c0_54 = arith.constant 0 : index
    %292 = vector.load %arg1[%c3, %c0_53, %c0_54] : memref<8x8x128xf32, #tpu.memory_space<vmem>>, vector<1x8x128xf32>
    %293 = vector.shape_cast %292 : vector<1x8x128xf32> to vector<8x128xf32>
    %294 = arith.addf %289, %293 : vector<8x128xf32>
    %c3_i32_55 = arith.constant 3 : i32
    %295 = vector.broadcast %c3_i32_55 : i32 to vector<1x128xi32>
    %296 = arith.cmpi sgt, %0, %295 : vector<1x128xi32>
    %c7_i32_56 = arith.constant 7 : i32
    %297 = vector.shape_cast %296 : vector<1x128xi1> to vector<1x128xi1>
    %298 = vector.broadcast %297 : vector<1x128xi1> to vector<8x128xi1>
    %299 = vector.broadcast %c7_i32_56 : i32 to vector<8x128xi32>
    %300 = arith.select %298, %291, %299 : vector<8x128xi1>, vector<8x128xi32>
    %c3_57 = arith.constant 3 : index
    %c0_58 = arith.constant 0 : index
    %c0_59 = arith.constant 0 : index
    %301 = vector.load %arg7[%c3_57, %c0_58, %c0_59] : memref<8x8x128xi32, #tpu.memory_space<vmem>>, vector<1x8x128xi32>
    %302 = vector.shape_cast %301 : vector<1x8x128xi32> to vector<8x128xi32>
    %303 = vector.shape_cast %300 : vector<8x128xi32> to vector<1x8x128xi32>
    tpu.vector_store %arg7[%c3_57, %c0_58, %c0_59], %303 {strides = array<i32>} : memref<8x8x128xi32, #tpu.memory_space<vmem>>, vector<1x8x128xi32>,
    %304 = vector.shape_cast %296 : vector<1x128xi1> to vector<1x128xi1>
    %305 = vector.broadcast %304 : vector<1x128xi1> to vector<8x128xi1>
    %306 = arith.select %305, %294, %238 : vector<8x128xi1>, vector<8x128xf32>
    %307 = vector.extract_strided_slice %306 {offsets = [0, 0], sizes = [1, 128], strides = [1, 1]} : vector<8x128xf32> to vector<1x128xf32>
    %308 = vector.broadcast %307 : vector<1x128xf32> to vector<8x128xf32>
    %309 = arith.addf %308, %4 : vector<8x128xf32>
    %c0_i32_60 = arith.constant 0 : i32
    %310 = vector.broadcast %c0_i32_60 : i32 to vector<8x128xi32>
    %311 = vector.extract_strided_slice %306 {offsets = [1, 0], sizes = [1, 128], strides = [1, 1]} : vector<8x128xf32> to vector<1x128xf32>
    %312 = vector.broadcast %311 : vector<1x128xf32> to vector<8x128xf32>
    %313 = arith.addf %312, %7 : vector<8x128xf32>
    %314 = arith.cmpf ogt, %313, %309 : vector<8x128xf32>
    %315 = arith.select %314, %313, %309 : vector<8x128xi1>, vector<8x128xf32>
    %c1_i32_61 = arith.constant 1 : i32
    %316 = vector.broadcast %c1_i32_61 : i32 to vector<8x128xi32>
    %317 = arith.select %314, %316, %310 : vector<8x128xi1>, vector<8x128xi32>
    %318 = vector.extract_strided_slice %306 {offsets = [2, 0], sizes = [1, 128], strides = [1, 1]} : vector<8x128xf32> to vector<1x128xf32>
    %319 = vector.broadcast %318 : vector<1x128xf32> to vector<8x128xf32>
    %320 = arith.addf %319, %10 : vector<8x128xf32>
    %321 = arith.cmpf ogt, %320, %315 : vector<8x128xf32>
    %322 = arith.select %321, %320, %315 : vector<8x128xi1>, vector<8x128xf32>
    %c2_i32_62 = arith.constant 2 : i32
    %323 = vector.broadcast %c2_i32_62 : i32 to vector<8x128xi32>
    %324 = arith.select %321, %323, %317 : vector<8x128xi1>, vector<8x128xi32>
    %325 = vector.extract_strided_slice %306 {offsets = [3, 0], sizes = [1, 128], strides = [1, 1]} : vector<8x128xf32> to vector<1x128xf32>
    %326 = vector.broadcast %325 : vector<1x128xf32> to vector<8x128xf32>
    %327 = arith.addf %326, %13 : vector<8x128xf32>
    %328 = arith.cmpf ogt, %327, %322 : vector<8x128xf32>
    %329 = arith.select %328, %327, %322 : vector<8x128xi1>, vector<8x128xf32>
    %c3_i32_63 = arith.constant 3 : i32
    %330 = vector.broadcast %c3_i32_63 : i32 to vector<8x128xi32>
    %331 = arith.select %328, %330, %324 : vector<8x128xi1>, vector<8x128xi32>
    %332 = vector.extract_strided_slice %306 {offsets = [4, 0], sizes = [1, 128], strides = [1, 1]} : vector<8x128xf32> to vector<1x128xf32>
    %333 = vector.broadcast %332 : vector<1x128xf32> to vector<8x128xf32>
    %334 = arith.addf %333, %16 : vector<8x128xf32>
    %335 = arith.cmpf ogt, %334, %329 : vector<8x128xf32>
    %336 = arith.select %335, %334, %329 : vector<8x128xi1>, vector<8x128xf32>
    %c4_i32_64 = arith.constant 4 : i32
    %337 = vector.broadcast %c4_i32_64 : i32 to vector<8x128xi32>
    %338 = arith.select %335, %337, %331 : vector<8x128xi1>, vector<8x128xi32>
    %339 = vector.extract_strided_slice %306 {offsets = [5, 0], sizes = [1, 128], strides = [1, 1]} : vector<8x128xf32> to vector<1x128xf32>
    %340 = vector.broadcast %339 : vector<1x128xf32> to vector<8x128xf32>
    %341 = arith.addf %340, %19 : vector<8x128xf32>
    %342 = arith.cmpf ogt, %341, %336 : vector<8x128xf32>
    %343 = arith.select %342, %341, %336 : vector<8x128xi1>, vector<8x128xf32>
    %c5_i32_65 = arith.constant 5 : i32
    %344 = vector.broadcast %c5_i32_65 : i32 to vector<8x128xi32>
    %345 = arith.select %342, %344, %338 : vector<8x128xi1>, vector<8x128xi32>
    %346 = vector.extract_strided_slice %306 {offsets = [6, 0], sizes = [1, 128], strides = [1, 1]} : vector<8x128xf32> to vector<1x128xf32>
    %347 = vector.broadcast %346 : vector<1x128xf32> to vector<8x128xf32>
    %348 = arith.addf %347, %22 : vector<8x128xf32>
    %349 = arith.cmpf ogt, %348, %343 : vector<8x128xf32>
    %350 = arith.select %349, %348, %343 : vector<8x128xi1>, vector<8x128xf32>
    %c6_i32_66 = arith.constant 6 : i32
    %351 = vector.broadcast %c6_i32_66 : i32 to vector<8x128xi32>
    %352 = arith.select %349, %351, %345 : vector<8x128xi1>, vector<8x128xi32>
    %353 = vector.extract_strided_slice %306 {offsets = [7, 0], sizes = [1, 128], strides = [1, 1]} : vector<8x128xf32> to vector<1x128xf32>
    %354 = vector.broadcast %353 : vector<1x128xf32> to vector<8x128xf32>
    %355 = arith.addf %354, %25 : vector<8x128xf32>
    %356 = arith.cmpf ogt, %355, %350 : vector<8x128xf32>
    %357 = arith.select %356, %355, %350 : vector<8x128xi1>, vector<8x128xf32>
    %c7_i32_67 = arith.constant 7 : i32
    %358 = vector.broadcast %c7_i32_67 : i32 to vector<8x128xi32>
    %359 = arith.select %356, %358, %352 : vector<8x128xi1>, vector<8x128xi32>
    %c4 = arith.constant 4 : index
    %c0_68 = arith.constant 0 : index
    %c0_69 = arith.constant 0 : index
    %360 = vector.load %arg1[%c4, %c0_68, %c0_69] : memref<8x8x128xf32, #tpu.memory_space<vmem>>, vector<1x8x128xf32>
    %361 = vector.shape_cast %360 : vector<1x8x128xf32> to vector<8x128xf32>
    %362 = arith.addf %357, %361 : vector<8x128xf32>
    %c4_i32_70 = arith.constant 4 : i32
    %363 = vector.broadcast %c4_i32_70 : i32 to vector<1x128xi32>
    %364 = arith.cmpi sgt, %0, %363 : vector<1x128xi32>
    %c7_i32_71 = arith.constant 7 : i32
    %365 = vector.shape_cast %364 : vector<1x128xi1> to vector<1x128xi1>
    %366 = vector.broadcast %365 : vector<1x128xi1> to vector<8x128xi1>
    %367 = vector.broadcast %c7_i32_71 : i32 to vector<8x128xi32>
    %368 = arith.select %366, %359, %367 : vector<8x128xi1>, vector<8x128xi32>
    %c4_72 = arith.constant 4 : index
    %c0_73 = arith.constant 0 : index
    %c0_74 = arith.constant 0 : index
    %369 = vector.load %arg7[%c4_72, %c0_73, %c0_74] : memref<8x8x128xi32, #tpu.memory_space<vmem>>, vector<1x8x128xi32>
    %370 = vector.shape_cast %369 : vector<1x8x128xi32> to vector<8x128xi32>
    %371 = vector.shape_cast %368 : vector<8x128xi32> to vector<1x8x128xi32>
    tpu.vector_store %arg7[%c4_72, %c0_73, %c0_74], %371 {strides = array<i32>} : memref<8x8x128xi32, #tpu.memory_space<vmem>>, vector<1x8x128xi32>,
    %372 = vector.shape_cast %364 : vector<1x128xi1> to vector<1x128xi1>
    %373 = vector.broadcast %372 : vector<1x128xi1> to vector<8x128xi1>
    %374 = arith.select %373, %362, %306 : vector<8x128xi1>, vector<8x128xf32>
    %375 = vector.extract_strided_slice %374 {offsets = [0, 0], sizes = [1, 128], strides = [1, 1]} : vector<8x128xf32> to vector<1x128xf32>
    %376 = vector.broadcast %375 : vector<1x128xf32> to vector<8x128xf32>
    %377 = arith.addf %376, %4 : vector<8x128xf32>
    %c0_i32_75 = arith.constant 0 : i32
    %378 = vector.broadcast %c0_i32_75 : i32 to vector<8x128xi32>
    %379 = vector.extract_strided_slice %374 {offsets = [1, 0], sizes = [1, 128], strides = [1, 1]} : vector<8x128xf32> to vector<1x128xf32>
    %380 = vector.broadcast %379 : vector<1x128xf32> to vector<8x128xf32>
    %381 = arith.addf %380, %7 : vector<8x128xf32>
    %382 = arith.cmpf ogt, %381, %377 : vector<8x128xf32>
    %383 = arith.select %382, %381, %377 : vector<8x128xi1>, vector<8x128xf32>
    %c1_i32_76 = arith.constant 1 : i32
    %384 = vector.broadcast %c1_i32_76 : i32 to vector<8x128xi32>
    %385 = arith.select %382, %384, %378 : vector<8x128xi1>, vector<8x128xi32>
    %386 = vector.extract_strided_slice %374 {offsets = [2, 0], sizes = [1, 128], strides = [1, 1]} : vector<8x128xf32> to vector<1x128xf32>
    %387 = vector.broadcast %386 : vector<1x128xf32> to vector<8x128xf32>
    %388 = arith.addf %387, %10 : vector<8x128xf32>
    %389 = arith.cmpf ogt, %388, %383 : vector<8x128xf32>
    %390 = arith.select %389, %388, %383 : vector<8x128xi1>, vector<8x128xf32>
    %c2_i32_77 = arith.constant 2 : i32
    %391 = vector.broadcast %c2_i32_77 : i32 to vector<8x128xi32>
    %392 = arith.select %389, %391, %385 : vector<8x128xi1>, vector<8x128xi32>
    %393 = vector.extract_strided_slice %374 {offsets = [3, 0], sizes = [1, 128], strides = [1, 1]} : vector<8x128xf32> to vector<1x128xf32>
    %394 = vector.broadcast %393 : vector<1x128xf32> to vector<8x128xf32>
    %395 = arith.addf %394, %13 : vector<8x128xf32>
    %396 = arith.cmpf ogt, %395, %390 : vector<8x128xf32>
    %397 = arith.select %396, %395, %390 : vector<8x128xi1>, vector<8x128xf32>
    %c3_i32_78 = arith.constant 3 : i32
    %398 = vector.broadcast %c3_i32_78 : i32 to vector<8x128xi32>
    %399 = arith.select %396, %398, %392 : vector<8x128xi1>, vector<8x128xi32>
    %400 = vector.extract_strided_slice %374 {offsets = [4, 0], sizes = [1, 128], strides = [1, 1]} : vector<8x128xf32> to vector<1x128xf32>
    %401 = vector.broadcast %400 : vector<1x128xf32> to vector<8x128xf32>
    %402 = arith.addf %401, %16 : vector<8x128xf32>
    %403 = arith.cmpf ogt, %402, %397 : vector<8x128xf32>
    %404 = arith.select %403, %402, %397 : vector<8x128xi1>, vector<8x128xf32>
    %c4_i32_79 = arith.constant 4 : i32
    %405 = vector.broadcast %c4_i32_79 : i32 to vector<8x128xi32>
    %406 = arith.select %403, %405, %399 : vector<8x128xi1>, vector<8x128xi32>
    %407 = vector.extract_strided_slice %374 {offsets = [5, 0], sizes = [1, 128], strides = [1, 1]} : vector<8x128xf32> to vector<1x128xf32>
    %408 = vector.broadcast %407 : vector<1x128xf32> to vector<8x128xf32>
    %409 = arith.addf %408, %19 : vector<8x128xf32>
    %410 = arith.cmpf ogt, %409, %404 : vector<8x128xf32>
    %411 = arith.select %410, %409, %404 : vector<8x128xi1>, vector<8x128xf32>
    %c5_i32_80 = arith.constant 5 : i32
    %412 = vector.broadcast %c5_i32_80 : i32 to vector<8x128xi32>
    %413 = arith.select %410, %412, %406 : vector<8x128xi1>, vector<8x128xi32>
    %414 = vector.extract_strided_slice %374 {offsets = [6, 0], sizes = [1, 128], strides = [1, 1]} : vector<8x128xf32> to vector<1x128xf32>
    %415 = vector.broadcast %414 : vector<1x128xf32> to vector<8x128xf32>
    %416 = arith.addf %415, %22 : vector<8x128xf32>
    %417 = arith.cmpf ogt, %416, %411 : vector<8x128xf32>
    %418 = arith.select %417, %416, %411 : vector<8x128xi1>, vector<8x128xf32>
    %c6_i32_81 = arith.constant 6 : i32
    %419 = vector.broadcast %c6_i32_81 : i32 to vector<8x128xi32>
    %420 = arith.select %417, %419, %413 : vector<8x128xi1>, vector<8x128xi32>
    %421 = vector.extract_strided_slice %374 {offsets = [7, 0], sizes = [1, 128], strides = [1, 1]} : vector<8x128xf32> to vector<1x128xf32>
    %422 = vector.broadcast %421 : vector<1x128xf32> to vector<8x128xf32>
    %423 = arith.addf %422, %25 : vector<8x128xf32>
    %424 = arith.cmpf ogt, %423, %418 : vector<8x128xf32>
    %425 = arith.select %424, %423, %418 : vector<8x128xi1>, vector<8x128xf32>
    %c7_i32_82 = arith.constant 7 : i32
    %426 = vector.broadcast %c7_i32_82 : i32 to vector<8x128xi32>
    %427 = arith.select %424, %426, %420 : vector<8x128xi1>, vector<8x128xi32>
    %c5 = arith.constant 5 : index
    %c0_83 = arith.constant 0 : index
    %c0_84 = arith.constant 0 : index
    %428 = vector.load %arg1[%c5, %c0_83, %c0_84] : memref<8x8x128xf32, #tpu.memory_space<vmem>>, vector<1x8x128xf32>
    %429 = vector.shape_cast %428 : vector<1x8x128xf32> to vector<8x128xf32>
    %430 = arith.addf %425, %429 : vector<8x128xf32>
    %c5_i32_85 = arith.constant 5 : i32
    %431 = vector.broadcast %c5_i32_85 : i32 to vector<1x128xi32>
    %432 = arith.cmpi sgt, %0, %431 : vector<1x128xi32>
    %c7_i32_86 = arith.constant 7 : i32
    %433 = vector.shape_cast %432 : vector<1x128xi1> to vector<1x128xi1>
    %434 = vector.broadcast %433 : vector<1x128xi1> to vector<8x128xi1>
    %435 = vector.broadcast %c7_i32_86 : i32 to vector<8x128xi32>
    %436 = arith.select %434, %427, %435 : vector<8x128xi1>, vector<8x128xi32>
    %c5_87 = arith.constant 5 : index
    %c0_88 = arith.constant 0 : index
    %c0_89 = arith.constant 0 : index
    %437 = vector.load %arg7[%c5_87, %c0_88, %c0_89] : memref<8x8x128xi32, #tpu.memory_space<vmem>>, vector<1x8x128xi32>
    %438 = vector.shape_cast %437 : vector<1x8x128xi32> to vector<8x128xi32>
    %439 = vector.shape_cast %436 : vector<8x128xi32> to vector<1x8x128xi32>
    tpu.vector_store %arg7[%c5_87, %c0_88, %c0_89], %439 {strides = array<i32>} : memref<8x8x128xi32, #tpu.memory_space<vmem>>, vector<1x8x128xi32>,
    %440 = vector.shape_cast %432 : vector<1x128xi1> to vector<1x128xi1>
    %441 = vector.broadcast %440 : vector<1x128xi1> to vector<8x128xi1>
    %442 = arith.select %441, %430, %374 : vector<8x128xi1>, vector<8x128xf32>
    %443 = vector.extract_strided_slice %442 {offsets = [0, 0], sizes = [1, 128], strides = [1, 1]} : vector<8x128xf32> to vector<1x128xf32>
    %444 = vector.broadcast %443 : vector<1x128xf32> to vector<8x128xf32>
    %445 = arith.addf %444, %4 : vector<8x128xf32>
    %c0_i32_90 = arith.constant 0 : i32
    %446 = vector.broadcast %c0_i32_90 : i32 to vector<8x128xi32>
    %447 = vector.extract_strided_slice %442 {offsets = [1, 0], sizes = [1, 128], strides = [1, 1]} : vector<8x128xf32> to vector<1x128xf32>
    %448 = vector.broadcast %447 : vector<1x128xf32> to vector<8x128xf32>
    %449 = arith.addf %448, %7 : vector<8x128xf32>
    %450 = arith.cmpf ogt, %449, %445 : vector<8x128xf32>
    %451 = arith.select %450, %449, %445 : vector<8x128xi1>, vector<8x128xf32>
    %c1_i32_91 = arith.constant 1 : i32
    %452 = vector.broadcast %c1_i32_91 : i32 to vector<8x128xi32>
    %453 = arith.select %450, %452, %446 : vector<8x128xi1>, vector<8x128xi32>
    %454 = vector.extract_strided_slice %442 {offsets = [2, 0], sizes = [1, 128], strides = [1, 1]} : vector<8x128xf32> to vector<1x128xf32>
    %455 = vector.broadcast %454 : vector<1x128xf32> to vector<8x128xf32>
    %456 = arith.addf %455, %10 : vector<8x128xf32>
    %457 = arith.cmpf ogt, %456, %451 : vector<8x128xf32>
    %458 = arith.select %457, %456, %451 : vector<8x128xi1>, vector<8x128xf32>
    %c2_i32_92 = arith.constant 2 : i32
    %459 = vector.broadcast %c2_i32_92 : i32 to vector<8x128xi32>
    %460 = arith.select %457, %459, %453 : vector<8x128xi1>, vector<8x128xi32>
    %461 = vector.extract_strided_slice %442 {offsets = [3, 0], sizes = [1, 128], strides = [1, 1]} : vector<8x128xf32> to vector<1x128xf32>
    %462 = vector.broadcast %461 : vector<1x128xf32> to vector<8x128xf32>
    %463 = arith.addf %462, %13 : vector<8x128xf32>
    %464 = arith.cmpf ogt, %463, %458 : vector<8x128xf32>
    %465 = arith.select %464, %463, %458 : vector<8x128xi1>, vector<8x128xf32>
    %c3_i32_93 = arith.constant 3 : i32
    %466 = vector.broadcast %c3_i32_93 : i32 to vector<8x128xi32>
    %467 = arith.select %464, %466, %460 : vector<8x128xi1>, vector<8x128xi32>
    %468 = vector.extract_strided_slice %442 {offsets = [4, 0], sizes = [1, 128], strides = [1, 1]} : vector<8x128xf32> to vector<1x128xf32>
    %469 = vector.broadcast %468 : vector<1x128xf32> to vector<8x128xf32>
    %470 = arith.addf %469, %16 : vector<8x128xf32>
    %471 = arith.cmpf ogt, %470, %465 : vector<8x128xf32>
    %472 = arith.select %471, %470, %465 : vector<8x128xi1>, vector<8x128xf32>
    %c4_i32_94 = arith.constant 4 : i32
    %473 = vector.broadcast %c4_i32_94 : i32 to vector<8x128xi32>
    %474 = arith.select %471, %473, %467 : vector<8x128xi1>, vector<8x128xi32>
    %475 = vector.extract_strided_slice %442 {offsets = [5, 0], sizes = [1, 128], strides = [1, 1]} : vector<8x128xf32> to vector<1x128xf32>
    %476 = vector.broadcast %475 : vector<1x128xf32> to vector<8x128xf32>
    %477 = arith.addf %476, %19 : vector<8x128xf32>
    %478 = arith.cmpf ogt, %477, %472 : vector<8x128xf32>
    %479 = arith.select %478, %477, %472 : vector<8x128xi1>, vector<8x128xf32>
    %c5_i32_95 = arith.constant 5 : i32
    %480 = vector.broadcast %c5_i32_95 : i32 to vector<8x128xi32>
    %481 = arith.select %478, %480, %474 : vector<8x128xi1>, vector<8x128xi32>
    %482 = vector.extract_strided_slice %442 {offsets = [6, 0], sizes = [1, 128], strides = [1, 1]} : vector<8x128xf32> to vector<1x128xf32>
    %483 = vector.broadcast %482 : vector<1x128xf32> to vector<8x128xf32>
    %484 = arith.addf %483, %22 : vector<8x128xf32>
    %485 = arith.cmpf ogt, %484, %479 : vector<8x128xf32>
    %486 = arith.select %485, %484, %479 : vector<8x128xi1>, vector<8x128xf32>
    %c6_i32_96 = arith.constant 6 : i32
    %487 = vector.broadcast %c6_i32_96 : i32 to vector<8x128xi32>
    %488 = arith.select %485, %487, %481 : vector<8x128xi1>, vector<8x128xi32>
    %489 = vector.extract_strided_slice %442 {offsets = [7, 0], sizes = [1, 128], strides = [1, 1]} : vector<8x128xf32> to vector<1x128xf32>
    %490 = vector.broadcast %489 : vector<1x128xf32> to vector<8x128xf32>
    %491 = arith.addf %490, %25 : vector<8x128xf32>
    %492 = arith.cmpf ogt, %491, %486 : vector<8x128xf32>
    %493 = arith.select %492, %491, %486 : vector<8x128xi1>, vector<8x128xf32>
    %c7_i32_97 = arith.constant 7 : i32
    %494 = vector.broadcast %c7_i32_97 : i32 to vector<8x128xi32>
    %495 = arith.select %492, %494, %488 : vector<8x128xi1>, vector<8x128xi32>
    %c6 = arith.constant 6 : index
    %c0_98 = arith.constant 0 : index
    %c0_99 = arith.constant 0 : index
    %496 = vector.load %arg1[%c6, %c0_98, %c0_99] : memref<8x8x128xf32, #tpu.memory_space<vmem>>, vector<1x8x128xf32>
    %497 = vector.shape_cast %496 : vector<1x8x128xf32> to vector<8x128xf32>
    %498 = arith.addf %493, %497 : vector<8x128xf32>
    %c6_i32_100 = arith.constant 6 : i32
    %499 = vector.broadcast %c6_i32_100 : i32 to vector<1x128xi32>
    %500 = arith.cmpi sgt, %0, %499 : vector<1x128xi32>
    %c7_i32_101 = arith.constant 7 : i32
    %501 = vector.shape_cast %500 : vector<1x128xi1> to vector<1x128xi1>
    %502 = vector.broadcast %501 : vector<1x128xi1> to vector<8x128xi1>
    %503 = vector.broadcast %c7_i32_101 : i32 to vector<8x128xi32>
    %504 = arith.select %502, %495, %503 : vector<8x128xi1>, vector<8x128xi32>
    %c6_102 = arith.constant 6 : index
    %c0_103 = arith.constant 0 : index
    %c0_104 = arith.constant 0 : index
    %505 = vector.load %arg7[%c6_102, %c0_103, %c0_104] : memref<8x8x128xi32, #tpu.memory_space<vmem>>, vector<1x8x128xi32>
    %506 = vector.shape_cast %505 : vector<1x8x128xi32> to vector<8x128xi32>
    %507 = vector.shape_cast %504 : vector<8x128xi32> to vector<1x8x128xi32>
    tpu.vector_store %arg7[%c6_102, %c0_103, %c0_104], %507 {strides = array<i32>} : memref<8x8x128xi32, #tpu.memory_space<vmem>>, vector<1x8x128xi32>,
    %508 = vector.shape_cast %500 : vector<1x128xi1> to vector<1x128xi1>
    %509 = vector.broadcast %508 : vector<1x128xi1> to vector<8x128xi1>
    %510 = arith.select %509, %498, %442 : vector<8x128xi1>, vector<8x128xf32>
    %511 = vector.extract_strided_slice %510 {offsets = [0, 0], sizes = [1, 128], strides = [1, 1]} : vector<8x128xf32> to vector<1x128xf32>
    %512 = vector.broadcast %511 : vector<1x128xf32> to vector<8x128xf32>
    %513 = arith.addf %512, %4 : vector<8x128xf32>
    %c0_i32_105 = arith.constant 0 : i32
    %514 = vector.broadcast %c0_i32_105 : i32 to vector<8x128xi32>
    %515 = vector.extract_strided_slice %510 {offsets = [1, 0], sizes = [1, 128], strides = [1, 1]} : vector<8x128xf32> to vector<1x128xf32>
    %516 = vector.broadcast %515 : vector<1x128xf32> to vector<8x128xf32>
    %517 = arith.addf %516, %7 : vector<8x128xf32>
    %518 = arith.cmpf ogt, %517, %513 : vector<8x128xf32>
    %519 = arith.select %518, %517, %513 : vector<8x128xi1>, vector<8x128xf32>
    %c1_i32_106 = arith.constant 1 : i32
    %520 = vector.broadcast %c1_i32_106 : i32 to vector<8x128xi32>
    %521 = arith.select %518, %520, %514 : vector<8x128xi1>, vector<8x128xi32>
    %522 = vector.extract_strided_slice %510 {offsets = [2, 0], sizes = [1, 128], strides = [1, 1]} : vector<8x128xf32> to vector<1x128xf32>
    %523 = vector.broadcast %522 : vector<1x128xf32> to vector<8x128xf32>
    %524 = arith.addf %523, %10 : vector<8x128xf32>
    %525 = arith.cmpf ogt, %524, %519 : vector<8x128xf32>
    %526 = arith.select %525, %524, %519 : vector<8x128xi1>, vector<8x128xf32>
    %c2_i32_107 = arith.constant 2 : i32
    %527 = vector.broadcast %c2_i32_107 : i32 to vector<8x128xi32>
    %528 = arith.select %525, %527, %521 : vector<8x128xi1>, vector<8x128xi32>
    %529 = vector.extract_strided_slice %510 {offsets = [3, 0], sizes = [1, 128], strides = [1, 1]} : vector<8x128xf32> to vector<1x128xf32>
    %530 = vector.broadcast %529 : vector<1x128xf32> to vector<8x128xf32>
    %531 = arith.addf %530, %13 : vector<8x128xf32>
    %532 = arith.cmpf ogt, %531, %526 : vector<8x128xf32>
    %533 = arith.select %532, %531, %526 : vector<8x128xi1>, vector<8x128xf32>
    %c3_i32_108 = arith.constant 3 : i32
    %534 = vector.broadcast %c3_i32_108 : i32 to vector<8x128xi32>
    %535 = arith.select %532, %534, %528 : vector<8x128xi1>, vector<8x128xi32>
    %536 = vector.extract_strided_slice %510 {offsets = [4, 0], sizes = [1, 128], strides = [1, 1]} : vector<8x128xf32> to vector<1x128xf32>
    %537 = vector.broadcast %536 : vector<1x128xf32> to vector<8x128xf32>
    %538 = arith.addf %537, %16 : vector<8x128xf32>
    %539 = arith.cmpf ogt, %538, %533 : vector<8x128xf32>
    %540 = arith.select %539, %538, %533 : vector<8x128xi1>, vector<8x128xf32>
    %c4_i32_109 = arith.constant 4 : i32
    %541 = vector.broadcast %c4_i32_109 : i32 to vector<8x128xi32>
    %542 = arith.select %539, %541, %535 : vector<8x128xi1>, vector<8x128xi32>
    %543 = vector.extract_strided_slice %510 {offsets = [5, 0], sizes = [1, 128], strides = [1, 1]} : vector<8x128xf32> to vector<1x128xf32>
    %544 = vector.broadcast %543 : vector<1x128xf32> to vector<8x128xf32>
    %545 = arith.addf %544, %19 : vector<8x128xf32>
    %546 = arith.cmpf ogt, %545, %540 : vector<8x128xf32>
    %547 = arith.select %546, %545, %540 : vector<8x128xi1>, vector<8x128xf32>
    %c5_i32_110 = arith.constant 5 : i32
    %548 = vector.broadcast %c5_i32_110 : i32 to vector<8x128xi32>
    %549 = arith.select %546, %548, %542 : vector<8x128xi1>, vector<8x128xi32>
    %550 = vector.extract_strided_slice %510 {offsets = [6, 0], sizes = [1, 128], strides = [1, 1]} : vector<8x128xf32> to vector<1x128xf32>
    %551 = vector.broadcast %550 : vector<1x128xf32> to vector<8x128xf32>
    %552 = arith.addf %551, %22 : vector<8x128xf32>
    %553 = arith.cmpf ogt, %552, %547 : vector<8x128xf32>
    %554 = arith.select %553, %552, %547 : vector<8x128xi1>, vector<8x128xf32>
    %c6_i32_111 = arith.constant 6 : i32
    %555 = vector.broadcast %c6_i32_111 : i32 to vector<8x128xi32>
    %556 = arith.select %553, %555, %549 : vector<8x128xi1>, vector<8x128xi32>
    %557 = vector.extract_strided_slice %510 {offsets = [7, 0], sizes = [1, 128], strides = [1, 1]} : vector<8x128xf32> to vector<1x128xf32>
    %558 = vector.broadcast %557 : vector<1x128xf32> to vector<8x128xf32>
    %559 = arith.addf %558, %25 : vector<8x128xf32>
    %560 = arith.cmpf ogt, %559, %554 : vector<8x128xf32>
    %561 = arith.select %560, %559, %554 : vector<8x128xi1>, vector<8x128xf32>
    %c7_i32_112 = arith.constant 7 : i32
    %562 = vector.broadcast %c7_i32_112 : i32 to vector<8x128xi32>
    %563 = arith.select %560, %562, %556 : vector<8x128xi1>, vector<8x128xi32>
    %c7 = arith.constant 7 : index
    %c0_113 = arith.constant 0 : index
    %c0_114 = arith.constant 0 : index
    %564 = vector.load %arg1[%c7, %c0_113, %c0_114] : memref<8x8x128xf32, #tpu.memory_space<vmem>>, vector<1x8x128xf32>
    %565 = vector.shape_cast %564 : vector<1x8x128xf32> to vector<8x128xf32>
    %566 = arith.addf %561, %565 : vector<8x128xf32>
    %c7_i32_115 = arith.constant 7 : i32
    %567 = vector.broadcast %c7_i32_115 : i32 to vector<1x128xi32>
    %568 = arith.cmpi sgt, %0, %567 : vector<1x128xi32>
    %c7_i32_116 = arith.constant 7 : i32
    %569 = vector.shape_cast %568 : vector<1x128xi1> to vector<1x128xi1>
    %570 = vector.broadcast %569 : vector<1x128xi1> to vector<8x128xi1>
    %571 = vector.broadcast %c7_i32_116 : i32 to vector<8x128xi32>
    %572 = arith.select %570, %563, %571 : vector<8x128xi1>, vector<8x128xi32>
    %c7_117 = arith.constant 7 : index
    %c0_118 = arith.constant 0 : index
    %c0_119 = arith.constant 0 : index
    %573 = vector.load %arg7[%c7_117, %c0_118, %c0_119] : memref<8x8x128xi32, #tpu.memory_space<vmem>>, vector<1x8x128xi32>
    %574 = vector.shape_cast %573 : vector<1x8x128xi32> to vector<8x128xi32>
    %575 = vector.shape_cast %572 : vector<8x128xi32> to vector<1x8x128xi32>
    tpu.vector_store %arg7[%c7_117, %c0_118, %c0_119], %575 {strides = array<i32>} : memref<8x8x128xi32, #tpu.memory_space<vmem>>, vector<1x8x128xi32>,
    %576 = vector.shape_cast %568 : vector<1x128xi1> to vector<1x128xi1>
    %577 = vector.broadcast %576 : vector<1x128xi1> to vector<8x128xi1>
    %578 = arith.select %577, %566, %510 : vector<8x128xi1>, vector<8x128xf32>
    %579 = arith.addf %578, %28 : vector<8x128xf32>
    %580 = vector.extract_strided_slice %579 {offsets = [0, 0], sizes = [1, 128], strides = [1, 1]} : vector<8x128xf32> to vector<1x128xf32>
    %c0_i32_120 = arith.constant 0 : i32
    %581 = vector.broadcast %c0_i32_120 : i32 to vector<1x128xi32>
    %582 = vector.extract_strided_slice %579 {offsets = [1, 0], sizes = [1, 128], strides = [1, 1]} : vector<8x128xf32> to vector<1x128xf32>
    %583 = arith.cmpf ogt, %582, %580 : vector<1x128xf32>
    %584 = arith.select %583, %582, %580 : vector<1x128xi1>, vector<1x128xf32>
    %c1_i32_121 = arith.constant 1 : i32
    %585 = vector.broadcast %c1_i32_121 : i32 to vector<1x128xi32>
    %586 = arith.select %583, %585, %581 : vector<1x128xi1>, vector<1x128xi32>
    %587 = vector.extract_strided_slice %579 {offsets = [2, 0], sizes = [1, 128], strides = [1, 1]} : vector<8x128xf32> to vector<1x128xf32>
    %588 = arith.cmpf ogt, %587, %584 : vector<1x128xf32>
    %589 = arith.select %588, %587, %584 : vector<1x128xi1>, vector<1x128xf32>
    %c2_i32_122 = arith.constant 2 : i32
    %590 = vector.broadcast %c2_i32_122 : i32 to vector<1x128xi32>
    %591 = arith.select %588, %590, %586 : vector<1x128xi1>, vector<1x128xi32>
    %592 = vector.extract_strided_slice %579 {offsets = [3, 0], sizes = [1, 128], strides = [1, 1]} : vector<8x128xf32> to vector<1x128xf32>
    %593 = arith.cmpf ogt, %592, %589 : vector<1x128xf32>
    %594 = arith.select %593, %592, %589 : vector<1x128xi1>, vector<1x128xf32>
    %c3_i32_123 = arith.constant 3 : i32
    %595 = vector.broadcast %c3_i32_123 : i32 to vector<1x128xi32>
    %596 = arith.select %593, %595, %591 : vector<1x128xi1>, vector<1x128xi32>
    %597 = vector.extract_strided_slice %579 {offsets = [4, 0], sizes = [1, 128], strides = [1, 1]} : vector<8x128xf32> to vector<1x128xf32>
    %598 = arith.cmpf ogt, %597, %594 : vector<1x128xf32>
    %599 = arith.select %598, %597, %594 : vector<1x128xi1>, vector<1x128xf32>
    %c4_i32_124 = arith.constant 4 : i32
    %600 = vector.broadcast %c4_i32_124 : i32 to vector<1x128xi32>
    %601 = arith.select %598, %600, %596 : vector<1x128xi1>, vector<1x128xi32>
    %602 = vector.extract_strided_slice %579 {offsets = [5, 0], sizes = [1, 128], strides = [1, 1]} : vector<8x128xf32> to vector<1x128xf32>
    %603 = arith.cmpf ogt, %602, %599 : vector<1x128xf32>
    %604 = arith.select %603, %602, %599 : vector<1x128xi1>, vector<1x128xf32>
    %c5_i32_125 = arith.constant 5 : i32
    %605 = vector.broadcast %c5_i32_125 : i32 to vector<1x128xi32>
    %606 = arith.select %603, %605, %601 : vector<1x128xi1>, vector<1x128xi32>
    %607 = vector.extract_strided_slice %579 {offsets = [6, 0], sizes = [1, 128], strides = [1, 1]} : vector<8x128xf32> to vector<1x128xf32>
    %608 = arith.cmpf ogt, %607, %604 : vector<1x128xf32>
    %609 = arith.select %608, %607, %604 : vector<1x128xi1>, vector<1x128xf32>
    %c6_i32_126 = arith.constant 6 : i32
    %610 = vector.broadcast %c6_i32_126 : i32 to vector<1x128xi32>
    %611 = arith.select %608, %610, %606 : vector<1x128xi1>, vector<1x128xi32>
    %612 = vector.extract_strided_slice %579 {offsets = [7, 0], sizes = [1, 128], strides = [1, 1]} : vector<8x128xf32> to vector<1x128xf32>
    %613 = arith.cmpf ogt, %612, %609 : vector<1x128xf32>
    %614 = arith.select %613, %612, %609 : vector<1x128xi1>, vector<1x128xf32>
    %c7_i32_127 = arith.constant 7 : i32
    %615 = vector.broadcast %c7_i32_127 : i32 to vector<1x128xi32>
    %616 = arith.select %613, %615, %611 : vector<1x128xi1>, vector<1x128xi32>
    %c0_128 = arith.constant 0 : index
    %c0_129 = arith.constant 0 : index
    %617 = vector.load %arg6[%c0_128, %c0_129] : memref<1x128xf32, #tpu.memory_space<vmem>>, vector<1x128xf32>
    tpu.vector_store %arg6[%c0_128, %c0_129], %614 {strides = array<i32>} : memref<1x128xf32, #tpu.memory_space<vmem>>, vector<1x128xf32>,
    %c7_130 = arith.constant 7 : index
    %c0_131 = arith.constant 0 : index
    %c0_132 = arith.constant 0 : index
    %618 = vector.load %arg7[%c7_130, %c0_131, %c0_132] : memref<8x8x128xi32, #tpu.memory_space<vmem>>, vector<1x8x128xi32>
    %619 = vector.shape_cast %618 : vector<1x8x128xi32> to vector<8x128xi32>
    %620 = vector.extract_strided_slice %619 {offsets = [0, 0], sizes = [1, 128], strides = [1, 1]} : vector<8x128xi32> to vector<1x128xi32>
    %c1_i32_133 = arith.constant 1 : i32
    %621 = vector.broadcast %c1_i32_133 : i32 to vector<1x128xi32>
    %622 = arith.cmpi eq, %616, %621 : vector<1x128xi32>
    %623 = vector.extract_strided_slice %619 {offsets = [1, 0], sizes = [1, 128], strides = [1, 1]} : vector<8x128xi32> to vector<1x128xi32>
    %624 = arith.select %622, %623, %620 : vector<1x128xi1>, vector<1x128xi32>
    %c2_i32_134 = arith.constant 2 : i32
    %625 = vector.broadcast %c2_i32_134 : i32 to vector<1x128xi32>
    %626 = arith.cmpi eq, %616, %625 : vector<1x128xi32>
    %627 = vector.extract_strided_slice %619 {offsets = [2, 0], sizes = [1, 128], strides = [1, 1]} : vector<8x128xi32> to vector<1x128xi32>
    %628 = arith.select %626, %627, %624 : vector<1x128xi1>, vector<1x128xi32>
    %c3_i32_135 = arith.constant 3 : i32
    %629 = vector.broadcast %c3_i32_135 : i32 to vector<1x128xi32>
    %630 = arith.cmpi eq, %616, %629 : vector<1x128xi32>
    %631 = vector.extract_strided_slice %619 {offsets = [3, 0], sizes = [1, 128], strides = [1, 1]} : vector<8x128xi32> to vector<1x128xi32>
    %632 = arith.select %630, %631, %628 : vector<1x128xi1>, vector<1x128xi32>
    %c4_i32_136 = arith.constant 4 : i32
    %633 = vector.broadcast %c4_i32_136 : i32 to vector<1x128xi32>
    %634 = arith.cmpi eq, %616, %633 : vector<1x128xi32>
    %635 = vector.extract_strided_slice %619 {offsets = [4, 0], sizes = [1, 128], strides = [1, 1]} : vector<8x128xi32> to vector<1x128xi32>
    %636 = arith.select %634, %635, %632 : vector<1x128xi1>, vector<1x128xi32>
    %c5_i32_137 = arith.constant 5 : i32
    %637 = vector.broadcast %c5_i32_137 : i32 to vector<1x128xi32>
    %638 = arith.cmpi eq, %616, %637 : vector<1x128xi32>
    %639 = vector.extract_strided_slice %619 {offsets = [5, 0], sizes = [1, 128], strides = [1, 1]} : vector<8x128xi32> to vector<1x128xi32>
    %640 = arith.select %638, %639, %636 : vector<1x128xi1>, vector<1x128xi32>
    %c6_i32_138 = arith.constant 6 : i32
    %641 = vector.broadcast %c6_i32_138 : i32 to vector<1x128xi32>
    %642 = arith.cmpi eq, %616, %641 : vector<1x128xi32>
    %643 = vector.extract_strided_slice %619 {offsets = [6, 0], sizes = [1, 128], strides = [1, 1]} : vector<8x128xi32> to vector<1x128xi32>
    %644 = arith.select %642, %643, %640 : vector<1x128xi1>, vector<1x128xi32>
    %c7_i32_139 = arith.constant 7 : i32
    %645 = vector.broadcast %c7_i32_139 : i32 to vector<1x128xi32>
    %646 = arith.cmpi eq, %616, %645 : vector<1x128xi32>
    %647 = vector.extract_strided_slice %619 {offsets = [7, 0], sizes = [1, 128], strides = [1, 1]} : vector<8x128xi32> to vector<1x128xi32>
    %648 = arith.select %646, %647, %644 : vector<1x128xi1>, vector<1x128xi32>
    %c1_i32_140 = arith.constant 1 : i32
    %649 = vector.broadcast %c1_i32_140 : i32 to vector<1x128xi32>
    %650 = arith.subi %0, %649 : vector<1x128xi32>
    %c7_i32_141 = arith.constant 7 : i32
    %651 = vector.broadcast %c7_i32_141 : i32 to vector<1x128xi32>
    %652 = arith.cmpi sgt, %650, %651 : vector<1x128xi32>
    %653 = arith.select %652, %648, %616 : vector<1x128xi1>, vector<1x128xi32>
    %c1_i32_142 = arith.constant 1 : i32
    %654 = vector.broadcast %c1_i32_142 : i32 to vector<1x128xi32>
    %655 = arith.subi %0, %654 : vector<1x128xi32>
    %c7_i32_143 = arith.constant 7 : i32
    %656 = vector.broadcast %c7_i32_143 : i32 to vector<1x128xi32>
    %657 = arith.cmpi sge, %655, %656 : vector<1x128xi32>
    %c7_i32_144 = arith.constant 7 : i32
    %658 = vector.broadcast %c7_i32_144 : i32 to vector<1x128xi32>
    %659 = arith.select %657, %653, %658 : vector<1x128xi1>, vector<1x128xi32>
    %c7_145 = arith.constant 7 : index
    %c0_146 = arith.constant 0 : index
    %660 = vector.load %arg5[%c7_145, %c0_146] : memref<8x128xi32, #tpu.memory_space<vmem>>, vector<1x128xi32>
    tpu.vector_store %arg5[%c7_145, %c0_146], %659 {strides = array<i32>} : memref<8x128xi32, #tpu.memory_space<vmem>>, vector<1x128xi32>,
    %c7_147 = arith.constant 7 : index
    %c0_148 = arith.constant 0 : index
    %c0_149 = arith.constant 0 : index
    %661 = vector.load %arg7[%c7_147, %c0_148, %c0_149] : memref<8x8x128xi32, #tpu.memory_space<vmem>>, vector<1x8x128xi32>
    %662 = vector.shape_cast %661 : vector<1x8x128xi32> to vector<8x128xi32>
    %663 = vector.extract_strided_slice %662 {offsets = [0, 0], sizes = [1, 128], strides = [1, 1]} : vector<8x128xi32> to vector<1x128xi32>
    %c1_i32_150 = arith.constant 1 : i32
    %664 = vector.broadcast %c1_i32_150 : i32 to vector<1x128xi32>
    %665 = arith.cmpi eq, %653, %664 : vector<1x128xi32>
    %666 = vector.extract_strided_slice %662 {offsets = [1, 0], sizes = [1, 128], strides = [1, 1]} : vector<8x128xi32> to vector<1x128xi32>
    %667 = arith.select %665, %666, %663 : vector<1x128xi1>, vector<1x128xi32>
    %c2_i32_151 = arith.constant 2 : i32
    %668 = vector.broadcast %c2_i32_151 : i32 to vector<1x128xi32>
    %669 = arith.cmpi eq, %653, %668 : vector<1x128xi32>
    %670 = vector.extract_strided_slice %662 {offsets = [2, 0], sizes = [1, 128], strides = [1, 1]} : vector<8x128xi32> to vector<1x128xi32>
    %671 = arith.select %669, %670, %667 : vector<1x128xi1>, vector<1x128xi32>
    %c3_i32_152 = arith.constant 3 : i32
    %672 = vector.broadcast %c3_i32_152 : i32 to vector<1x128xi32>
    %673 = arith.cmpi eq, %653, %672 : vector<1x128xi32>
    %674 = vector.extract_strided_slice %662 {offsets = [3, 0], sizes = [1, 128], strides = [1, 1]} : vector<8x128xi32> to vector<1x128xi32>
    %675 = arith.select %673, %674, %671 : vector<1x128xi1>, vector<1x128xi32>
    %c4_i32_153 = arith.constant 4 : i32
    %676 = vector.broadcast %c4_i32_153 : i32 to vector<1x128xi32>
    %677 = arith.cmpi eq, %653, %676 : vector<1x128xi32>
    %678 = vector.extract_strided_slice %662 {offsets = [4, 0], sizes = [1, 128], strides = [1, 1]} : vector<8x128xi32> to vector<1x128xi32>
    %679 = arith.select %677, %678, %675 : vector<1x128xi1>, vector<1x128xi32>
    %c5_i32_154 = arith.constant 5 : i32
    %680 = vector.broadcast %c5_i32_154 : i32 to vector<1x128xi32>
    %681 = arith.cmpi eq, %653, %680 : vector<1x128xi32>
    %682 = vector.extract_strided_slice %662 {offsets = [5, 0], sizes = [1, 128], strides = [1, 1]} : vector<8x128xi32> to vector<1x128xi32>
    %683 = arith.select %681, %682, %679 : vector<1x128xi1>, vector<1x128xi32>
    %c6_i32_155 = arith.constant 6 : i32
    %684 = vector.broadcast %c6_i32_155 : i32 to vector<1x128xi32>
    %685 = arith.cmpi eq, %653, %684 : vector<1x128xi32>
    %686 = vector.extract_strided_slice %662 {offsets = [6, 0], sizes = [1, 128], strides = [1, 1]} : vector<8x128xi32> to vector<1x128xi32>
    %687 = arith.select %685, %686, %683 : vector<1x128xi1>, vector<1x128xi32>
    %c7_i32_156 = arith.constant 7 : i32
    %688 = vector.broadcast %c7_i32_156 : i32 to vector<1x128xi32>
    %689 = arith.cmpi eq, %653, %688 : vector<1x128xi32>
    %690 = vector.extract_strided_slice %662 {offsets = [7, 0], sizes = [1, 128], strides = [1, 1]} : vector<8x128xi32> to vector<1x128xi32>
    %691 = arith.select %689, %690, %687 : vector<1x128xi1>, vector<1x128xi32>
    %c1_i32_157 = arith.constant 1 : i32
    %692 = vector.broadcast %c1_i32_157 : i32 to vector<1x128xi32>
    %693 = arith.subi %0, %692 : vector<1x128xi32>
    %c6_i32_158 = arith.constant 6 : i32
    %694 = vector.broadcast %c6_i32_158 : i32 to vector<1x128xi32>
    %695 = arith.cmpi sgt, %693, %694 : vector<1x128xi32>
    %696 = arith.select %695, %691, %653 : vector<1x128xi1>, vector<1x128xi32>
    %c1_i32_159 = arith.constant 1 : i32
    %697 = vector.broadcast %c1_i32_159 : i32 to vector<1x128xi32>
    %698 = arith.subi %0, %697 : vector<1x128xi32>
    %c6_i32_160 = arith.constant 6 : i32
    %699 = vector.broadcast %c6_i32_160 : i32 to vector<1x128xi32>
    %700 = arith.cmpi sge, %698, %699 : vector<1x128xi32>
    %c7_i32_161 = arith.constant 7 : i32
    %701 = vector.broadcast %c7_i32_161 : i32 to vector<1x128xi32>
    %702 = arith.select %700, %696, %701 : vector<1x128xi1>, vector<1x128xi32>
    %c6_162 = arith.constant 6 : index
    %c0_163 = arith.constant 0 : index
    %703 = vector.load %arg5[%c6_162, %c0_163] : memref<8x128xi32, #tpu.memory_space<vmem>>, vector<1x128xi32>
    tpu.vector_store %arg5[%c6_162, %c0_163], %702 {strides = array<i32>} : memref<8x128xi32, #tpu.memory_space<vmem>>, vector<1x128xi32>,
    %c6_164 = arith.constant 6 : index
    %c0_165 = arith.constant 0 : index
    %c0_166 = arith.constant 0 : index
    %704 = vector.load %arg7[%c6_164, %c0_165, %c0_166] : memref<8x8x128xi32, #tpu.memory_space<vmem>>, vector<1x8x128xi32>
    %705 = vector.shape_cast %704 : vector<1x8x128xi32> to vector<8x128xi32>
    %706 = vector.extract_strided_slice %705 {offsets = [0, 0], sizes = [1, 128], strides = [1, 1]} : vector<8x128xi32> to vector<1x128xi32>
    %c1_i32_167 = arith.constant 1 : i32
    %707 = vector.broadcast %c1_i32_167 : i32 to vector<1x128xi32>
    %708 = arith.cmpi eq, %696, %707 : vector<1x128xi32>
    %709 = vector.extract_strided_slice %705 {offsets = [1, 0], sizes = [1, 128], strides = [1, 1]} : vector<8x128xi32> to vector<1x128xi32>
    %710 = arith.select %708, %709, %706 : vector<1x128xi1>, vector<1x128xi32>
    %c2_i32_168 = arith.constant 2 : i32
    %711 = vector.broadcast %c2_i32_168 : i32 to vector<1x128xi32>
    %712 = arith.cmpi eq, %696, %711 : vector<1x128xi32>
    %713 = vector.extract_strided_slice %705 {offsets = [2, 0], sizes = [1, 128], strides = [1, 1]} : vector<8x128xi32> to vector<1x128xi32>
    %714 = arith.select %712, %713, %710 : vector<1x128xi1>, vector<1x128xi32>
    %c3_i32_169 = arith.constant 3 : i32
    %715 = vector.broadcast %c3_i32_169 : i32 to vector<1x128xi32>
    %716 = arith.cmpi eq, %696, %715 : vector<1x128xi32>
    %717 = vector.extract_strided_slice %705 {offsets = [3, 0], sizes = [1, 128], strides = [1, 1]} : vector<8x128xi32> to vector<1x128xi32>
    %718 = arith.select %716, %717, %714 : vector<1x128xi1>, vector<1x128xi32>
    %c4_i32_170 = arith.constant 4 : i32
    %719 = vector.broadcast %c4_i32_170 : i32 to vector<1x128xi32>
    %720 = arith.cmpi eq, %696, %719 : vector<1x128xi32>
    %721 = vector.extract_strided_slice %705 {offsets = [4, 0], sizes = [1, 128], strides = [1, 1]} : vector<8x128xi32> to vector<1x128xi32>
    %722 = arith.select %720, %721, %718 : vector<1x128xi1>, vector<1x128xi32>
    %c5_i32_171 = arith.constant 5 : i32
    %723 = vector.broadcast %c5_i32_171 : i32 to vector<1x128xi32>
    %724 = arith.cmpi eq, %696, %723 : vector<1x128xi32>
    %725 = vector.extract_strided_slice %705 {offsets = [5, 0], sizes = [1, 128], strides = [1, 1]} : vector<8x128xi32> to vector<1x128xi32>
    %726 = arith.select %724, %725, %722 : vector<1x128xi1>, vector<1x128xi32>
    %c6_i32_172 = arith.constant 6 : i32
    %727 = vector.broadcast %c6_i32_172 : i32 to vector<1x128xi32>
    %728 = arith.cmpi eq, %696, %727 : vector<1x128xi32>
    %729 = vector.extract_strided_slice %705 {offsets = [6, 0], sizes = [1, 128], strides = [1, 1]} : vector<8x128xi32> to vector<1x128xi32>
    %730 = arith.select %728, %729, %726 : vector<1x128xi1>, vector<1x128xi32>
    %c7_i32_173 = arith.constant 7 : i32
    %731 = vector.broadcast %c7_i32_173 : i32 to vector<1x128xi32>
    %732 = arith.cmpi eq, %696, %731 : vector<1x128xi32>
    %733 = vector.extract_strided_slice %705 {offsets = [7, 0], sizes = [1, 128], strides = [1, 1]} : vector<8x128xi32> to vector<1x128xi32>
    %734 = arith.select %732, %733, %730 : vector<1x128xi1>, vector<1x128xi32>
    %c1_i32_174 = arith.constant 1 : i32
    %735 = vector.broadcast %c1_i32_174 : i32 to vector<1x128xi32>
    %736 = arith.subi %0, %735 : vector<1x128xi32>
    %c5_i32_175 = arith.constant 5 : i32
    %737 = vector.broadcast %c5_i32_175 : i32 to vector<1x128xi32>
    %738 = arith.cmpi sgt, %736, %737 : vector<1x128xi32>
    %739 = arith.select %738, %734, %696 : vector<1x128xi1>, vector<1x128xi32>
    %c1_i32_176 = arith.constant 1 : i32
    %740 = vector.broadcast %c1_i32_176 : i32 to vector<1x128xi32>
    %741 = arith.subi %0, %740 : vector<1x128xi32>
    %c5_i32_177 = arith.constant 5 : i32
    %742 = vector.broadcast %c5_i32_177 : i32 to vector<1x128xi32>
    %743 = arith.cmpi sge, %741, %742 : vector<1x128xi32>
    %c7_i32_178 = arith.constant 7 : i32
    %744 = vector.broadcast %c7_i32_178 : i32 to vector<1x128xi32>
    %745 = arith.select %743, %739, %744 : vector<1x128xi1>, vector<1x128xi32>
    %c5_179 = arith.constant 5 : index
    %c0_180 = arith.constant 0 : index
    %746 = vector.load %arg5[%c5_179, %c0_180] : memref<8x128xi32, #tpu.memory_space<vmem>>, vector<1x128xi32>
    tpu.vector_store %arg5[%c5_179, %c0_180], %745 {strides = array<i32>} : memref<8x128xi32, #tpu.memory_space<vmem>>, vector<1x128xi32>,
    %c5_181 = arith.constant 5 : index
    %c0_182 = arith.constant 0 : index
    %c0_183 = arith.constant 0 : index
    %747 = vector.load %arg7[%c5_181, %c0_182, %c0_183] : memref<8x8x128xi32, #tpu.memory_space<vmem>>, vector<1x8x128xi32>
    %748 = vector.shape_cast %747 : vector<1x8x128xi32> to vector<8x128xi32>
    %749 = vector.extract_strided_slice %748 {offsets = [0, 0], sizes = [1, 128], strides = [1, 1]} : vector<8x128xi32> to vector<1x128xi32>
    %c1_i32_184 = arith.constant 1 : i32
    %750 = vector.broadcast %c1_i32_184 : i32 to vector<1x128xi32>
    %751 = arith.cmpi eq, %739, %750 : vector<1x128xi32>
    %752 = vector.extract_strided_slice %748 {offsets = [1, 0], sizes = [1, 128], strides = [1, 1]} : vector<8x128xi32> to vector<1x128xi32>
    %753 = arith.select %751, %752, %749 : vector<1x128xi1>, vector<1x128xi32>
    %c2_i32_185 = arith.constant 2 : i32
    %754 = vector.broadcast %c2_i32_185 : i32 to vector<1x128xi32>
    %755 = arith.cmpi eq, %739, %754 : vector<1x128xi32>
    %756 = vector.extract_strided_slice %748 {offsets = [2, 0], sizes = [1, 128], strides = [1, 1]} : vector<8x128xi32> to vector<1x128xi32>
    %757 = arith.select %755, %756, %753 : vector<1x128xi1>, vector<1x128xi32>
    %c3_i32_186 = arith.constant 3 : i32
    %758 = vector.broadcast %c3_i32_186 : i32 to vector<1x128xi32>
    %759 = arith.cmpi eq, %739, %758 : vector<1x128xi32>
    %760 = vector.extract_strided_slice %748 {offsets = [3, 0], sizes = [1, 128], strides = [1, 1]} : vector<8x128xi32> to vector<1x128xi32>
    %761 = arith.select %759, %760, %757 : vector<1x128xi1>, vector<1x128xi32>
    %c4_i32_187 = arith.constant 4 : i32
    %762 = vector.broadcast %c4_i32_187 : i32 to vector<1x128xi32>
    %763 = arith.cmpi eq, %739, %762 : vector<1x128xi32>
    %764 = vector.extract_strided_slice %748 {offsets = [4, 0], sizes = [1, 128], strides = [1, 1]} : vector<8x128xi32> to vector<1x128xi32>
    %765 = arith.select %763, %764, %761 : vector<1x128xi1>, vector<1x128xi32>
    %c5_i32_188 = arith.constant 5 : i32
    %766 = vector.broadcast %c5_i32_188 : i32 to vector<1x128xi32>
    %767 = arith.cmpi eq, %739, %766 : vector<1x128xi32>
    %768 = vector.extract_strided_slice %748 {offsets = [5, 0], sizes = [1, 128], strides = [1, 1]} : vector<8x128xi32> to vector<1x128xi32>
    %769 = arith.select %767, %768, %765 : vector<1x128xi1>, vector<1x128xi32>
    %c6_i32_189 = arith.constant 6 : i32
    %770 = vector.broadcast %c6_i32_189 : i32 to vector<1x128xi32>
    %771 = arith.cmpi eq, %739, %770 : vector<1x128xi32>
    %772 = vector.extract_strided_slice %748 {offsets = [6, 0], sizes = [1, 128], strides = [1, 1]} : vector<8x128xi32> to vector<1x128xi32>
    %773 = arith.select %771, %772, %769 : vector<1x128xi1>, vector<1x128xi32>
    %c7_i32_190 = arith.constant 7 : i32
    %774 = vector.broadcast %c7_i32_190 : i32 to vector<1x128xi32>
    %775 = arith.cmpi eq, %739, %774 : vector<1x128xi32>
    %776 = vector.extract_strided_slice %748 {offsets = [7, 0], sizes = [1, 128], strides = [1, 1]} : vector<8x128xi32> to vector<1x128xi32>
    %777 = arith.select %775, %776, %773 : vector<1x128xi1>, vector<1x128xi32>
    %c1_i32_191 = arith.constant 1 : i32
    %778 = vector.broadcast %c1_i32_191 : i32 to vector<1x128xi32>
    %779 = arith.subi %0, %778 : vector<1x128xi32>
    %c4_i32_192 = arith.constant 4 : i32
    %780 = vector.broadcast %c4_i32_192 : i32 to vector<1x128xi32>
    %781 = arith.cmpi sgt, %779, %780 : vector<1x128xi32>
    %782 = arith.select %781, %777, %739 : vector<1x128xi1>, vector<1x128xi32>
    %c1_i32_193 = arith.constant 1 : i32
    %783 = vector.broadcast %c1_i32_193 : i32 to vector<1x128xi32>
    %784 = arith.subi %0, %783 : vector<1x128xi32>
    %c4_i32_194 = arith.constant 4 : i32
    %785 = vector.broadcast %c4_i32_194 : i32 to vector<1x128xi32>
    %786 = arith.cmpi sge, %784, %785 : vector<1x128xi32>
    %c7_i32_195 = arith.constant 7 : i32
    %787 = vector.broadcast %c7_i32_195 : i32 to vector<1x128xi32>
    %788 = arith.select %786, %782, %787 : vector<1x128xi1>, vector<1x128xi32>
    %c4_196 = arith.constant 4 : index
    %c0_197 = arith.constant 0 : index
    %789 = vector.load %arg5[%c4_196, %c0_197] : memref<8x128xi32, #tpu.memory_space<vmem>>, vector<1x128xi32>
    tpu.vector_store %arg5[%c4_196, %c0_197], %788 {strides = array<i32>} : memref<8x128xi32, #tpu.memory_space<vmem>>, vector<1x128xi32>,
    %c4_198 = arith.constant 4 : index
    %c0_199 = arith.constant 0 : index
    %c0_200 = arith.constant 0 : index
    %790 = vector.load %arg7[%c4_198, %c0_199, %c0_200] : memref<8x8x128xi32, #tpu.memory_space<vmem>>, vector<1x8x128xi32>
    %791 = vector.shape_cast %790 : vector<1x8x128xi32> to vector<8x128xi32>
    %792 = vector.extract_strided_slice %791 {offsets = [0, 0], sizes = [1, 128], strides = [1, 1]} : vector<8x128xi32> to vector<1x128xi32>
    %c1_i32_201 = arith.constant 1 : i32
    %793 = vector.broadcast %c1_i32_201 : i32 to vector<1x128xi32>
    %794 = arith.cmpi eq, %782, %793 : vector<1x128xi32>
    %795 = vector.extract_strided_slice %791 {offsets = [1, 0], sizes = [1, 128], strides = [1, 1]} : vector<8x128xi32> to vector<1x128xi32>
    %796 = arith.select %794, %795, %792 : vector<1x128xi1>, vector<1x128xi32>
    %c2_i32_202 = arith.constant 2 : i32
    %797 = vector.broadcast %c2_i32_202 : i32 to vector<1x128xi32>
    %798 = arith.cmpi eq, %782, %797 : vector<1x128xi32>
    %799 = vector.extract_strided_slice %791 {offsets = [2, 0], sizes = [1, 128], strides = [1, 1]} : vector<8x128xi32> to vector<1x128xi32>
    %800 = arith.select %798, %799, %796 : vector<1x128xi1>, vector<1x128xi32>
    %c3_i32_203 = arith.constant 3 : i32
    %801 = vector.broadcast %c3_i32_203 : i32 to vector<1x128xi32>
    %802 = arith.cmpi eq, %782, %801 : vector<1x128xi32>
    %803 = vector.extract_strided_slice %791 {offsets = [3, 0], sizes = [1, 128], strides = [1, 1]} : vector<8x128xi32> to vector<1x128xi32>
    %804 = arith.select %802, %803, %800 : vector<1x128xi1>, vector<1x128xi32>
    %c4_i32_204 = arith.constant 4 : i32
    %805 = vector.broadcast %c4_i32_204 : i32 to vector<1x128xi32>
    %806 = arith.cmpi eq, %782, %805 : vector<1x128xi32>
    %807 = vector.extract_strided_slice %791 {offsets = [4, 0], sizes = [1, 128], strides = [1, 1]} : vector<8x128xi32> to vector<1x128xi32>
    %808 = arith.select %806, %807, %804 : vector<1x128xi1>, vector<1x128xi32>
    %c5_i32_205 = arith.constant 5 : i32
    %809 = vector.broadcast %c5_i32_205 : i32 to vector<1x128xi32>
    %810 = arith.cmpi eq, %782, %809 : vector<1x128xi32>
    %811 = vector.extract_strided_slice %791 {offsets = [5, 0], sizes = [1, 128], strides = [1, 1]} : vector<8x128xi32> to vector<1x128xi32>
    %812 = arith.select %810, %811, %808 : vector<1x128xi1>, vector<1x128xi32>
    %c6_i32_206 = arith.constant 6 : i32
    %813 = vector.broadcast %c6_i32_206 : i32 to vector<1x128xi32>
    %814 = arith.cmpi eq, %782, %813 : vector<1x128xi32>
    %815 = vector.extract_strided_slice %791 {offsets = [6, 0], sizes = [1, 128], strides = [1, 1]} : vector<8x128xi32> to vector<1x128xi32>
    %816 = arith.select %814, %815, %812 : vector<1x128xi1>, vector<1x128xi32>
    %c7_i32_207 = arith.constant 7 : i32
    %817 = vector.broadcast %c7_i32_207 : i32 to vector<1x128xi32>
    %818 = arith.cmpi eq, %782, %817 : vector<1x128xi32>
    %819 = vector.extract_strided_slice %791 {offsets = [7, 0], sizes = [1, 128], strides = [1, 1]} : vector<8x128xi32> to vector<1x128xi32>
    %820 = arith.select %818, %819, %816 : vector<1x128xi1>, vector<1x128xi32>
    %c1_i32_208 = arith.constant 1 : i32
    %821 = vector.broadcast %c1_i32_208 : i32 to vector<1x128xi32>
    %822 = arith.subi %0, %821 : vector<1x128xi32>
    %c3_i32_209 = arith.constant 3 : i32
    %823 = vector.broadcast %c3_i32_209 : i32 to vector<1x128xi32>
    %824 = arith.cmpi sgt, %822, %823 : vector<1x128xi32>
    %825 = arith.select %824, %820, %782 : vector<1x128xi1>, vector<1x128xi32>
    %c1_i32_210 = arith.constant 1 : i32
    %826 = vector.broadcast %c1_i32_210 : i32 to vector<1x128xi32>
    %827 = arith.subi %0, %826 : vector<1x128xi32>
    %c3_i32_211 = arith.constant 3 : i32
    %828 = vector.broadcast %c3_i32_211 : i32 to vector<1x128xi32>
    %829 = arith.cmpi sge, %827, %828 : vector<1x128xi32>
    %c7_i32_212 = arith.constant 7 : i32
    %830 = vector.broadcast %c7_i32_212 : i32 to vector<1x128xi32>
    %831 = arith.select %829, %825, %830 : vector<1x128xi1>, vector<1x128xi32>
    %c3_213 = arith.constant 3 : index
    %c0_214 = arith.constant 0 : index
    %832 = vector.load %arg5[%c3_213, %c0_214] : memref<8x128xi32, #tpu.memory_space<vmem>>, vector<1x128xi32>
    tpu.vector_store %arg5[%c3_213, %c0_214], %831 {strides = array<i32>} : memref<8x128xi32, #tpu.memory_space<vmem>>, vector<1x128xi32>,
    %c3_215 = arith.constant 3 : index
    %c0_216 = arith.constant 0 : index
    %c0_217 = arith.constant 0 : index
    %833 = vector.load %arg7[%c3_215, %c0_216, %c0_217] : memref<8x8x128xi32, #tpu.memory_space<vmem>>, vector<1x8x128xi32>
    %834 = vector.shape_cast %833 : vector<1x8x128xi32> to vector<8x128xi32>
    %835 = vector.extract_strided_slice %834 {offsets = [0, 0], sizes = [1, 128], strides = [1, 1]} : vector<8x128xi32> to vector<1x128xi32>
    %c1_i32_218 = arith.constant 1 : i32
    %836 = vector.broadcast %c1_i32_218 : i32 to vector<1x128xi32>
    %837 = arith.cmpi eq, %825, %836 : vector<1x128xi32>
    %838 = vector.extract_strided_slice %834 {offsets = [1, 0], sizes = [1, 128], strides = [1, 1]} : vector<8x128xi32> to vector<1x128xi32>
    %839 = arith.select %837, %838, %835 : vector<1x128xi1>, vector<1x128xi32>
    %c2_i32_219 = arith.constant 2 : i32
    %840 = vector.broadcast %c2_i32_219 : i32 to vector<1x128xi32>
    %841 = arith.cmpi eq, %825, %840 : vector<1x128xi32>
    %842 = vector.extract_strided_slice %834 {offsets = [2, 0], sizes = [1, 128], strides = [1, 1]} : vector<8x128xi32> to vector<1x128xi32>
    %843 = arith.select %841, %842, %839 : vector<1x128xi1>, vector<1x128xi32>
    %c3_i32_220 = arith.constant 3 : i32
    %844 = vector.broadcast %c3_i32_220 : i32 to vector<1x128xi32>
    %845 = arith.cmpi eq, %825, %844 : vector<1x128xi32>
    %846 = vector.extract_strided_slice %834 {offsets = [3, 0], sizes = [1, 128], strides = [1, 1]} : vector<8x128xi32> to vector<1x128xi32>
    %847 = arith.select %845, %846, %843 : vector<1x128xi1>, vector<1x128xi32>
    %c4_i32_221 = arith.constant 4 : i32
    %848 = vector.broadcast %c4_i32_221 : i32 to vector<1x128xi32>
    %849 = arith.cmpi eq, %825, %848 : vector<1x128xi32>
    %850 = vector.extract_strided_slice %834 {offsets = [4, 0], sizes = [1, 128], strides = [1, 1]} : vector<8x128xi32> to vector<1x128xi32>
    %851 = arith.select %849, %850, %847 : vector<1x128xi1>, vector<1x128xi32>
    %c5_i32_222 = arith.constant 5 : i32
    %852 = vector.broadcast %c5_i32_222 : i32 to vector<1x128xi32>
    %853 = arith.cmpi eq, %825, %852 : vector<1x128xi32>
    %854 = vector.extract_strided_slice %834 {offsets = [5, 0], sizes = [1, 128], strides = [1, 1]} : vector<8x128xi32> to vector<1x128xi32>
    %855 = arith.select %853, %854, %851 : vector<1x128xi1>, vector<1x128xi32>
    %c6_i32_223 = arith.constant 6 : i32
    %856 = vector.broadcast %c6_i32_223 : i32 to vector<1x128xi32>
    %857 = arith.cmpi eq, %825, %856 : vector<1x128xi32>
    %858 = vector.extract_strided_slice %834 {offsets = [6, 0], sizes = [1, 128], strides = [1, 1]} : vector<8x128xi32> to vector<1x128xi32>
    %859 = arith.select %857, %858, %855 : vector<1x128xi1>, vector<1x128xi32>
    %c7_i32_224 = arith.constant 7 : i32
    %860 = vector.broadcast %c7_i32_224 : i32 to vector<1x128xi32>
    %861 = arith.cmpi eq, %825, %860 : vector<1x128xi32>
    %862 = vector.extract_strided_slice %834 {offsets = [7, 0], sizes = [1, 128], strides = [1, 1]} : vector<8x128xi32> to vector<1x128xi32>
    %863 = arith.select %861, %862, %859 : vector<1x128xi1>, vector<1x128xi32>
    %c1_i32_225 = arith.constant 1 : i32
    %864 = vector.broadcast %c1_i32_225 : i32 to vector<1x128xi32>
    %865 = arith.subi %0, %864 : vector<1x128xi32>
    %c2_i32_226 = arith.constant 2 : i32
    %866 = vector.broadcast %c2_i32_226 : i32 to vector<1x128xi32>
    %867 = arith.cmpi sgt, %865, %866 : vector<1x128xi32>
    %868 = arith.select %867, %863, %825 : vector<1x128xi1>, vector<1x128xi32>
    %c1_i32_227 = arith.constant 1 : i32
    %869 = vector.broadcast %c1_i32_227 : i32 to vector<1x128xi32>
    %870 = arith.subi %0, %869 : vector<1x128xi32>
    %c2_i32_228 = arith.constant 2 : i32
    %871 = vector.broadcast %c2_i32_228 : i32 to vector<1x128xi32>
    %872 = arith.cmpi sge, %870, %871 : vector<1x128xi32>
    %c7_i32_229 = arith.constant 7 : i32
    %873 = vector.broadcast %c7_i32_229 : i32 to vector<1x128xi32>
    %874 = arith.select %872, %868, %873 : vector<1x128xi1>, vector<1x128xi32>
    %c2_230 = arith.constant 2 : index
    %c0_231 = arith.constant 0 : index
    %875 = vector.load %arg5[%c2_230, %c0_231] : memref<8x128xi32, #tpu.memory_space<vmem>>, vector<1x128xi32>
    tpu.vector_store %arg5[%c2_230, %c0_231], %874 {strides = array<i32>} : memref<8x128xi32, #tpu.memory_space<vmem>>, vector<1x128xi32>,
    %c2_232 = arith.constant 2 : index
    %c0_233 = arith.constant 0 : index
    %c0_234 = arith.constant 0 : index
    %876 = vector.load %arg7[%c2_232, %c0_233, %c0_234] : memref<8x8x128xi32, #tpu.memory_space<vmem>>, vector<1x8x128xi32>
    %877 = vector.shape_cast %876 : vector<1x8x128xi32> to vector<8x128xi32>
    %878 = vector.extract_strided_slice %877 {offsets = [0, 0], sizes = [1, 128], strides = [1, 1]} : vector<8x128xi32> to vector<1x128xi32>
    %c1_i32_235 = arith.constant 1 : i32
    %879 = vector.broadcast %c1_i32_235 : i32 to vector<1x128xi32>
    %880 = arith.cmpi eq, %868, %879 : vector<1x128xi32>
    %881 = vector.extract_strided_slice %877 {offsets = [1, 0], sizes = [1, 128], strides = [1, 1]} : vector<8x128xi32> to vector<1x128xi32>
    %882 = arith.select %880, %881, %878 : vector<1x128xi1>, vector<1x128xi32>
    %c2_i32_236 = arith.constant 2 : i32
    %883 = vector.broadcast %c2_i32_236 : i32 to vector<1x128xi32>
    %884 = arith.cmpi eq, %868, %883 : vector<1x128xi32>
    %885 = vector.extract_strided_slice %877 {offsets = [2, 0], sizes = [1, 128], strides = [1, 1]} : vector<8x128xi32> to vector<1x128xi32>
    %886 = arith.select %884, %885, %882 : vector<1x128xi1>, vector<1x128xi32>
    %c3_i32_237 = arith.constant 3 : i32
    %887 = vector.broadcast %c3_i32_237 : i32 to vector<1x128xi32>
    %888 = arith.cmpi eq, %868, %887 : vector<1x128xi32>
    %889 = vector.extract_strided_slice %877 {offsets = [3, 0], sizes = [1, 128], strides = [1, 1]} : vector<8x128xi32> to vector<1x128xi32>
    %890 = arith.select %888, %889, %886 : vector<1x128xi1>, vector<1x128xi32>
    %c4_i32_238 = arith.constant 4 : i32
    %891 = vector.broadcast %c4_i32_238 : i32 to vector<1x128xi32>
    %892 = arith.cmpi eq, %868, %891 : vector<1x128xi32>
    %893 = vector.extract_strided_slice %877 {offsets = [4, 0], sizes = [1, 128], strides = [1, 1]} : vector<8x128xi32> to vector<1x128xi32>
    %894 = arith.select %892, %893, %890 : vector<1x128xi1>, vector<1x128xi32>
    %c5_i32_239 = arith.constant 5 : i32
    %895 = vector.broadcast %c5_i32_239 : i32 to vector<1x128xi32>
    %896 = arith.cmpi eq, %868, %895 : vector<1x128xi32>
    %897 = vector.extract_strided_slice %877 {offsets = [5, 0], sizes = [1, 128], strides = [1, 1]} : vector<8x128xi32> to vector<1x128xi32>
    %898 = arith.select %896, %897, %894 : vector<1x128xi1>, vector<1x128xi32>
    %c6_i32_240 = arith.constant 6 : i32
    %899 = vector.broadcast %c6_i32_240 : i32 to vector<1x128xi32>
    %900 = arith.cmpi eq, %868, %899 : vector<1x128xi32>
    %901 = vector.extract_strided_slice %877 {offsets = [6, 0], sizes = [1, 128], strides = [1, 1]} : vector<8x128xi32> to vector<1x128xi32>
    %902 = arith.select %900, %901, %898 : vector<1x128xi1>, vector<1x128xi32>
    %c7_i32_241 = arith.constant 7 : i32
    %903 = vector.broadcast %c7_i32_241 : i32 to vector<1x128xi32>
    %904 = arith.cmpi eq, %868, %903 : vector<1x128xi32>
    %905 = vector.extract_strided_slice %877 {offsets = [7, 0], sizes = [1, 128], strides = [1, 1]} : vector<8x128xi32> to vector<1x128xi32>
    %906 = arith.select %904, %905, %902 : vector<1x128xi1>, vector<1x128xi32>
    %c1_i32_242 = arith.constant 1 : i32
    %907 = vector.broadcast %c1_i32_242 : i32 to vector<1x128xi32>
    %908 = arith.subi %0, %907 : vector<1x128xi32>
    %c1_i32_243 = arith.constant 1 : i32
    %909 = vector.broadcast %c1_i32_243 : i32 to vector<1x128xi32>
    %910 = arith.cmpi sgt, %908, %909 : vector<1x128xi32>
    %911 = arith.select %910, %906, %868 : vector<1x128xi1>, vector<1x128xi32>
    %c1_i32_244 = arith.constant 1 : i32
    %912 = vector.broadcast %c1_i32_244 : i32 to vector<1x128xi32>
    %913 = arith.subi %0, %912 : vector<1x128xi32>
    %c1_i32_245 = arith.constant 1 : i32
    %914 = vector.broadcast %c1_i32_245 : i32 to vector<1x128xi32>
    %915 = arith.cmpi sge, %913, %914 : vector<1x128xi32>
    %c7_i32_246 = arith.constant 7 : i32
    %916 = vector.broadcast %c7_i32_246 : i32 to vector<1x128xi32>
    %917 = arith.select %915, %911, %916 : vector<1x128xi1>, vector<1x128xi32>
    %c1_247 = arith.constant 1 : index
    %c0_248 = arith.constant 0 : index
    %918 = vector.load %arg5[%c1_247, %c0_248] : memref<8x128xi32, #tpu.memory_space<vmem>>, vector<1x128xi32>
    tpu.vector_store %arg5[%c1_247, %c0_248], %917 {strides = array<i32>} : memref<8x128xi32, #tpu.memory_space<vmem>>, vector<1x128xi32>,
    %c1_249 = arith.constant 1 : index
    %c0_250 = arith.constant 0 : index
    %c0_251 = arith.constant 0 : index
    %919 = vector.load %arg7[%c1_249, %c0_250, %c0_251] : memref<8x8x128xi32, #tpu.memory_space<vmem>>, vector<1x8x128xi32>
    %920 = vector.shape_cast %919 : vector<1x8x128xi32> to vector<8x128xi32>
    %921 = vector.extract_strided_slice %920 {offsets = [0, 0], sizes = [1, 128], strides = [1, 1]} : vector<8x128xi32> to vector<1x128xi32>
    %c1_i32_252 = arith.constant 1 : i32
    %922 = vector.broadcast %c1_i32_252 : i32 to vector<1x128xi32>
    %923 = arith.cmpi eq, %911, %922 : vector<1x128xi32>
    %924 = vector.extract_strided_slice %920 {offsets = [1, 0], sizes = [1, 128], strides = [1, 1]} : vector<8x128xi32> to vector<1x128xi32>
    %925 = arith.select %923, %924, %921 : vector<1x128xi1>, vector<1x128xi32>
    %c2_i32_253 = arith.constant 2 : i32
    %926 = vector.broadcast %c2_i32_253 : i32 to vector<1x128xi32>
    %927 = arith.cmpi eq, %911, %926 : vector<1x128xi32>
    %928 = vector.extract_strided_slice %920 {offsets = [2, 0], sizes = [1, 128], strides = [1, 1]} : vector<8x128xi32> to vector<1x128xi32>
    %929 = arith.select %927, %928, %925 : vector<1x128xi1>, vector<1x128xi32>
    %c3_i32_254 = arith.constant 3 : i32
    %930 = vector.broadcast %c3_i32_254 : i32 to vector<1x128xi32>
    %931 = arith.cmpi eq, %911, %930 : vector<1x128xi32>
    %932 = vector.extract_strided_slice %920 {offsets = [3, 0], sizes = [1, 128], strides = [1, 1]} : vector<8x128xi32> to vector<1x128xi32>
    %933 = arith.select %931, %932, %929 : vector<1x128xi1>, vector<1x128xi32>
    %c4_i32_255 = arith.constant 4 : i32
    %934 = vector.broadcast %c4_i32_255 : i32 to vector<1x128xi32>
    %935 = arith.cmpi eq, %911, %934 : vector<1x128xi32>
    %936 = vector.extract_strided_slice %920 {offsets = [4, 0], sizes = [1, 128], strides = [1, 1]} : vector<8x128xi32> to vector<1x128xi32>
    %937 = arith.select %935, %936, %933 : vector<1x128xi1>, vector<1x128xi32>
    %c5_i32_256 = arith.constant 5 : i32
    %938 = vector.broadcast %c5_i32_256 : i32 to vector<1x128xi32>
    %939 = arith.cmpi eq, %911, %938 : vector<1x128xi32>
    %940 = vector.extract_strided_slice %920 {offsets = [5, 0], sizes = [1, 128], strides = [1, 1]} : vector<8x128xi32> to vector<1x128xi32>
    %941 = arith.select %939, %940, %937 : vector<1x128xi1>, vector<1x128xi32>
    %c6_i32_257 = arith.constant 6 : i32
    %942 = vector.broadcast %c6_i32_257 : i32 to vector<1x128xi32>
    %943 = arith.cmpi eq, %911, %942 : vector<1x128xi32>
    %944 = vector.extract_strided_slice %920 {offsets = [6, 0], sizes = [1, 128], strides = [1, 1]} : vector<8x128xi32> to vector<1x128xi32>
    %945 = arith.select %943, %944, %941 : vector<1x128xi1>, vector<1x128xi32>
    %c7_i32_258 = arith.constant 7 : i32
    %946 = vector.broadcast %c7_i32_258 : i32 to vector<1x128xi32>
    %947 = arith.cmpi eq, %911, %946 : vector<1x128xi32>
    %948 = vector.extract_strided_slice %920 {offsets = [7, 0], sizes = [1, 128], strides = [1, 1]} : vector<8x128xi32> to vector<1x128xi32>
    %949 = arith.select %947, %948, %945 : vector<1x128xi1>, vector<1x128xi32>
    %c1_i32_259 = arith.constant 1 : i32
    %950 = vector.broadcast %c1_i32_259 : i32 to vector<1x128xi32>
    %951 = arith.subi %0, %950 : vector<1x128xi32>
    %c0_i32_260 = arith.constant 0 : i32
    %952 = vector.broadcast %c0_i32_260 : i32 to vector<1x128xi32>
    %953 = arith.cmpi sgt, %951, %952 : vector<1x128xi32>
    %954 = arith.select %953, %949, %911 : vector<1x128xi1>, vector<1x128xi32>
    %c1_i32_261 = arith.constant 1 : i32
    %955 = vector.broadcast %c1_i32_261 : i32 to vector<1x128xi32>
    %956 = arith.subi %0, %955 : vector<1x128xi32>
    %c0_i32_262 = arith.constant 0 : i32
    %957 = vector.broadcast %c0_i32_262 : i32 to vector<1x128xi32>
    %958 = arith.cmpi sge, %956, %957 : vector<1x128xi32>
    %c7_i32_263 = arith.constant 7 : i32
    %959 = vector.broadcast %c7_i32_263 : i32 to vector<1x128xi32>
    %960 = arith.select %958, %954, %959 : vector<1x128xi1>, vector<1x128xi32>
    %c0_264 = arith.constant 0 : index
    %c0_265 = arith.constant 0 : index
    %961 = vector.load %arg5[%c0_264, %c0_265] : memref<8x128xi32, #tpu.memory_space<vmem>>, vector<1x128xi32>
    tpu.vector_store %arg5[%c0_264, %c0_265], %960 {strides = array<i32>} : memref<8x128xi32, #tpu.memory_space<vmem>>, vector<1x128xi32>,
    return
  }
  func.func @transform_0(%arg0: i32) -> (i32, i32, i32) {
    %c0_i32 = arith.constant 0 : i32
    %c0_i32_0 = arith.constant 0 : i32
    %c0_i32_1 = arith.constant 0 : i32
    return %c0_i32, %c0_i32_0, %arg0 : i32, i32, i32
  }
  func.func @transform_1(%arg0: i32) -> (i32, i32) {
    %c0_i32 = arith.constant 0 : i32
    %c0_i32_0 = arith.constant 0 : i32
    return %c0_i32, %arg0 : i32, i32
  }
  func.func @transform_2(%arg0: i32) -> (i32, i32) {
    %c0_i32 = arith.constant 0 : i32
    %c0_i32_0 = arith.constant 0 : i32
    %c0_i32_1 = arith.constant 0 : i32
    return %c0_i32, %c0_i32_0 : i32, i32
  }
  func.func @transform_3(%arg0: i32) -> (i32, i32) {
    %c0_i32 = arith.constant 0 : i32
    %c0_i32_0 = arith.constant 0 : i32
    %c0_i32_1 = arith.constant 0 : i32
    return %c0_i32, %c0_i32_0 : i32, i32
  }
  func.func @transform_4(%arg0: i32) -> (i32, i32) {
    %c0_i32 = arith.constant 0 : i32
    %c0_i32_0 = arith.constant 0 : i32
    return %c0_i32, %arg0 : i32, i32
  }
  func.func @transform_5(%arg0: i32) -> (i32, i32) {
    %c0_i32 = arith.constant 0 : i32
    %c0_i32_0 = arith.constant 0 : i32
    return %c0_i32, %arg0 : i32, i32
  }
}

</mosaic_0001>

<bundles_post_ra>
// kernel: _viterbi_device.2
= control target key start
LH: loop header
LB: loop body
LE: loop exit
PB: predicated region body
PF: predicated region fallthrough
CT: control target
= control target key end

     0   :  { %s1239_s12 = smov 0   ;;  %s1540_s0 = inlined_call_operand.vmem [shape: f32[1024,32], index: 0, kind: input, shape index: {}]   ;;  %s1541_s1 = inlined_call_operand.vmem [shape: f32[32,128], index: 1, kind: input, shape index: {}]   ;;  %s1542_s2 = inlined_call_operand.vmem [shape: f32[1,128], index: 2, kind: input, shape index: {}]   ;;  %s1543_s3 = inlined_call_operand.vmem [shape: f32[1024,128], index: 3, kind: output, shape index: {}]  }
   0x1 LB: > { %s947_s13 = sadd.s32 4294967295, %s1217_s12   ;;  %p951_p0 = scmp.ge.s32.totalorder %s1217_s12, 1  ;;  %s1217_s12 = sphi %s1239_s12, %s13_s12  }
   0x2   : > { %p138_p1 = scmp.lt.s32.totalorder %s1217_s12, 3 }
   0x4   : > { %p139_p2 = pnand %p951_p0, %p138_p1 }
   0x5   : > { %s952_s18 = sshll.u32 (!%p139_p2), %s947_s13, 6 }
   0x6   : > { %142 = sbr.rel (%p139_p2) target bundleno = 279 (0x117), region = 32  ;;  %p163_p3 = scmp.lt.s32.totalorder (!%p139_p2), %s952_s18, 127 }
   0xb   : > { %v241_v0 = vld [vmem:[%s1541_s1 + $0x18] sm:$0xff]  ;;  %v240_v1 = vld [vmem:[%s1541_s1 + $0x10] sm:$0xff]  ;;  %v239_v2 = vld [vmem:[%s1541_s1 + $0x8] sm:$0xff]  ;;  %s1545_s18 = smov (!%p163_p3, %s952_s18), 127  ;;  %vm249_vm0 = vcmask 261120  }
   0xc   : > { %1091 = vmatprep.subr.mxu0 %v241_v0  ;;  %1195 = vmatprep.subr.mxu1 %v241_v0  ;;  %v238_v3 = vld [vmem:[%s1541_s1] sm:$0xff]  ;;  %s953_s23 = sshll.u32 %s1545_s18, 3 }
   0xd   : > { %1092 = vmatpush3.msra.mxu0 %v241_v0  ;;  %1199 = vmatpush3.msra.mxu1 %v241_v0  ;;  %s1267_s26 = scalar_lea.vmem %s1540_s0, %s953_s23  ;;  %s1407_s4 = scalar_lea.vmem %s1543_s3, %s953_s23 }
   0xe   : > { %1093 = vmatprep.subr.mxu0 %v240_v1  ;;  %1196 = vmatprep.subr.mxu1 %v240_v1  ;;  %v174_v4 = vld [vmem:[%s1267_s26] sm:$0xff]  ;;  %v175_v6 = vld [vmem:[%s1267_s26 + $0x8] sm:$0xff]  ;;  %v176_v8 = vld [vmem:[%s1267_s26 + $0x10] sm:$0xff] }
   0xf   : > { %1094 = vmatpush3.msra.mxu0 %v240_v1  ;;  %1200 = vmatpush3.msra.mxu1 %v240_v1  ;;  %v206_v5 = vld [vmem:[%s1267_s26 + $0x100] sm:$0xff]  ;;  %v207_v7 = vld [vmem:[%s1267_s26 + $0x108] sm:$0xff]  ;;  %v208_v9 = vld [vmem:[%s1267_s26 + $0x110] sm:$0xff] }
  0x10   : > { %1095 = vmatprep.subr.mxu0 %v239_v2  ;;  %1197 = vmatprep.subr.mxu1 %v239_v2  ;;  %v177_v10 = vld [vmem:[%s1267_s26 + $0x18] sm:$0xff]  ;;  %v178_v12 = vld [vmem:[%s1267_s26 + $0x20] sm:$0xff]  ;;  %v179_v14 = vld [vmem:[%s1267_s26 + $0x28] sm:$0xff] }
  0x11   : > { %1096 = vmatpush3.msra.mxu0 %v239_v2  ;;  %1201 = vmatpush3.msra.mxu1 %v239_v2  ;;  %v209_v11 = vld [vmem:[%s1267_s26 + $0x118] sm:$0xff]  ;;  %v210_v13 = vld [vmem:[%s1267_s26 + $0x120] sm:$0xff]  ;;  %v211_v15 = vld [vmem:[%s1267_s26 + $0x128] sm:$0xff] }
  0x12   : > { %1097 = vmatprep.subr.mxu0 %v238_v3  ;;  %1198 = vmatprep.subr.mxu1 %v238_v3  ;;  %v180_v16 = vld [vmem:[%s1267_s26 + $0x30] sm:$0xff]  ;;  %v181_v18 = vld [vmem:[%s1267_s26 + $0x38] sm:$0xff]  ;;  %v182_v20 = vld [vmem:[%s1267_s26 + $0x40] sm:$0xff] }
  0x13   : > { %1098 = vmatpush3.msra.mxu0 %v238_v3  ;;  %1202 = vmatpush3.msra.mxu1 %v238_v3  ;;  %v212_v17 = vld [vmem:[%s1267_s26 + $0x130] sm:$0xff]  ;;  %v213_v19 = vld [vmem:[%s1267_s26 + $0x138] sm:$0xff]  ;;  %v214_v21 = vld [vmem:[%s1267_s26 + $0x140] sm:$0xff] }
  0x14   : > { %1099 = vmatprep.mubr.msk.f32.mxu0 %vm249_vm0, %v174_v4  ;;  %1147 = vmatprep.mubr.msk.f32.mxu1 %vm249_vm0, %v206_v5  ;;  %v183_v22 = vld [vmem:[%s1267_s26 + $0x48] sm:$0xff]  ;;  %v184_v24 = vld [vmem:[%s1267_s26 + $0x50] sm:$0xff]  ;;  %v185_v26 = vld [vmem:[%s1267_s26 + $0x58] sm:$0xff] }
  0x15   : > { %1100 = vmatmul.mubr.msk.f32.vlgmr.msra.gmra.mxu0 %vm249_vm0, %v175_v6  ;;  %1148 = vmatmul.mubr.msk.f32.vlgmr.msra.gmra.mxu1 %vm249_vm0, %v207_v7  ;;  %v215_v23 = vld [vmem:[%s1267_s26 + $0x148] sm:$0xff]  ;;  %v216_v25 = vld [vmem:[%s1267_s26 + $0x150] sm:$0xff]  ;;  %v217_v27 = vld [vmem:[%s1267_s26 + $0x158] sm:$0xff] }
  0x16   : > { %1102 = vmatprep.mubr.msk.f32.mxu0 %vm249_vm0, %v176_v8  ;;  %1150 = vmatprep.mubr.msk.f32.mxu1 %vm249_vm0, %v208_v9  ;;  %v186_v28 = vld [vmem:[%s1267_s26 + $0x60] sm:$0xff]  ;;  %v187_v30 = vld [vmem:[%s1267_s26 + $0x68] sm:$0xff]  ;;  %v188_v32 = vld [vmem:[%s1267_s26 + $0x70] sm:$0xff] }
  0x17   : > { %v218_v29 = vld [vmem:[%s1267_s26 + $0x160] sm:$0xff]  ;;  %v219_v31 = vld [vmem:[%s1267_s26 + $0x168] sm:$0xff]  ;;  %v220_v33 = vld [vmem:[%s1267_s26 + $0x170] sm:$0xff] }
  0x18   : > { %v189_v34 = vld [vmem:[%s1267_s26 + $0x78] sm:$0xff]  ;;  %v190_v36 = vld [vmem:[%s1267_s26 + $0x80] sm:$0xff]  ;;  %v191_v38 = vld [vmem:[%s1267_s26 + $0x88] sm:$0xff] }
  0x19   : > { %1103 = vmatmul.mubr.msk.f32.gmra.mxu0 %vm249_vm0, %v177_v10  ;;  %1151 = vmatmul.mubr.msk.f32.gmra.mxu1 %vm249_vm0, %v209_v11  ;;  %v221_v35 = vld [vmem:[%s1267_s26 + $0x178] sm:$0xff]  ;;  %v222_v37 = vld [vmem:[%s1267_s26 + $0x180] sm:$0xff]  ;;  %v223_v39 = vld [vmem:[%s1267_s26 + $0x188] sm:$0xff] }
  0x1a   : > { %1105 = vmatprep.mubr.msk.f32.mxu0 %vm249_vm0, %v178_v12  ;;  %1153 = vmatprep.mubr.msk.f32.mxu1 %vm249_vm0, %v210_v13  ;;  %v192_v40 = vld [vmem:[%s1267_s26 + $0x90] sm:$0xff]  ;;  %v193_v42 = vld [vmem:[%s1267_s26 + $0x98] sm:$0xff]  ;;  %v194_v44 = vld [vmem:[%s1267_s26 + $0xa0] sm:$0xff] }
  0x1b   : > { %v224_v41 = vld [vmem:[%s1267_s26 + $0x190] sm:$0xff]  ;;  %v225_v43 = vld [vmem:[%s1267_s26 + $0x198] sm:$0xff]  ;;  %v226_v45 = vld [vmem:[%s1267_s26 + $0x1a0] sm:$0xff] }
  0x1c   : > { %v195_v46 = vld [vmem:[%s1267_s26 + $0xa8] sm:$0xff]  ;;  %v196_v48 = vld [vmem:[%s1267_s26 + $0xb0] sm:$0xff]  ;;  %v197_v50 = vld [vmem:[%s1267_s26 + $0xb8] sm:$0xff] }
  0x1d   : > { %1106 = vmatmul.mubr.msk.f32.gmra.mxu0 %vm249_vm0, %v179_v14  ;;  %1154 = vmatmul.mubr.msk.f32.gmra.mxu1 %vm249_vm0, %v211_v15  ;;  %v227_v47 = vld [vmem:[%s1267_s26 + $0x1a8] sm:$0xff]  ;;  %v228_v49 = vld [vmem:[%s1267_s26 + $0x1b0] sm:$0xff]  ;;  %v229_v51 = vld [vmem:[%s1267_s26 + $0x1b8] sm:$0xff] }
  0x1e   : > { %1108 = vmatprep.mubr.msk.f32.mxu0 %vm249_vm0, %v180_v16  ;;  %1156 = vmatprep.mubr.msk.f32.mxu1 %vm249_vm0, %v212_v17  ;;  %v198_v52 = vld [vmem:[%s1267_s26 + $0xc0] sm:$0xff]  ;;  %v199_v54 = vld [vmem:[%s1267_s26 + $0xc8] sm:$0xff]  ;;  %v200_v56 = vld [vmem:[%s1267_s26 + $0xd0] sm:$0xff] }
  0x1f   : > { %v230_v53 = vld [vmem:[%s1267_s26 + $0x1c0] sm:$0xff]  ;;  %v231_v55 = vld [vmem:[%s1267_s26 + $0x1c8] sm:$0xff]  ;;  %v232_v57 = vld [vmem:[%s1267_s26 + $0x1d0] sm:$0xff] }
  0x20   : > { %v201_v58 = vld [vmem:[%s1267_s26 + $0xd8] sm:$0xff]  ;;  %v202_v60 = vld [vmem:[%s1267_s26 + $0xe0] sm:$0xff]  ;;  %v203_v62 = vld [vmem:[%s1267_s26 + $0xe8] sm:$0xff] }
  0x21   : > { %1109 = vmatmul.mubr.msk.f32.gmra.mxu0 %vm249_vm0, %v181_v18  ;;  %1157 = vmatmul.mubr.msk.f32.gmra.mxu1 %vm249_vm0, %v213_v19  ;;  %v233_v59 = vld [vmem:[%s1267_s26 + $0x1d8] sm:$0xff]  ;;  %v234_v61 = vld [vmem:[%s1267_s26 + $0x1e0] sm:$0xff]  ;;  %v235_v63 = vld [vmem:[%s1267_s26 + $0x1e8] sm:$0xff] }
  0x22   : > { %1111 = vmatprep.mubr.msk.f32.mxu0 %vm249_vm0, %v182_v20  ;;  %1159 = vmatprep.mubr.msk.f32.mxu1 %vm249_vm0, %v214_v21  ;;  %v204_v0 = vld [vmem:[%s1267_s26 + $0xf0] sm:$0xff]  ;;  %v205_v2 = vld [vmem:[%s1267_s26 + $0xf8] sm:$0xff]  ;;  %v1400_v4 = vld [vmem:[%s1542_s2] ss:$0 sm:$0xff] }
  0x23   : > { %v236_v1 = vld [vmem:[%s1267_s26 + $0x1f0] sm:$0xff]  ;;  %v237_v3 = vld [vmem:[%s1267_s26 + $0x1f8] sm:$0xff] }
  0x25   : > { %1112 = vmatmul.mubr.msk.f32.gmra.mxu0 %vm249_vm0, %v183_v22  ;;  %1160 = vmatmul.mubr.msk.f32.gmra.mxu1 %vm249_vm0, %v215_v23 }
  0x26   : > { %1114 = vmatprep.mubr.msk.f32.mxu0 %vm249_vm0, %v184_v24  ;;  %1162 = vmatprep.mubr.msk.f32.mxu1 %vm249_vm0, %v216_v25 }
  0x29   : > { %1115 = vmatmul.mubr.msk.f32.gmra.mxu0 %vm249_vm0, %v185_v26  ;;  %1163 = vmatmul.mubr.msk.f32.gmra.mxu1 %vm249_vm0, %v217_v27 }
  0x2a   : > { %1117 = vmatprep.mubr.msk.f32.mxu0 %vm249_vm0, %v186_v28  ;;  %1165 = vmatprep.mubr.msk.f32.mxu1 %vm249_vm0, %v218_v29 }
  0x2d   : > { %1118 = vmatmul.mubr.msk.f32.gmra.mxu0 %vm249_vm0, %v187_v30  ;;  %1166 = vmatmul.mubr.msk.f32.gmra.mxu1 %vm249_vm0, %v219_v31 }
  0x2e   : > { %1120 = vmatprep.mubr.msk.f32.mxu0 %vm249_vm0, %v188_v32  ;;  %1168 = vmatprep.mubr.msk.f32.mxu1 %vm249_vm0, %v220_v33 }
  0x31   : > { %1121 = vmatmul.mubr.msk.f32.gmra.mxu0 %vm249_vm0, %v189_v34  ;;  %1169 = vmatmul.mubr.msk.f32.gmra.mxu1 %vm249_vm0, %v221_v35 }
  0x32   : > { %1123 = vmatprep.mubr.msk.f32.mxu0 %vm249_vm0, %v190_v36  ;;  %1171 = vmatprep.mubr.msk.f32.mxu1 %vm249_vm0, %v222_v37 }
  0x35   : > { %1124 = vmatmul.mubr.msk.f32.gmra.mxu0 %vm249_vm0, %v191_v38  ;;  %1172 = vmatmul.mubr.msk.f32.gmra.mxu1 %vm249_vm0, %v223_v39 }
  0x36   : > { %1126 = vmatprep.mubr.msk.f32.mxu0 %vm249_vm0, %v192_v40  ;;  %1174 = vmatprep.mubr.msk.f32.mxu1 %vm249_vm0, %v224_v41 }
  0x39   : > { %1127 = vmatmul.mubr.msk.f32.gmra.mxu0 %vm249_vm0, %v193_v42  ;;  %1175 = vmatmul.mubr.msk.f32.gmra.mxu1 %vm249_vm0, %v225_v43 }
  0x3a   : > { %1129 = vmatprep.mubr.msk.f32.mxu0 %vm249_vm0, %v194_v44  ;;  %1177 = vmatprep.mubr.msk.f32.mxu1 %vm249_vm0, %v226_v45 }
  0x3d   : > { %1130 = vmatmul.mubr.msk.f32.gmra.mxu0 %vm249_vm0, %v195_v46  ;;  %1178 = vmatmul.mubr.msk.f32.gmra.mxu1 %vm249_vm0, %v227_v47 }
  0x3e   : > { %1132 = vmatprep.mubr.msk.f32.mxu0 %vm249_vm0, %v196_v48  ;;  %1180 = vmatprep.mubr.msk.f32.mxu1 %vm249_vm0, %v228_v49 }
  0x41   : > { %1133 = vmatmul.mubr.msk.f32.gmra.mxu0 %vm249_vm0, %v197_v50  ;;  %1181 = vmatmul.mubr.msk.f32.gmra.mxu1 %vm249_vm0, %v229_v51 }
  0x42   : > { %1135 = vmatprep.mubr.msk.f32.mxu0 %vm249_vm0, %v198_v52  ;;  %1183 = vmatprep.mubr.msk.f32.mxu1 %vm249_vm0, %v230_v53 }
  0x45   : > { %1136 = vmatmul.mubr.msk.f32.gmra.mxu0 %vm249_vm0, %v199_v54  ;;  %1184 = vmatmul.mubr.msk.f32.gmra.mxu1 %vm249_vm0, %v231_v55 }
  0x46   : > { %1138 = vmatprep.mubr.msk.f32.mxu0 %vm249_vm0, %v200_v56  ;;  %1186 = vmatprep.mubr.msk.f32.mxu1 %vm249_vm0, %v232_v57 }
  0x49   : > { %1139 = vmatmul.mubr.msk.f32.gmra.mxu0 %vm249_vm0, %v201_v58  ;;  %1187 = vmatmul.mubr.msk.f32.gmra.mxu1 %vm249_vm0, %v233_v59 }
  0x4a   : > { %1141 = vmatprep.mubr.msk.f32.mxu0 %vm249_vm0, %v202_v60  ;;  %1189 = vmatprep.mubr.msk.f32.mxu1 %vm249_vm0, %v234_v61 }
  0x4d   : > { %1142 = vmatmul.mubr.msk.f32.gmra.mxu0 %vm249_vm0, %v203_v62  ;;  %1190 = vmatmul.mubr.msk.f32.gmra.mxu1 %vm249_vm0, %v235_v63 }
  0x4e   : > { %1144 = vmatprep.mubr.msk.f32.mxu0 %vm249_vm0, %v204_v0  ;;  %1192 = vmatprep.mubr.msk.f32.mxu1 %vm249_vm0, %v236_v1 }
  0x51   : > { %1145 = vmatmul.mubr.msk.f32.gmra.mxu0 %vm249_vm0, %v205_v2  ;;  %1193 = vmatmul.mubr.msk.f32.gmra.mxu1 %vm249_vm0, %v237_v3 }
  0xd5   : > { %v1101_v5 = vpop.f32.mrf.mxu0  ;;  %v1149_v6 = vpop.f32.mrf.mxu1 }
  0xd6   : > { %v514_v7 = vadd.f32 %v1101_v5, %v1400_v4  ;;  %v674_v8 = vadd.f32 %v1149_v6, %v1400_v4 }
  0xd7   : > { %v508_v9 = vpop.f32.mrf.mxu0  ;;  %v668_v10 = vpop.f32.mrf.mxu1 }
  0xd8   : > { %828 = vst [vmem:[%s1407_s4 + $0x8] sm:$0xff] %v514_v7  ;;  %860 = vst [vmem:[%s1407_s4 + $0x108] sm:$0xff] %v674_v8  ;;  %v509_v11 = vadd.f32 %v1400_v4, %v508_v9  ;;  %v669_v12 = vadd.f32 %v1400_v4, %v668_v10 }
  0xd9   : > { %v1104_v13 = vpop.f32.mrf.mxu0  ;;  %v1152_v14 = vpop.f32.mrf.mxu1 }
  0xda   : > { %827 = vst [vmem:[%s1407_s4] sm:$0xff] %v509_v11  ;;  %859 = vst [vmem:[%s1407_s4 + $0x100] sm:$0xff] %v669_v12  ;;  %v524_v15 = vadd.f32 %v1104_v13, %v1400_v4  ;;  %v684_v16 = vadd.f32 %v1152_v14, %v1400_v4 }
  0xdb   : > { %v518_v17 = vpop.f32.mrf.mxu0  ;;  %v678_v18 = vpop.f32.mrf.mxu1 }
  0xdc   : > { %830 = vst [vmem:[%s1407_s4 + $0x18] sm:$0xff] %v524_v15  ;;  %862 = vst [vmem:[%s1407_s4 + $0x118] sm:$0xff] %v684_v16  ;;  %v519_v19 = vadd.f32 %v1400_v4, %v518_v17  ;;  %v679_v20 = vadd.f32 %v1400_v4, %v678_v18 }
  0xdd   : > { %v1107_v21 = vpop.f32.mrf.mxu0  ;;  %v1155_v22 = vpop.f32.mrf.mxu1 }
  0xde   : > { %829 = vst [vmem:[%s1407_s4 + $0x10] sm:$0xff] %v519_v19  ;;  %861 = vst [vmem:[%s1407_s4 + $0x110] sm:$0xff] %v679_v20  ;;  %v534_v23 = vadd.f32 %v1107_v21, %v1400_v4  ;;  %v694_v24 = vadd.f32 %v1155_v22, %v1400_v4 }
  0xdf   : > { %v528_v25 = vpop.f32.mrf.mxu0  ;;  %v688_v26 = vpop.f32.mrf.mxu1 }
  0xe0   : > { %832 = vst [vmem:[%s1407_s4 + $0x28] sm:$0xff] %v534_v23  ;;  %864 = vst [vmem:[%s1407_s4 + $0x128] sm:$0xff] %v694_v24  ;;  %v529_v27 = vadd.f32 %v1400_v4, %v528_v25  ;;  %v689_v28 = vadd.f32 %v1400_v4, %v688_v26 }
  0xe1   : > { %v1110_v29 = vpop.f32.mrf.mxu0  ;;  %v1158_v30 = vpop.f32.mrf.mxu1 }
  0xe2   : > { %831 = vst [vmem:[%s1407_s4 + $0x20] sm:$0xff] %v529_v27  ;;  %863 = vst [vmem:[%s1407_s4 + $0x120] sm:$0xff] %v689_v28  ;;  %v544_v31 = vadd.f32 %v1110_v29, %v1400_v4  ;;  %v704_v32 = vadd.f32 %v1158_v30, %v1400_v4 }
  0xe3   : > { %v538_v33 = vpop.f32.mrf.mxu0  ;;  %v698_v34 = vpop.f32.mrf.mxu1 }
  0xe4   : > { %834 = vst [vmem:[%s1407_s4 + $0x38] sm:$0xff] %v544_v31  ;;  %866 = vst [vmem:[%s1407_s4 + $0x138] sm:$0xff] %v704_v32  ;;  %v539_v35 = vadd.f32 %v1400_v4, %v538_v33  ;;  %v699_v36 = vadd.f32 %v1400_v4, %v698_v34 }
  0xe5   : > { %v1113_v37 = vpop.f32.mrf.mxu0  ;;  %v1161_v38 = vpop.f32.mrf.mxu1 }
  0xe6   : > { %833 = vst [vmem:[%s1407_s4 + $0x30] sm:$0xff] %v539_v35  ;;  %865 = vst [vmem:[%s1407_s4 + $0x130] sm:$0xff] %v699_v36  ;;  %v554_v39 = vadd.f32 %v1113_v37, %v1400_v4  ;;  %v714_v40 = vadd.f32 %v1161_v38, %v1400_v4 }
  0xe7   : > { %v548_v41 = vpop.f32.mrf.mxu0  ;;  %v708_v42 = vpop.f32.mrf.mxu1 }
  0xe8   : > { %836 = vst [vmem:[%s1407_s4 + $0x48] sm:$0xff] %v554_v39  ;;  %868 = vst [vmem:[%s1407_s4 + $0x148] sm:$0xff] %v714_v40  ;;  %v549_v43 = vadd.f32 %v1400_v4, %v548_v41  ;;  %v709_v44 = vadd.f32 %v1400_v4, %v708_v42 }
  0xe9   : > { %v1116_v45 = vpop.f32.mrf.mxu0  ;;  %v1164_v46 = vpop.f32.mrf.mxu1 }
  0xea   : > { %835 = vst [vmem:[%s1407_s4 + $0x40] sm:$0xff] %v549_v43  ;;  %867 = vst [vmem:[%s1407_s4 + $0x140] sm:$0xff] %v709_v44  ;;  %v564_v47 = vadd.f32 %v1116_v45, %v1400_v4  ;;  %v724_v48 = vadd.f32 %v1164_v46, %v1400_v4 }
  0xeb   : > { %v558_v49 = vpop.f32.mrf.mxu0  ;;  %v718_v50 = vpop.f32.mrf.mxu1 }
  0xec   : > { %838 = vst [vmem:[%s1407_s4 + $0x58] sm:$0xff] %v564_v47  ;;  %870 = vst [vmem:[%s1407_s4 + $0x158] sm:$0xff] %v724_v48  ;;  %v559_v51 = vadd.f32 %v1400_v4, %v558_v49  ;;  %v719_v52 = vadd.f32 %v1400_v4, %v718_v50 }
  0xed   : > { %v1119_v53 = vpop.f32.mrf.mxu0  ;;  %v1167_v54 = vpop.f32.mrf.mxu1 }
  0xee   : > { %837 = vst [vmem:[%s1407_s4 + $0x50] sm:$0xff] %v559_v51  ;;  %869 = vst [vmem:[%s1407_s4 + $0x150] sm:$0xff] %v719_v52  ;;  %v574_v55 = vadd.f32 %v1119_v53, %v1400_v4  ;;  %v734_v56 = vadd.f32 %v1167_v54, %v1400_v4 }
  0xef   : > { %v568_v57 = vpop.f32.mrf.mxu0  ;;  %v728_v58 = vpop.f32.mrf.mxu1 }
  0xf0   : > { %840 = vst [vmem:[%s1407_s4 + $0x68] sm:$0xff] %v574_v55  ;;  %872 = vst [vmem:[%s1407_s4 + $0x168] sm:$0xff] %v734_v56  ;;  %v569_v59 = vadd.f32 %v1400_v4, %v568_v57  ;;  %v729_v60 = vadd.f32 %v1400_v4, %v728_v58 }
  0xf1   : > { %v1122_v61 = vpop.f32.mrf.mxu0  ;;  %v1170_v62 = vpop.f32.mrf.mxu1 }
  0xf2   : > { %839 = vst [vmem:[%s1407_s4 + $0x60] sm:$0xff] %v569_v59  ;;  %871 = vst [vmem:[%s1407_s4 + $0x160] sm:$0xff] %v729_v60  ;;  %v584_v63 = vadd.f32 %v1122_v61, %v1400_v4  ;;  %v744_v0 = vadd.f32 %v1170_v62, %v1400_v4 }
  0xf3   : > { %v578_v1 = vpop.f32.mrf.mxu0  ;;  %v738_v2 = vpop.f32.mrf.mxu1 }
  0xf4   : > { %842 = vst [vmem:[%s1407_s4 + $0x78] sm:$0xff] %v584_v63  ;;  %874 = vst [vmem:[%s1407_s4 + $0x178] sm:$0xff] %v744_v0  ;;  %v579_v3 = vadd.f32 %v1400_v4, %v578_v1  ;;  %v739_v5 = vadd.f32 %v1400_v4, %v738_v2 }
  0xf5   : > { %v1125_v6 = vpop.f32.mrf.mxu0  ;;  %v1173_v7 = vpop.f32.mrf.mxu1 }
  0xf6   : > { %841 = vst [vmem:[%s1407_s4 + $0x70] sm:$0xff] %v579_v3  ;;  %873 = vst [vmem:[%s1407_s4 + $0x170] sm:$0xff] %v739_v5  ;;  %v594_v8 = vadd.f32 %v1125_v6, %v1400_v4  ;;  %v754_v9 = vadd.f32 %v1173_v7, %v1400_v4 }
  0xf7   : > { %v588_v10 = vpop.f32.mrf.mxu0  ;;  %v748_v11 = vpop.f32.mrf.mxu1 }
  0xf8   : > { %844 = vst [vmem:[%s1407_s4 + $0x88] sm:$0xff] %v594_v8  ;;  %876 = vst [vmem:[%s1407_s4 + $0x188] sm:$0xff] %v754_v9  ;;  %v589_v12 = vadd.f32 %v1400_v4, %v588_v10  ;;  %v749_v13 = vadd.f32 %v1400_v4, %v748_v11 }
  0xf9   : > { %v1128_v14 = vpop.f32.mrf.mxu0  ;;  %v1176_v15 = vpop.f32.mrf.mxu1 }
  0xfa   : > { %843 = vst [vmem:[%s1407_s4 + $0x80] sm:$0xff] %v589_v12  ;;  %875 = vst [vmem:[%s1407_s4 + $0x180] sm:$0xff] %v749_v13  ;;  %v604_v16 = vadd.f32 %v1128_v14, %v1400_v4  ;;  %v764_v17 = vadd.f32 %v1176_v15, %v1400_v4 }
  0xfb   : > { %v598_v18 = vpop.f32.mrf.mxu0  ;;  %v758_v19 = vpop.f32.mrf.mxu1 }
  0xfc   : > { %846 = vst [vmem:[%s1407_s4 + $0x98] sm:$0xff] %v604_v16  ;;  %878 = vst [vmem:[%s1407_s4 + $0x198] sm:$0xff] %v764_v17  ;;  %v599_v20 = vadd.f32 %v1400_v4, %v598_v18  ;;  %v759_v21 = vadd.f32 %v1400_v4, %v758_v19 }
  0xfd   : > { %v1131_v22 = vpop.f32.mrf.mxu0  ;;  %v1179_v23 = vpop.f32.mrf.mxu1 }
  0xfe   : > { %845 = vst [vmem:[%s1407_s4 + $0x90] sm:$0xff] %v599_v20  ;;  %877 = vst [vmem:[%s1407_s4 + $0x190] sm:$0xff] %v759_v21  ;;  %v614_v24 = vadd.f32 %v1131_v22, %v1400_v4  ;;  %v774_v25 = vadd.f32 %v1179_v23, %v1400_v4 }
  0xff   : > { %v608_v26 = vpop.f32.mrf.mxu0  ;;  %v768_v27 = vpop.f32.mrf.mxu1 }
 0x100   : > { %848 = vst [vmem:[%s1407_s4 + $0xa8] sm:$0xff] %v614_v24  ;;  %880 = vst [vmem:[%s1407_s4 + $0x1a8] sm:$0xff] %v774_v25  ;;  %v609_v28 = vadd.f32 %v1400_v4, %v608_v26  ;;  %v769_v29 = vadd.f32 %v1400_v4, %v768_v27 }
 0x101   : > { %v1134_v30 = vpop.f32.mrf.mxu0  ;;  %v1182_v31 = vpop.f32.mrf.mxu1 }
 0x102   : > { %847 = vst [vmem:[%s1407_s4 + $0xa0] sm:$0xff] %v609_v28  ;;  %879 = vst [vmem:[%s1407_s4 + $0x1a0] sm:$0xff] %v769_v29  ;;  %v624_v32 = vadd.f32 %v1134_v30, %v1400_v4  ;;  %v784_v33 = vadd.f32 %v1182_v31, %v1400_v4 }
 0x103   : > { %v618_v34 = vpop.f32.mrf.mxu0  ;;  %v778_v35 = vpop.f32.mrf.mxu1 }
 0x104   : > { %850 = vst [vmem:[%s1407_s4 + $0xb8] sm:$0xff] %v624_v32  ;;  %882 = vst [vmem:[%s1407_s4 + $0x1b8] sm:$0xff] %v784_v33  ;;  %v619_v36 = vadd.f32 %v1400_v4, %v618_v34  ;;  %v779_v37 = vadd.f32 %v1400_v4, %v778_v35 }
 0x105   : > { %v1137_v38 = vpop.f32.mrf.mxu0  ;;  %v1185_v39 = vpop.f32.mrf.mxu1 }
 0x106   : > { %849 = vst [vmem:[%s1407_s4 + $0xb0] sm:$0xff] %v619_v36  ;;  %881 = vst [vmem:[%s1407_s4 + $0x1b0] sm:$0xff] %v779_v37  ;;  %v634_v40 = vadd.f32 %v1137_v38, %v1400_v4  ;;  %v794_v41 = vadd.f32 %v1185_v39, %v1400_v4 }
 0x107   : > { %v628_v42 = vpop.f32.mrf.mxu0  ;;  %v788_v43 = vpop.f32.mrf.mxu1 }
 0x108   : > { %852 = vst [vmem:[%s1407_s4 + $0xc8] sm:$0xff] %v634_v40  ;;  %884 = vst [vmem:[%s1407_s4 + $0x1c8] sm:$0xff] %v794_v41  ;;  %v629_v44 = vadd.f32 %v1400_v4, %v628_v42  ;;  %v789_v45 = vadd.f32 %v1400_v4, %v788_v43 }
 0x109   : > { %v1140_v46 = vpop.f32.mrf.mxu0  ;;  %v1188_v47 = vpop.f32.mrf.mxu1 }
 0x10a   : > { %851 = vst [vmem:[%s1407_s4 + $0xc0] sm:$0xff] %v629_v44  ;;  %883 = vst [vmem:[%s1407_s4 + $0x1c0] sm:$0xff] %v789_v45  ;;  %v644_v48 = vadd.f32 %v1140_v46, %v1400_v4  ;;  %v804_v49 = vadd.f32 %v1188_v47, %v1400_v4 }
 0x10b   : > { %v638_v50 = vpop.f32.mrf.mxu0  ;;  %v798_v51 = vpop.f32.mrf.mxu1 }
 0x10c   : > { %854 = vst [vmem:[%s1407_s4 + $0xd8] sm:$0xff] %v644_v48  ;;  %886 = vst [vmem:[%s1407_s4 + $0x1d8] sm:$0xff] %v804_v49  ;;  %v639_v52 = vadd.f32 %v1400_v4, %v638_v50  ;;  %v799_v53 = vadd.f32 %v1400_v4, %v798_v51 }
 0x10d   : > { %v1143_v54 = vpop.f32.mrf.mxu0  ;;  %v1191_v55 = vpop.f32.mrf.mxu1 }
 0x10e   : > { %853 = vst [vmem:[%s1407_s4 + $0xd0] sm:$0xff] %v639_v52  ;;  %885 = vst [vmem:[%s1407_s4 + $0x1d0] sm:$0xff] %v799_v53  ;;  %v654_v56 = vadd.f32 %v1143_v54, %v1400_v4  ;;  %v814_v57 = vadd.f32 %v1191_v55, %v1400_v4 }
 0x10f   : > { %v648_v58 = vpop.f32.mrf.mxu0  ;;  %v808_v59 = vpop.f32.mrf.mxu1 }
 0x110   : > { %856 = vst [vmem:[%s1407_s4 + $0xe8] sm:$0xff] %v654_v56  ;;  %888 = vst [vmem:[%s1407_s4 + $0x1e8] sm:$0xff] %v814_v57  ;;  %v649_v60 = vadd.f32 %v1400_v4, %v648_v58  ;;  %v809_v61 = vadd.f32 %v1400_v4, %v808_v59 }
 0x111   : > { %v1146_v62 = vpop.f32.mrf.mxu0  ;;  %v1194_v63 = vpop.f32.mrf.mxu1 }
 0x112   : > { %855 = vst [vmem:[%s1407_s4 + $0xe0] sm:$0xff] %v649_v60  ;;  %887 = vst [vmem:[%s1407_s4 + $0x1e0] sm:$0xff] %v809_v61  ;;  %v664_v0 = vadd.f32 %v1146_v62, %v1400_v4  ;;  %v824_v1 = vadd.f32 %v1194_v63, %v1400_v4 }
 0x113   : > { %v658_v2 = vpop.f32.mrf.mxu0  ;;  %v818_v3 = vpop.f32.mrf.mxu1 }
 0x114   : > { %858 = vst [vmem:[%s1407_s4 + $0xf8] sm:$0xff] %v664_v0  ;;  %890 = vst [vmem:[%s1407_s4 + $0x1f8] sm:$0xff] %v824_v1  ;;  %v659_v5 = vadd.f32 %v1400_v4, %v658_v2  ;;  %v819_v6 = vadd.f32 %v1400_v4, %v818_v3 }
 0x116   : > { %857 = vst [vmem:[%s1407_s4 + $0xf0] sm:$0xff] %v659_v5  ;;  %889 = vst [vmem:[%s1407_s4 + $0x1f0] sm:$0xff] %v819_v6 }
 0x117 PF: > { %s13_s12 = sadd.s32 1, %s1217_s12  }
 0x118   : > { %p10_p4 = scmp.ge.s32.totalorder %s13_s12, 4  }
 0x11a   :  { %12 = sbr.rel (!%p10_p4) target bundleno = 1 (0x1), region = 62 }

// kernel: _viterbi_device.3
= control target key start
LH: loop header
LB: loop body
LE: loop exit
PB: predicated region body
PF: predicated region fallthrough
CT: control target
= control target key end

     0   :  { %v1292_v0 = vmov 2   ;;  %v1293_v1 = vmov 0   ;;  %v1294_v3 = vmov 3   ;;  %v1295_v4 = vmov 1   ;;  %s1729_s2 = inlined_call_operand.vmem [shape: f32[8,8], index: 2, kind: input, shape index: {}]   ;;  %s1730_s3 = inlined_call_operand.vmem [shape: f32[8,1], index: 3, kind: input, shape index: {}]   ;;  %s1731_s1 = inlined_call_operand.vmem [shape: s32[1,128], index: 1, kind: input, shape index: {}]   ;;  %s1732_s0 = inlined_call_operand.vmem [shape: f32[8,8,128], index: 0, kind: input, shape index: {}]   ;;  %s1733_s5 = inlined_call_operand.vmem [shape: f32[1,128], index: 5, kind: output, shape index: {1}]   ;;  %s1734_s4 = inlined_call_operand.vmem [shape: s32[8,128], index: 4, kind: output, shape index: {0}]  }
   0x1   :  { %1285 = vset.pattern.permute.xlu1 %v1292_v0  ;;  %1283 = vset.pattern.permute.xlu0 %v1293_v1  ;;  %v20_v2 = vld [vmem:[%s1729_s2] sm:$0xff]  ;;  %v1296_v5 = vmov 4   ;;  %v1297_v6 = vmov 5   ;;  %v1298_v7 = vmov 6   ;;  %v1299_v8 = vmov 7  }
   0x2   :  { %31 = vperm.xlu1 %1285, %v20_v2   ;;  %23 = vperm.xlu0 %1283, %v20_v2   ;;  %v54_v9 = vld [vmem:[%s1730_s3] sm:$0xff]  ;;  %v60_v10 = vlaneseq  ;;  %v1300_v17 = vmov -10000.0  }
   0x3   :  { %v1390_v40 = vld [vmem:[%s1731_s1] sm:$0x1] }
   0x4   :  { %v1340_v11 = vshrl.u32 %v60_v10, 7  ;;  %vm127_vm5 = vcmp.gt.s32.totalorder %v1390_v40, 0  ;;  %v125_v55 = vld [vmem:[%s1732_s0] sm:$0xff]  ;;  %vm201_vm11 = vcmp.gt.s32.totalorder %v1390_v40, 1 }
   0x5   :  { %v128_v50 = vsel %vm127_vm5, 1, %v1293_v1 }
   0x6   :  { %1286 = vset.pattern.permute.xlu1 %v1294_v3  ;;  %1284 = vset.pattern.permute.xlu0 %v1295_v4  ;;  %vm62_vm0 = vcmp.eq.s32.totalorder %v1340_v11, 6  ;;  %v1344_v12 = vsub.s32 0, %v1340_v11  ;;  %v1347_v13 = vsub.s32 1, %v1340_v11  ;;  %v1350_v14 = vsub.s32 2, %v1340_v11 }
   0x7   :  { %35 = vperm.xlu1 %1286, %v20_v2   ;;  %27 = vperm.xlu0 %1284, %v20_v2   ;;  %v63_v18 = vsel %vm62_vm0, 0.0, %v1300_v17  ;;  %v1358_v20 = vsub.s32 3, %v1340_v11  ;;  %v1362_v22 = vsub.s32 4, %v1340_v11  ;;  %v1366_v24 = vsub.s32 5, %v1340_v11 }
   0x8   :  { %v67_v19 = vrot.slane %v63_v18, %v1344_v12  ;;  %v72_v21 = vrot.slane %v63_v18, %v1347_v13  ;;  %v80_v23 = vrot.slane %v63_v18, %v1350_v14  ;;  %v1379_v33 = vsub.s32 6, %v1340_v11 }
   0x9   :  { %v88_v28 = vrot.slane %v63_v18, %v1358_v20  ;;  %v96_v30 = vrot.slane %v63_v18, %v1362_v22  ;;  %v104_v32 = vrot.slane %v63_v18, %v1366_v24  ;;  %v1395_v44 = vsub.s32 7, %v1340_v11 }
   0xa   :  { %v112_v42 = vrot.slane %v63_v18, %v1379_v33  ;;  %v132_v52 = vrot.slane %v128_v50, %v1344_v12 }
   0xb   :  { %1287 = vset.pattern.permute.xlu1 %v1296_v5  ;;  %1288 = vset.pattern.permute.xlu0 %v1297_v6  ;;  %v120_v48 = vrot.slane %v63_v18, %v1395_v44 }
   0xc   :  { %39 = vperm.xlu1 %1287, %v20_v2   ;;  %43 = vperm.xlu0 %1288, %v20_v2   ;;  %vm133_vm9 = vcmp.eq.s32.totalorder %v132_v52, 1 }
  0x10   :  { %1289 = vset.pattern.permute.xlu1 %v1298_v7  ;;  %1291 = vset.pattern.permute.xlu0 %v1293_v1 }
  0x11   :  { %47 = vperm.xlu1 %1289, %v20_v2   ;;  %57 = vperm.xlu0 %1291, %v54_v9  }
  0x15   :  { %1290 = vset.pattern.permute.xlu1 %v1299_v8 }
  0x16   :  { %51 = vperm.xlu1 %1290, %v20_v2  }
  0x7d   :  { %v1352_v15 = vpop.permute.xlu1 %31  ;;  %v1354_v16 = vpop.permute.xlu0 %23 }
  0x7e   :  { %v68_v27 = vadd.f32 %v67_v19, %v1354_v16  ;;  %v81_v31 = vadd.f32 %v80_v23, %v1352_v15 }
  0x82   :  { %v1368_v25 = vpop.permute.xlu1 %35  ;;  %v1370_v26 = vpop.permute.xlu0 %27 }
  0x83   :  { %v73_v29 = vadd.f32 %v72_v21, %v1370_v26  ;;  %v89_v35 = vadd.f32 %v88_v28, %v1368_v25 }
  0x85   :  { %vm74_vm1 = vcmp.gt.f32.partialorder %v73_v29, %v68_v27 }
  0x86   :  { %v75_v34 = vsel %vm74_vm1, %v73_v29, %v68_v27 }
  0x87   :  { %vm82_vm2 = vcmp.gt.f32.partialorder %v81_v31, %v75_v34  ;;  %v1382_v36 = vpop.permute.xlu1 %39  ;;  %v1384_v37 = vpop.permute.xlu0 %43 }
  0x88   :  { %v83_v38 = vsel %vm82_vm2, %v81_v31, %v75_v34  ;;  %v97_v39 = vadd.f32 %v96_v30, %v1382_v36  ;;  %v105_v41 = vadd.f32 %v104_v32, %v1384_v37 }
  0x89   :  { %vm90_vm3 = vcmp.gt.f32.partialorder %v89_v35, %v83_v38 }
  0x8a   :  { %v91_v43 = vsel %vm90_vm3, %v89_v35, %v83_v38 }
  0x8b   :  { %vm98_vm4 = vcmp.gt.f32.partialorder %v97_v39, %v91_v43 }
  0x8c   :  { %v99_v45 = vsel %vm98_vm4, %v97_v39, %v91_v43  ;;  %v1398_v46 = vpop.permute.xlu1 %47  ;;  %vm276_vm4 = vcmp.gt.s32.totalorder %v1390_v40, 2 }
  0x8d   :  { %vm106_vm6 = vcmp.gt.f32.partialorder %v105_v41, %v99_v45  ;;  %v113_v47 = vadd.f32 %v112_v42, %v1398_v46 }
  0x8e   :  { %v107_v49 = vsel %vm106_vm6, %v105_v41, %v99_v45  ;;  %v1265_v41 = vld [vmem:[%s1732_s0 + $0x8] sm:$0xff] }
  0x8f   :  { %vm114_vm7 = vcmp.gt.f32.partialorder %v113_v47, %v107_v49 }
  0x90   :  { %v115_v54 = vsel %vm114_vm7, %v113_v47, %v107_v49 }
  0x91   :  { %v1403_v51 = vpop.permute.xlu1 %51 }
  0x92   :  { %v121_v53 = vadd.f32 %v120_v48, %v1403_v51 }
  0x94   :  { %vm122_vm8 = vcmp.gt.f32.partialorder %v121_v53, %v115_v54 }
  0x95   :  { %v123_v56 = vsel %vm122_vm8, %v121_v53, %v115_v54 }
  0x96   :  { %v126_v57 = vadd.f32 %v125_v55, %v123_v56 }
  0x98   :  { %v136_v58 = vsel %vm133_vm9, %v126_v57, %v63_v18  ;;  %v202_v18 = vsel %vm201_vm11, 1, %v1293_v1 }
  0x99   :  { %v140_v59 = vrot.slane %v136_v58, %v1344_v12  ;;  %v145_v60 = vrot.slane %v136_v58, %v1347_v13  ;;  %v153_v61 = vrot.slane %v136_v58, %v1350_v14  ;;  %v161_v0 = vrot.slane %v136_v58, %v1358_v20 }
  0x9a   :  { %v169_v3 = vrot.slane %v136_v58, %v1362_v22  ;;  %v177_v7 = vrot.slane %v136_v58, %v1366_v24  ;;  %v185_v17 = vrot.slane %v136_v58, %v1379_v33  ;;  %v193_v27 = vrot.slane %v136_v58, %v1395_v44 }
  0x9b   :  { %v141_v62 = vadd.f32 %v140_v59, %v1354_v16  ;;  %v146_v63 = vadd.f32 %v145_v60, %v1370_v26  ;;  %v154_v2 = vadd.f32 %v153_v61, %v1352_v15  ;;  %v162_v6 = vadd.f32 %v161_v0, %v1368_v25 }
  0x9c   :  { %v170_v10 = vadd.f32 %v169_v3, %v1382_v36  ;;  %v178_v23 = vadd.f32 %v177_v7, %v1384_v37  ;;  %v206_v30 = vrot.slane %v202_v18, %v1344_v12  ;;  %v186_v31 = vadd.f32 %v185_v17, %v1398_v46 }
  0x9d   :  { %vm147_vm10 = vcmp.gt.f32.partialorder %v146_v63, %v141_v62  ;;  %v194_v35 = vadd.f32 %v193_v27, %v1403_v51  ;;  %v277_v3 = vsel %vm276_vm4, 1, %v1293_v1 }
  0x9e   :  { %v148_v4 = vsel %vm147_vm10, %v146_v63, %v141_v62  ;;  %v149_v5 = vsel %vm147_vm10, 1, %v1293_v1  ;;  %vm207_vm1 = vcmp.eq.s32.totalorder %v206_v30, 1 }
  0x9f   :  { %vm155_vm12 = vcmp.gt.f32.partialorder %v154_v2, %v148_v4 }
  0xa0   :  { %v156_v8 = vsel %vm155_vm12, %v154_v2, %v148_v4  ;;  %v157_v9 = vsel %vm155_vm12, 2, %v149_v5 }
  0xa1   :  { %vm163_vm13 = vcmp.gt.f32.partialorder %v162_v6, %v156_v8 }
  0xa2   :  { %v164_v19 = vsel %vm163_vm13, %v162_v6, %v156_v8  ;;  %v165_v21 = vsel %vm163_vm13, 3, %v157_v9  ;;  %vm351_vm13 = vcmp.gt.s32.totalorder %v1390_v40, 3 }
  0xa3   :  { %vm171_vm14 = vcmp.gt.f32.partialorder %v170_v10, %v164_v19 }
  0xa4   :  { %v172_v28 = vsel %vm171_vm14, %v170_v10, %v164_v19  ;;  %v173_v29 = vsel %vm171_vm14, 4, %v165_v21  ;;  %v281_v10 = vrot.slane %v277_v3, %v1344_v12 }
  0xa5   :  { %vm179_vm15 = vcmp.gt.f32.partialorder %v178_v23, %v172_v28 }
  0xa6   :  { %v180_v32 = vsel %vm179_vm15, %v178_v23, %v172_v28  ;;  %v181_v34 = vsel %vm179_vm15, 5, %v173_v29  ;;  %v1266_v28 = vld [vmem:[%s1732_s0 + $0x10] sm:$0xff]  ;;  %vm282_vm10 = vcmp.eq.s32.totalorder %v281_v10, 1 }
  0xa7   :  { %vm187_vm0 = vcmp.gt.f32.partialorder %v186_v31, %v180_v32 }
  0xa8   :  { %v188_v38 = vsel %vm187_vm0, %v186_v31, %v180_v32  ;;  %v189_v39 = vsel %vm187_vm0, 6, %v181_v34 }
  0xa9   :  { %vm195_vm2 = vcmp.gt.f32.partialorder %v194_v35, %v188_v38 }
  0xaa   :  { %v196_v42 = vsel %vm195_vm2, %v194_v35, %v188_v38  ;;  %v197_v43 = vsel %vm195_vm2, 7, %v189_v39 }
  0xab   :  { %v200_v45 = vadd.f32 %v1265_v41, %v196_v42  ;;  %v1433_v47 = vsel %vm207_vm1, %v197_v43, 7 }
  0xad   :  { %v211_v48 = vsel %vm207_vm1, %v200_v45, %v136_v58 }
  0xae   :  { %v215_v49 = vrot.slane %v211_v48, %v1344_v12  ;;  %v220_v50 = vrot.slane %v211_v48, %v1347_v13  ;;  %v228_v52 = vrot.slane %v211_v48, %v1350_v14  ;;  %v236_v55 = vrot.slane %v211_v48, %v1358_v20 }
  0xaf   :  { %v244_v57 = vrot.slane %v211_v48, %v1362_v22  ;;  %v252_v61 = vrot.slane %v211_v48, %v1366_v24  ;;  %v260_v2 = vrot.slane %v211_v48, %v1379_v33  ;;  %v268_v7 = vrot.slane %v211_v48, %v1395_v44 }
  0xb0   :  { %v216_v53 = vadd.f32 %v215_v49, %v1354_v16  ;;  %v221_v54 = vadd.f32 %v220_v50, %v1370_v26  ;;  %v229_v56 = vadd.f32 %v228_v52, %v1352_v15  ;;  %v237_v60 = vadd.f32 %v236_v55, %v1368_v25 }
  0xb1   :  { %v245_v0 = vadd.f32 %v244_v57, %v1382_v36  ;;  %v253_v6 = vadd.f32 %v252_v61, %v1384_v37  ;;  %v261_v17 = vadd.f32 %v260_v2, %v1398_v46  ;;  %v269_v21 = vadd.f32 %v268_v7, %v1403_v51 }
  0xb2   :  { %vm222_vm3 = vcmp.gt.f32.partialorder %v221_v54, %v216_v53 }
  0xb3   :  { %v223_v59 = vsel %vm222_vm3, %v221_v54, %v216_v53  ;;  %v224_v58 = vsel %vm222_vm3, 1, %v1293_v1 }
  0xb4   :  { %vm230_vm5 = vcmp.gt.f32.partialorder %v229_v56, %v223_v59 }
  0xb5   :  { %v231_v62 = vsel %vm230_vm5, %v229_v56, %v223_v59  ;;  %v232_v63 = vsel %vm230_vm5, 2, %v224_v58  ;;  %v352_v59 = vsel %vm351_vm13, 1, %v1293_v1 }
  0xb6   :  { %vm238_vm6 = vcmp.gt.f32.partialorder %v237_v60, %v231_v62  ;;  %v356_v2 = vrot.slane %v352_v59, %v1344_v12 }
  0xb7   :  { %v239_v4 = vsel %vm238_vm6, %v237_v60, %v231_v62  ;;  %v240_v5 = vsel %vm238_vm6, 3, %v232_v63  ;;  %vm426_vm6 = vcmp.gt.s32.totalorder %v1390_v40, 4 }
  0xb8   :  { %vm246_vm7 = vcmp.gt.f32.partialorder %v245_v0, %v239_v4  ;;  %vm357_vm3 = vcmp.eq.s32.totalorder %v356_v2, 1  ;;  %v1268_v2 = vld [vmem:[%s1732_s0 + $0x20] sm:$0xff] }
  0xb9   :  { %v247_v8 = vsel %vm246_vm7, %v245_v0, %v239_v4  ;;  %v248_v9 = vsel %vm246_vm7, 4, %v240_v5 }
  0xba   :  { %vm254_vm8 = vcmp.gt.f32.partialorder %v253_v6, %v247_v8 }
  0xbb   :  { %v255_v18 = vsel %vm254_vm8, %v253_v6, %v247_v8  ;;  %v256_v19 = vsel %vm254_vm8, 5, %v248_v9  ;;  %v1267_v9 = vld [vmem:[%s1732_s0 + $0x18] sm:$0xff] }
  0xbc   :  { %vm262_vm9 = vcmp.gt.f32.partialorder %v261_v17, %v255_v18 }
  0xbd   :  { %v263_v23 = vsel %vm262_vm9, %v261_v17, %v255_v18  ;;  %v264_v27 = vsel %vm262_vm9, 6, %v256_v19 }
  0xbe   :  { %vm270_vm11 = vcmp.gt.f32.partialorder %v269_v21, %v263_v23 }
  0xbf   :  { %v271_v29 = vsel %vm270_vm11, %v269_v21, %v263_v23  ;;  %v272_v30 = vsel %vm270_vm11, 7, %v264_v27 }
  0xc0   :  { %v275_v31 = vadd.f32 %v1266_v28, %v271_v29  ;;  %v1458_v32 = vsel %vm282_vm10, %v272_v30, 7 }
  0xc2   :  { %v286_v34 = vsel %vm282_vm10, %v275_v31, %v211_v48 }
  0xc3   :  { %v290_v35 = vrot.slane %v286_v34, %v1344_v12  ;;  %v295_v38 = vrot.slane %v286_v34, %v1347_v13  ;;  %v303_v39 = vrot.slane %v286_v34, %v1350_v14  ;;  %v311_v43 = vrot.slane %v286_v34, %v1358_v20 }
  0xc4   :  { %v319_v49 = vrot.slane %v286_v34, %v1362_v22  ;;  %v327_v53 = vrot.slane %v286_v34, %v1366_v24  ;;  %v335_v57 = vrot.slane %v286_v34, %v1379_v33  ;;  %v343_v62 = vrot.slane %v286_v34, %v1395_v44 }
  0xc5   :  { %v291_v41 = vadd.f32 %v290_v35, %v1354_v16  ;;  %v296_v42 = vadd.f32 %v295_v38, %v1370_v26  ;;  %v304_v45 = vadd.f32 %v303_v39, %v1352_v15  ;;  %v312_v52 = vadd.f32 %v311_v43, %v1368_v25 }
  0xc6   :  { %v320_v56 = vadd.f32 %v319_v49, %v1382_v36  ;;  %v328_v61 = vadd.f32 %v327_v53, %v1384_v37  ;;  %v336_v3 = vadd.f32 %v335_v57, %v1398_v46  ;;  %v344_v6 = vadd.f32 %v343_v62, %v1403_v51 }
  0xc7   :  { %vm297_vm12 = vcmp.gt.f32.partialorder %v296_v42, %v291_v41 }
  0xc8   :  { %v298_v50 = vsel %vm297_vm12, %v296_v42, %v291_v41  ;;  %v299_v48 = vsel %vm297_vm12, 1, %v1293_v1 }
  0xc9   :  { %vm305_vm14 = vcmp.gt.f32.partialorder %v304_v45, %v298_v50 }
  0xca   :  { %v306_v54 = vsel %vm305_vm14, %v304_v45, %v298_v50  ;;  %v307_v55 = vsel %vm305_vm14, 2, %v299_v48  ;;  %v427_v48 = vsel %vm426_vm6, 1, %v1293_v1 }
  0xcb   :  { %vm313_vm15 = vcmp.gt.f32.partialorder %v312_v52, %v306_v54  ;;  %v431_v59 = vrot.slane %v427_v48, %v1344_v12 }
  0xcc   :  { %v314_v58 = vsel %vm313_vm15, %v312_v52, %v306_v54  ;;  %v315_v60 = vsel %vm313_vm15, 3, %v307_v55  ;;  %vm501_vm15 = vcmp.gt.s32.totalorder %v1390_v40, 5 }
  0xcd   :  { %vm321_vm0 = vcmp.gt.f32.partialorder %v320_v56, %v314_v58  ;;  %vm432_vm12 = vcmp.eq.s32.totalorder %v431_v59, 1 }
  0xce   :  { %v322_v63 = vsel %vm321_vm0, %v320_v56, %v314_v58  ;;  %v323_v0 = vsel %vm321_vm0, 4, %v315_v60 }
  0xcf   :  { %vm329_vm1 = vcmp.gt.f32.partialorder %v328_v61, %v322_v63 }
  0xd0   :  { %v330_v4 = vsel %vm329_vm1, %v328_v61, %v322_v63  ;;  %v331_v5 = vsel %vm329_vm1, 5, %v323_v0 }
  0xd1   :  { %vm337_vm2 = vcmp.gt.f32.partialorder %v336_v3, %v330_v4 }
  0xd2   :  { %v338_v7 = vsel %vm337_vm2, %v336_v3, %v330_v4  ;;  %v339_v8 = vsel %vm337_vm2, 6, %v331_v5 }
  0xd3   :  { %vm345_vm4 = vcmp.gt.f32.partialorder %v344_v6, %v338_v7 }
  0xd4   :  { %v346_v10 = vsel %vm345_vm4, %v344_v6, %v338_v7  ;;  %v347_v17 = vsel %vm345_vm4, 7, %v339_v8 }
  0xd5   :  { %v350_v18 = vadd.f32 %v1267_v9, %v346_v10  ;;  %v1483_v19 = vsel %vm357_vm3, %v347_v17, 7 }
  0xd7   :  { %v361_v21 = vsel %vm357_vm3, %v350_v18, %v286_v34 }
  0xd8   :  { %v365_v23 = vrot.slane %v361_v21, %v1344_v12  ;;  %v370_v27 = vrot.slane %v361_v21, %v1347_v13  ;;  %v378_v28 = vrot.slane %v361_v21, %v1350_v14  ;;  %v386_v31 = vrot.slane %v361_v21, %v1358_v20 }
  0xd9   :  { %v394_v38 = vrot.slane %v361_v21, %v1362_v22  ;;  %v402_v42 = vrot.slane %v361_v21, %v1366_v24  ;;  %v410_v50 = vrot.slane %v361_v21, %v1379_v33  ;;  %v418_v55 = vrot.slane %v361_v21, %v1395_v44 }
  0xda   :  { %v366_v29 = vadd.f32 %v365_v23, %v1354_v16  ;;  %v371_v30 = vadd.f32 %v370_v27, %v1370_v26  ;;  %v379_v35 = vadd.f32 %v378_v28, %v1352_v15  ;;  %v387_v41 = vadd.f32 %v386_v31, %v1368_v25 }
  0xdb   :  { %v395_v49 = vadd.f32 %v394_v38, %v1382_v36  ;;  %v403_v54 = vadd.f32 %v402_v42, %v1384_v37  ;;  %v411_v58 = vadd.f32 %v410_v50, %v1398_v46  ;;  %v419_v62 = vadd.f32 %v418_v55, %v1403_v51 }
  0xdc   :  { %vm372_vm5 = vcmp.gt.f32.partialorder %v371_v30, %v366_v29 }
  0xdd   :  { %v373_v39 = vsel %vm372_vm5, %v371_v30, %v366_v29  ;;  %v374_v34 = vsel %vm372_vm5, 1, %v1293_v1 }
  0xde   :  { %vm380_vm7 = vcmp.gt.f32.partialorder %v379_v35, %v373_v39 }
  0xdf   :  { %v381_v43 = vsel %vm380_vm7, %v379_v35, %v373_v39  ;;  %v382_v45 = vsel %vm380_vm7, 2, %v374_v34 }
  0xe0   :  { %vm388_vm8 = vcmp.gt.f32.partialorder %v387_v41, %v381_v43 }
  0xe1   :  { %v389_v52 = vsel %vm388_vm8, %v387_v41, %v381_v43  ;;  %v390_v53 = vsel %vm388_vm8, 3, %v382_v45  ;;  %v502_v41 = vsel %vm501_vm15, 1, %v1293_v1  ;;  %vm576_vm8 = vcmp.gt.s32.totalorder %v1390_v40, 6 }
  0xe2   :  { %vm396_vm9 = vcmp.gt.f32.partialorder %v395_v49, %v389_v52 }
  0xe3   :  { %v397_v56 = vsel %vm396_vm9, %v395_v49, %v389_v52  ;;  %v398_v57 = vsel %vm396_vm9, 4, %v390_v53  ;;  %v506_v52 = vrot.slane %v502_v41, %v1344_v12 }
  0xe4   :  { %vm404_vm10 = vcmp.gt.f32.partialorder %v403_v54, %v397_v56 }
  0xe5   :  { %v405_v60 = vsel %vm404_vm10, %v403_v54, %v397_v56  ;;  %v406_v61 = vsel %vm404_vm10, 5, %v398_v57  ;;  %vm507_vm5 = vcmp.eq.s32.totalorder %v506_v52, 1 }
  0xe6   :  { %vm412_vm11 = vcmp.gt.f32.partialorder %v411_v58, %v405_v60 }
  0xe7   :  { %v413_v63 = vsel %vm412_vm11, %v411_v58, %v405_v60  ;;  %v414_v0 = vsel %vm412_vm11, 6, %v406_v61  ;;  %v1269_v58 = vld [vmem:[%s1732_s0 + $0x28] sm:$0xff] }
  0xe8   :  { %vm420_vm13 = vcmp.gt.f32.partialorder %v419_v62, %v413_v63 }
  0xe9   :  { %v421_v3 = vsel %vm420_vm13, %v419_v62, %v413_v63  ;;  %v422_v4 = vsel %vm420_vm13, 7, %v414_v0 }
  0xea   :  { %v425_v5 = vadd.f32 %v1268_v2, %v421_v3  ;;  %v1508_v6 = vsel %vm432_vm12, %v422_v4, 7 }
  0xec   :  { %v436_v7 = vsel %vm432_vm12, %v425_v5, %v361_v21 }
  0xed   :  { %v440_v8 = vrot.slane %v436_v7, %v1344_v12  ;;  %v445_v9 = vrot.slane %v436_v7, %v1347_v13  ;;  %v453_v10 = vrot.slane %v436_v7, %v1350_v14  ;;  %v461_v23 = vrot.slane %v436_v7, %v1358_v20 }
  0xee   :  { %v469_v28 = vrot.slane %v436_v7, %v1362_v22  ;;  %v477_v31 = vrot.slane %v436_v7, %v1366_v24  ;;  %v485_v34 = vrot.slane %v436_v7, %v1379_v33  ;;  %v493_v49 = vrot.slane %v436_v7, %v1395_v44 }
  0xef   :  { %v441_v17 = vadd.f32 %v440_v8, %v1354_v16  ;;  %v446_v18 = vadd.f32 %v445_v9, %v1370_v26  ;;  %v454_v27 = vadd.f32 %v453_v10, %v1352_v15  ;;  %v462_v30 = vadd.f32 %v461_v23, %v1368_v25 }
  0xf0   :  { %v470_v39 = vadd.f32 %v469_v28, %v1382_v36  ;;  %v478_v45 = vadd.f32 %v477_v31, %v1384_v37  ;;  %v486_v53 = vadd.f32 %v485_v34, %v1398_v46  ;;  %v494_v56 = vadd.f32 %v493_v49, %v1403_v51 }
  0xf1   :  { %vm447_vm14 = vcmp.gt.f32.partialorder %v446_v18, %v441_v17  ;;  %v577_v31 = vsel %vm576_vm8, 1, %v1293_v1 }
  0xf2   :  { %v448_v29 = vsel %vm447_vm14, %v446_v18, %v441_v17  ;;  %v449_v21 = vsel %vm447_vm14, 1, %v1293_v1 }
  0xf3   :  { %vm455_vm0 = vcmp.gt.f32.partialorder %v454_v27, %v448_v29 }
  0xf4   :  { %v456_v35 = vsel %vm455_vm0, %v454_v27, %v448_v29  ;;  %v457_v38 = vsel %vm455_vm0, 2, %v449_v21 }
  0xf5   :  { %vm463_vm1 = vcmp.gt.f32.partialorder %v462_v30, %v456_v35 }
  0xf6   :  { %v464_v42 = vsel %vm463_vm1, %v462_v30, %v456_v35  ;;  %v465_v43 = vsel %vm463_vm1, 3, %v457_v38 }
  0xf7   :  { %vm471_vm2 = vcmp.gt.f32.partialorder %v470_v39, %v464_v42 }
  0xf8   :  { %v472_v50 = vsel %vm471_vm2, %v470_v39, %v464_v42  ;;  %v473_v48 = vsel %vm471_vm2, 4, %v465_v43  ;;  %v581_v43 = vrot.slane %v577_v31, %v1344_v12 }
  0xf9   :  { %vm479_vm3 = vcmp.gt.f32.partialorder %v478_v45, %v472_v50 }
  0xfa   :  { %v480_v54 = vsel %vm479_vm3, %v478_v45, %v472_v50  ;;  %v481_v55 = vsel %vm479_vm3, 5, %v473_v48  ;;  %vm582_vm14 = vcmp.eq.s32.totalorder %v581_v43, 1  ;;  %vm651_vm3 = vcmp.gt.s32.totalorder %v1390_v40, 7 }
  0xfb   :  { %vm487_vm4 = vcmp.gt.f32.partialorder %v486_v53, %v480_v54 }
  0xfc   :  { %v488_v57 = vsel %vm487_vm4, %v486_v53, %v480_v54  ;;  %v489_v59 = vsel %vm487_vm4, 6, %v481_v55  ;;  %v1270_v54 = vld [vmem:[%s1732_s0 + $0x30] sm:$0xff] }
  0xfd   :  { %vm495_vm6 = vcmp.gt.f32.partialorder %v494_v56, %v488_v57 }
  0xfe   :  { %v496_v60 = vsel %vm495_vm6, %v494_v56, %v488_v57  ;;  %v497_v61 = vsel %vm495_vm6, 7, %v489_v59 }
  0xff   :  { %v500_v62 = vadd.f32 %v1269_v58, %v496_v60  ;;  %v1533_v63 = vsel %vm507_vm5, %v497_v61, 7 }
 0x101   :  { %v511_v0 = vsel %vm507_vm5, %v500_v62, %v436_v7 }
 0x102   :  { %v515_v2 = vrot.slane %v511_v0, %v1344_v12  ;;  %v520_v3 = vrot.slane %v511_v0, %v1347_v13  ;;  %v528_v4 = vrot.slane %v511_v0, %v1350_v14  ;;  %v536_v9 = vrot.slane %v511_v0, %v1358_v20 }
 0x103   :  { %v544_v17 = vrot.slane %v511_v0, %v1362_v22  ;;  %v552_v27 = vrot.slane %v511_v0, %v1366_v24  ;;  %v560_v30 = vrot.slane %v511_v0, %v1379_v33  ;;  %v568_v34 = vrot.slane %v511_v0, %v1395_v44 }
 0x104   :  { %v516_v5 = vadd.f32 %v515_v2, %v1354_v16  ;;  %v521_v8 = vadd.f32 %v520_v3, %v1370_v26  ;;  %v529_v10 = vadd.f32 %v528_v4, %v1352_v15  ;;  %v537_v23 = vadd.f32 %v536_v9, %v1368_v25 }
 0x105   :  { %v545_v21 = vadd.f32 %v544_v17, %v1382_v36  ;;  %v553_v39 = vadd.f32 %v552_v27, %v1384_v37  ;;  %v561_v45 = vadd.f32 %v560_v30, %v1398_v46  ;;  %v569_v48 = vadd.f32 %v568_v34, %v1403_v51 }
 0x106   :  { %vm522_vm7 = vcmp.gt.f32.partialorder %v521_v8, %v516_v5 }
 0x107   :  { %v523_v18 = vsel %vm522_vm7, %v521_v8, %v516_v5  ;;  %v524_v7 = vsel %vm522_vm7, 1, %v1293_v1 }
 0x108   :  { %vm530_vm9 = vcmp.gt.f32.partialorder %v529_v10, %v523_v18 }
 0x109   :  { %v531_v28 = vsel %vm530_vm9, %v529_v10, %v523_v18  ;;  %v532_v29 = vsel %vm530_vm9, 2, %v524_v7  ;;  %v652_v10 = vsel %vm651_vm3, 1, %v1293_v1  ;;  %v58_v7 = vpop.permute.xlu0 %57 }
 0x10a   :  { %vm538_vm10 = vcmp.gt.f32.partialorder %v537_v23, %v531_v28 }
 0x10b   :  { %v539_v35 = vsel %vm538_vm10, %v537_v23, %v531_v28  ;;  %v540_v38 = vsel %vm538_vm10, 3, %v532_v29 }
 0x10c   :  { %vm546_vm11 = vcmp.gt.f32.partialorder %v545_v21, %v539_v35 }
 0x10d   :  { %v547_v41 = vsel %vm546_vm11, %v545_v21, %v539_v35  ;;  %v548_v42 = vsel %vm546_vm11, 4, %v540_v38 }
 0x10e   :  { %vm554_vm12 = vcmp.gt.f32.partialorder %v553_v39, %v547_v41 }
 0x10f   :  { %v555_v49 = vsel %vm554_vm12, %v553_v39, %v547_v41  ;;  %v556_v50 = vsel %vm554_vm12, 5, %v548_v42 }
 0x110   :  { %vm562_vm13 = vcmp.gt.f32.partialorder %v561_v45, %v555_v49 }
 0x111   :  { %v563_v52 = vsel %vm562_vm13, %v561_v45, %v555_v49  ;;  %v564_v53 = vsel %vm562_vm13, 6, %v556_v50 }
 0x112   :  { %vm570_vm15 = vcmp.gt.f32.partialorder %v569_v48, %v563_v52 }
 0x113   :  { %v571_v55 = vsel %vm570_vm15, %v569_v48, %v563_v52  ;;  %v572_v56 = vsel %vm570_vm15, 7, %v564_v53 }
 0x114   :  { %v575_v57 = vadd.f32 %v1270_v54, %v571_v55  ;;  %v1558_v59 = vsel %vm582_vm14, %v572_v56, 7 }
 0x116   :  { %v586_v58 = vsel %vm582_vm14, %v575_v57, %v511_v0 }
 0x117   :  { %v590_v60 = vrot.slane %v586_v58, %v1344_v12  ;;  %v595_v61 = vrot.slane %v586_v58, %v1347_v13  ;;  %v603_v62 = vrot.slane %v586_v58, %v1350_v14  ;;  %v611_v4 = vrot.slane %v586_v58, %v1358_v20 }
 0x118   :  { %v619_v8 = vrot.slane %v586_v58, %v1362_v22  ;;  %v627_v13 = vrot.slane %v586_v58, %v1366_v24  ;;  %v643_v22 = vrot.slane %v586_v58, %v1395_v44  ;;  %v656_v44 = vrot.slane %v652_v10, %v1344_v12 }
 0x119   :  { %v591_v2 = vadd.f32 %v590_v60, %v1354_v16  ;;  %v596_v3 = vadd.f32 %v595_v61, %v1370_v26  ;;  %v604_v5 = vadd.f32 %v603_v62, %v1352_v15  ;;  %v612_v0 = vadd.f32 %v611_v4, %v1368_v25 }
 0x11a   :  { %v620_v16 = vadd.f32 %v619_v8, %v1382_v36  ;;  %v635_v26 = vrot.slane %v586_v58, %v1379_v33  ;;  %v628_v15 = vadd.f32 %v627_v13, %v1384_v37  ;;  %v644_v33 = vadd.f32 %v643_v22, %v1403_v51  ;;  %v1271_v37 = vld [vmem:[%s1732_s0 + $0x38] sm:$0xff] }
 0x11b   :  { %vm597_vm0 = vcmp.gt.f32.partialorder %v596_v3, %v591_v2  ;;  %vm1589_vm8 = vcmp.eq.s32.totalorder %v656_v44, 1  ;;  %v1301_v62 = vmov 1966171168  }
 0x11c   :  { %v598_v9 = vsel %vm597_vm0, %v596_v3, %v591_v2  ;;  %v636_v24 = vadd.f32 %v635_v26, %v1398_v46  ;;  %v599_v29 = vsel %vm597_vm0, 1, %v1293_v1  ;;  %v738_v2 = vunpack.c.l.s4 %v1301_v62 }
 0x11d   :  { %vm605_vm1 = vcmp.gt.f32.partialorder %v604_v5, %v598_v9 }
 0x11e   :  { %v606_v14 = vsel %vm605_vm1, %v604_v5, %v598_v9  ;;  %v607_v35 = vsel %vm605_vm1, 2, %v599_v29  ;;  %v739_v13 = vunpack.c.0.s8 %v738_v2 }
 0x11f   :  { %vm613_vm2 = vcmp.gt.f32.partialorder %v612_v0, %v606_v14 }
 0x120   :  { %v614_v20 = vsel %vm613_vm2, %v612_v0, %v606_v14  ;;  %v615_v42 = vsel %vm613_vm2, 3, %v607_v35  ;;  %v1610_v22 = vsub.s32 %v739_v13, %v1340_v11  ;;  %v944_v13 = vcombine.high %v1533_v63, %v1533_v63 }
 0x121   :  { %vm621_vm4 = vcmp.gt.f32.partialorder %v620_v16, %v614_v20 }
 0x122   :  { %v622_v25 = vsel %vm621_vm4, %v620_v16, %v614_v20  ;;  %v623_v49 = vsel %vm621_vm4, 4, %v615_v42 }
 0x123   :  { %vm629_vm5 = vcmp.gt.f32.partialorder %v628_v15, %v622_v25 }
 0x124   :  { %v630_v36 = vsel %vm629_vm5, %v628_v15, %v622_v25 }
 0x125   :  { %vm637_vm6 = vcmp.gt.f32.partialorder %v636_v24, %v630_v36 }
 0x126   :  { %v638_v17 = vsel %vm637_vm6, %v636_v24, %v630_v36 }
 0x127   :  { %vm645_vm7 = vcmp.gt.f32.partialorder %v644_v33, %v638_v17 }
 0x128   :  { %v646_v18 = vsel %vm645_vm7, %v644_v33, %v638_v17 }
 0x129   :  { %v650_v46 = vadd.f32 %v1271_v37, %v646_v18 }
 0x12b   :  { %v661_v51 = vsel %vm1589_vm8, %v650_v46, %v586_v58 }
 0x12c   :  { %v662_v27 = vadd.f32 %v661_v51, %v58_v7 }
 0x12e   :  { %v664_v28 = vrot.slane %v662_v27, 7 }
 0x130   :  { %vm666_vm9 = vcmp.gt.f32.partialorder %v662_v27, %v664_v28 }
 0x131   :  { %v667_v21 = vsel %vm666_vm9, %v662_v27, %v664_v28  ;;  %v668_v12 = vsel %vm666_vm9, 1, %v1293_v1  ;;  %v631_v1 = vsel %vm629_vm5, 5, %v623_v49  ;;  %v875_v49 = vcombine.high %v1558_v59, %v1558_v59 }
 0x132   :  { %v670_v30 = vrot.slane %v667_v21, 7  ;;  %v674_v31 = vrot.slane %v668_v12, 7  ;;  %v639_v56 = vsel %vm637_vm6, 6, %v631_v1  ;;  %v1616_v12 = vadd.s32 4294967295, %v1390_v40 }
 0x133   :  { %v647_v3 = vsel %vm645_vm7, 7, %v639_v56 }
 0x134   :  { %vm672_vm10 = vcmp.gt.f32.partialorder %v662_v27, %v670_v30  ;;  %v658_v8 = vsel %vm1589_vm8, %v647_v3, 7  ;;  %vm735_vm7 = vcmp.gt.s32.totalorder %v1616_v12, 7  ;;  %vm771_vm8 = vcmp.ge.s32.totalorder %v1616_v12, 7 }
 0x135   :  { %v673_v38 = vsel %vm672_vm10, %v662_v27, %v670_v30  ;;  %v675_v39 = vsel %vm672_vm10, 2, %v674_v31  ;;  %v714_v26 = vrot.slane %v658_v8, 2  ;;  %v715_v20 = vrot.slane %v658_v8, 1 }
 0x136   :  { %v677_v34 = vrot.slane %v673_v38, 7  ;;  %v681_v41 = vrot.slane %v675_v39, 7  ;;  %v718_v15 = vrot.slane %v658_v8, 3  ;;  %v721_v24 = vrot.slane %v658_v8, 4 }
 0x137   :  { %v724_v36 = vrot.slane %v658_v8, 5  ;;  %v727_v37 = vrot.slane %v658_v8, 6  ;;  %v730_v18 = vrot.slane %v658_v8, 7  ;;  %v782_v28 = vrot.slane %v658_v8, %v1610_v22 }
 0x138   :  { %vm679_vm11 = vcmp.gt.f32.partialorder %v662_v27, %v677_v34  ;;  %v806_v29 = vcombine.high %v658_v8, %v658_v8 }
 0x139   :  { %v680_v43 = vsel %vm679_vm11, %v662_v27, %v677_v34  ;;  %v682_v45 = vsel %vm679_vm11, 3, %v681_v41  ;;  %v783_v35 = vcombine.high %v782_v28, %v782_v28  ;;  %v790_v34 = vrot.slane %v782_v28, %v1610_v22 }
 0x13a   :  { %v684_v50 = vrot.slane %v680_v43, 7  ;;  %v688_v48 = vrot.slane %v682_v45, 7  ;;  %v813_v38 = vrot.slane %v806_v29, %v1610_v22  ;;  %v851_v45 = vrot.slane %v1558_v59, %v1610_v22 }
 0x13b   :  { %v797_v43 = vrot.slane %v783_v35, %v1610_v22  ;;  %v1013_v28 = vcombine.high %v1508_v6, %v1508_v6 }
 0x13c   :  { %vm686_vm12 = vcmp.gt.f32.partialorder %v662_v27, %v684_v50  ;;  %v823_v40 = vcombine.high %v813_v38, %v813_v38  ;;  %v852_v56 = vcombine.high %v851_v45, %v851_v45 }
 0x13d   :  { %v687_v52 = vsel %vm686_vm12, %v662_v27, %v684_v50  ;;  %v689_v53 = vsel %vm686_vm12, 4, %v688_v48  ;;  %v800_v48 = vcombine.high %v790_v34, %v790_v34 }
 0x13e   :  { %v691_v54 = vrot.slane %v687_v52, 7  ;;  %v695_v55 = vrot.slane %v689_v53, 7  ;;  %v820_v52 = vrot.slane %v813_v38, %v1610_v22 }
 0x140   :  { %vm693_vm13 = vcmp.gt.f32.partialorder %v662_v27, %v691_v54  ;;  %v833_v2 = vcombine.high %v820_v52, %v820_v52 }
 0x141   :  { %v694_v57 = vsel %vm693_vm13, %v662_v27, %v691_v54  ;;  %v696_v58 = vsel %vm693_vm13, 5, %v695_v55  ;;  %v803_v54 = vcombine.high %v797_v43, %v797_v43  ;;  %v830_v55 = vrot.slane %v823_v40, %v1610_v22 }
 0x142   :  { %v698_v60 = vrot.slane %v694_v57, 7  ;;  %v702_v61 = vrot.slane %v696_v58, 7  ;;  %v882_v57 = vrot.slane %v875_v49, %v1610_v22  ;;  %vm838_vm13 = vcmp.gt.s32.totalorder %v1616_v12, 6 }
 0x144   :  { %vm700_vm14 = vcmp.gt.f32.partialorder %v662_v27, %v698_v60 }
 0x145   :  { %v701_v4 = vsel %vm700_vm14, %v662_v27, %v698_v60  ;;  %v703_v5 = vsel %vm700_vm14, 6, %v702_v61  ;;  %v859_v61 = vrot.slane %v851_v45, %v1610_v22  ;;  %v1058_v45 = vrot.slane %v1483_v19, %v1610_v22 }
 0x146   :  { %v705_v9 = vrot.slane %v701_v4, 7  ;;  %v709_v0 = vrot.slane %v703_v5, 7  ;;  %v836_v4 = vcombine.high %v830_v55, %v830_v55  ;;  %v866_v5 = vrot.slane %v852_v56, %v1610_v22 }
 0x148   :  { %vm707_vm15 = vcmp.gt.f32.partialorder %v662_v27, %v705_v9 }
 0x149   :  { %v708_v14 = vsel %vm707_vm15, %v662_v27, %v705_v9  ;;  %v710_v16 = vsel %vm707_vm15, 7, %v709_v0  ;;  %v920_v0 = vrot.slane %v1533_v63, %v1610_v22 }
 0x14a   :  { %711 = vst [vmem:[%s1733_s5 - $0x7] sm:$0x80] %v708_v14  ;;  %vm713_vm0 = vcmp.eq.s32.totalorder %v710_v16, 1  ;;  %vm717_vm1 = vcmp.eq.s32.totalorder %v710_v16, 2  ;;  %vm720_vm2 = vcmp.eq.s32.totalorder %v710_v16, 3  ;;  %v753_v33 = vcombine.high %v710_v16, %v710_v16 }
 0x14b   :  { %v716_v25 = vsel %vm713_vm0, %v714_v26, %v715_v20  ;;  %vm723_vm3 = vcmp.eq.s32.totalorder %v710_v16, 4  ;;  %vm726_vm4 = vcmp.eq.s32.totalorder %v710_v16, 5  ;;  %vm729_vm5 = vcmp.eq.s32.totalorder %v710_v16, 6 }
 0x14c   :  { %v719_v10 = vsel %vm717_vm1, %v718_v15, %v716_v25  ;;  %v760_v7 = vrot.slane %v753_v33, %v1610_v22  ;;  %vm732_vm6 = vcmp.eq.s32.totalorder %v710_v16, 7  ;;  %vm840_vm0 = vcmp.ge.s32.totalorder %v1616_v12, 6 }
 0x14d   :  { %v722_v17 = vsel %vm720_vm2, %v721_v24, %v719_v10  ;;  %v869_v16 = vcombine.high %v859_v61, %v859_v61  ;;  %v889_v20 = vrot.slane %v882_v57, %v1610_v22  ;;  %v872_v25 = vcombine.high %v866_v5, %v866_v5 }
 0x14e   :  { %v725_v44 = vsel %vm723_vm3, %v724_v36, %v722_v17  ;;  %v761_v27 = vcombine.high %v760_v7, %v760_v7  ;;  %v921_v36 = vcombine.high %v920_v0, %v920_v0  ;;  %v951_v33 = vrot.slane %v944_v13, %v1610_v22 }
 0x14f   :  { %v728_v46 = vsel %vm726_vm4, %v727_v37, %v725_v44  ;;  %v989_v37 = vrot.slane %v1508_v6, %v1610_v22  ;;  %v928_v7 = vrot.slane %v920_v0, %v1610_v22  ;;  %v1127_v0 = vrot.slane %v1458_v32, %v1610_v22 }
 0x150   :  { %v731_v23 = vsel %vm729_vm5, %v730_v18, %v728_v46  ;;  %v768_v31 = vrot.slane %v761_v27, %v1610_v22  ;;  %v902_v18 = vcombine.high %v889_v20, %v889_v20  ;;  %v958_v35 = vrot.slane %v951_v33, %v1610_v22 }
 0x151   :  { %v733_v11 = vsel %vm732_vm6, %v658_v8, %v731_v23  ;;  %vm907_vm6 = vcmp.gt.s32.totalorder %v1616_v12, 5  ;;  %v997_v40 = vrot.slane %v989_v37, %v1610_v22 }
 0x152   :  { %v736_v51 = vcombine.high %v733_v11, %v733_v11  ;;  %v769_v42 = vcombine.high %v768_v31, %v768_v31 }
 0x154   :  { %v743_v21 = vrot.slane %v736_v51, %v1610_v22  ;;  %v961_v51 = vcombine.high %v951_v33, %v951_v33  ;;  %v1128_v33 = vcombine.high %v1127_v0, %v1127_v0 }
 0x156   :  { %v744_v30 = vcombine.high %v743_v21, %v743_v21  ;;  %v938_v21 = vcombine.high %v928_v7, %v928_v7  ;;  %v968_v34 = vrot.slane %v961_v51, %v1610_v22  ;;  %v1196_v51 = vrot.slane %v1433_v47, %v1610_v22 }
 0x158   :  { %v751_v39 = vrot.slane %v744_v30, %v1610_v22  ;;  %v990_v30 = vcombine.high %v989_v37, %v989_v37 }
 0x15a   :  { %v752_v41 = vcombine.high %v751_v39, %v751_v39 }
 0x15c   :  { %v770_v50 = vsel %vm735_vm7, %v752_v41, %v769_v42  ;;  %v1020_v42 = vrot.slane %v1013_v28, %v1610_v22 }
 0x15d   :  { %v772_v1 = vsel %vm771_vm8, %v770_v50, 7  ;;  %vm775_vm9 = vcmp.eq.s32.totalorder %v770_v50, 1  ;;  %vm799_vm10 = vcmp.eq.s32.totalorder %v770_v50, 2  ;;  %vm802_vm11 = vcmp.eq.s32.totalorder %v770_v50, 3 }
 0x15e   :  { %773 = vst [vmem:[%s1734_s4 + $0x7] sm:$0x1] %v772_v1  ;;  %v798_v53 = vsel %vm775_vm9, %v797_v43, %v658_v8  ;;  %vm805_vm12 = vcmp.eq.s32.totalorder %v770_v50, 4  ;;  %vm822_vm14 = vcmp.eq.s32.totalorder %v770_v50, 5  ;;  %vm832_vm15 = vcmp.eq.s32.totalorder %v770_v50, 6 }
 0x15f   :  { %v801_v58 = vsel %vm799_vm10, %v800_v48, %v798_v53  ;;  %v892_v8 = vcombine.high %v882_v57, %v882_v57  ;;  %vm835_vm1 = vcmp.eq.s32.totalorder %v770_v50, 7  ;;  %vm909_vm9 = vcmp.ge.s32.totalorder %v1616_v12, 5 }
 0x160   :  { %v804_v60 = vsel %vm802_vm11, %v803_v54, %v801_v58  ;;  %v1004_v48 = vrot.slane %v990_v30, %v1610_v22  ;;  %v1007_v57 = vcombine.high %v997_v40, %v997_v40  ;;  %v1059_v58 = vcombine.high %v1058_v45, %v1058_v45 }
 0x161   :  { %v821_v62 = vsel %vm805_vm12, %v820_v52, %v804_v60  ;;  %v899_v24 = vrot.slane %v892_v8, %v1610_v22  ;;  %v974_v52 = vcombine.high %v968_v34, %v968_v34  ;;  %v1027_v61 = vrot.slane %v1020_v42, %v1610_v22 }
 0x162   :  { %v831_v3 = vsel %vm822_vm14, %v830_v55, %v821_v62  ;;  %v1082_v55 = vcombine.high %v1483_v19, %v1483_v19 }
 0x163   :  { %v834_v9 = vsel %vm832_vm15, %v833_v2, %v831_v3  ;;  %v905_v23 = vcombine.high %v899_v24, %v899_v24  ;;  %v1010_v2 = vcombine.high %v1004_v48, %v1004_v48 }
 0x164   :  { %v837_v14 = vsel %vm835_vm1, %v836_v4, %v834_v9  ;;  %vm976_vm1 = vcmp.gt.s32.totalorder %v1616_v12, 4  ;;  %v1066_v9 = vrot.slane %v1058_v45, %v1610_v22 }
 0x165   :  { %v839_v26 = vsel %vm838_vm13, %v837_v14, %v770_v50  ;;  %v971_v50 = vcombine.high %v958_v35, %v958_v35  ;;  %v1040_v14 = vcombine.high %v1027_v61, %v1027_v61 }
 0x166   :  { %v841_v15 = vsel %vm840_vm0, %v839_v26, 7  ;;  %vm844_vm2 = vcmp.eq.s32.totalorder %v839_v26, 1  ;;  %vm868_vm3 = vcmp.eq.s32.totalorder %v839_v26, 2  ;;  %vm871_vm4 = vcmp.eq.s32.totalorder %v839_v26, 3 }
 0x167   :  { %842 = vst [vmem:[%s1734_s4 + $0x6] sm:$0x1] %v841_v15  ;;  %v867_v10 = vsel %vm844_vm2, %v866_v5, %v1558_v59  ;;  %vm874_vm5 = vcmp.eq.s32.totalorder %v839_v26, 4  ;;  %vm891_vm7 = vcmp.eq.s32.totalorder %v839_v26, 5  ;;  %vm901_vm8 = vcmp.eq.s32.totalorder %v839_v26, 6 }
 0x168   :  { %v870_v17 = vsel %vm868_vm3, %v869_v16, %v867_v10  ;;  %v935_v59 = vrot.slane %v921_v36, %v1610_v22  ;;  %vm904_vm10 = vcmp.eq.s32.totalorder %v839_v26, 7  ;;  %vm978_vm3 = vcmp.ge.s32.totalorder %v1616_v12, 4 }
 0x169   :  { %v873_v44 = vsel %vm871_vm4, %v872_v25, %v870_v17  ;;  %v1089_v5 = vrot.slane %v1082_v55, %v1610_v22  ;;  %v1073_v16 = vrot.slane %v1059_v58, %v1610_v22  ;;  %v1076_v36 = vcombine.high %v1066_v9, %v1066_v9 }
 0x16a   :  { %v890_v46 = vsel %vm874_vm5, %v889_v20, %v873_v44  ;;  %v941_v39 = vcombine.high %v935_v59, %v935_v59 }
 0x16b   :  { %v900_v11 = vsel %vm891_vm7, %v899_v24, %v890_v46  ;;  %v1151_v24 = vcombine.high %v1458_v32, %v1458_v32  ;;  %v1096_v37 = vrot.slane %v1089_v5, %v1610_v22 }
 0x16c   :  { %v903_v27 = vsel %vm901_vm8, %v902_v18, %v900_v11  ;;  %v1079_v18 = vcombine.high %v1073_v16, %v1073_v16 }
 0x16d   :  { %v906_v29 = vsel %vm904_vm10, %v905_v23, %v903_v27  ;;  %vm1045_vm10 = vcmp.gt.s32.totalorder %v1616_v12, 3  ;;  %v1158_v23 = vrot.slane %v1151_v24, %v1610_v22  ;;  %v1109_v28 = vcombine.high %v1096_v37, %v1096_v37 }
 0x16e   :  { %v908_v31 = vsel %vm907_vm6, %v906_v29, %v839_v26  ;;  %v1142_v29 = vrot.slane %v1128_v33, %v1610_v22 }
 0x16f   :  { %v910_v38 = vsel %vm909_vm9, %v908_v31, 7  ;;  %vm913_vm11 = vcmp.eq.s32.totalorder %v908_v31, 1  ;;  %vm937_vm12 = vcmp.eq.s32.totalorder %v908_v31, 2  ;;  %vm940_vm13 = vcmp.eq.s32.totalorder %v908_v31, 3 }
 0x170   :  { %911 = vst [vmem:[%s1734_s4 + $0x5] sm:$0x1] %v910_v38  ;;  %v936_v41 = vsel %vm913_vm11, %v935_v59, %v1533_v63  ;;  %vm943_vm14 = vcmp.eq.s32.totalorder %v908_v31, 4  ;;  %vm960_vm15 = vcmp.eq.s32.totalorder %v908_v31, 5  ;;  %vm970_vm0 = vcmp.eq.s32.totalorder %v908_v31, 6 }
 0x171   :  { %v939_v43 = vsel %vm937_vm12, %v938_v21, %v936_v41  ;;  %v1030_v63 = vcombine.high %v1020_v42, %v1020_v42  ;;  %vm973_vm2 = vcmp.eq.s32.totalorder %v908_v31, 7  ;;  %vm1047_vm12 = vcmp.ge.s32.totalorder %v1616_v12, 3 }
 0x172   :  { %v942_v49 = vsel %vm940_vm13, %v941_v39, %v939_v43  ;;  %v1135_v59 = vrot.slane %v1127_v0, %v1610_v22  ;;  %v1220_v38 = vcombine.high %v1433_v47, %v1433_v47  ;;  %v1197_v41 = vcombine.high %v1196_v51, %v1196_v51 }
 0x173   :  { %v959_v1 = vsel %vm943_vm14, %v958_v35, %v942_v49  ;;  %v1037_v3 = vrot.slane %v1030_v63, %v1610_v22  ;;  %v1165_v43 = vrot.slane %v1158_v23, %v1610_v22  ;;  %v1148_v45 = vcombine.high %v1142_v29, %v1142_v29 }
 0x174   :  { %v969_v53 = vsel %vm960_vm15, %v968_v34, %v959_v1  ;;  %v1145_v34 = vcombine.high %v1135_v59, %v1135_v59 }
 0x175   :  { %v972_v54 = vsel %vm970_vm0, %v971_v50, %v969_v53  ;;  %v1043_v20 = vcombine.high %v1037_v3, %v1037_v3  ;;  %v1178_v63 = vcombine.high %v1165_v43, %v1165_v43 }
 0x176   :  { %v975_v56 = vsel %vm973_vm2, %v974_v52, %v972_v54  ;;  %v1204_v52 = vrot.slane %v1196_v51, %v1610_v22  ;;  %v1211_v54 = vrot.slane %v1197_v41, %v1610_v22 }
 0x177   :  { %v977_v60 = vsel %vm976_vm1, %v975_v56, %v908_v31 }
 0x178   :  { %v979_v62 = vsel %vm978_vm3, %v977_v60, 7  ;;  %vm982_vm4 = vcmp.eq.s32.totalorder %v977_v60, 1  ;;  %vm1006_vm5 = vcmp.eq.s32.totalorder %v977_v60, 2  ;;  %vm1009_vm6 = vcmp.eq.s32.totalorder %v977_v60, 3 }
 0x179   :  { %980 = vst [vmem:[%s1734_s4 + $0x4] sm:$0x1] %v979_v62  ;;  %v1005_v4 = vsel %vm982_vm4, %v1004_v48, %v1508_v6  ;;  %vm1012_vm7 = vcmp.eq.s32.totalorder %v977_v60, 4  ;;  %vm1029_vm8 = vcmp.eq.s32.totalorder %v977_v60, 5  ;;  %vm1039_vm9 = vcmp.eq.s32.totalorder %v977_v60, 6 }
 0x17a   :  { %v1008_v8 = vsel %vm1006_vm5, %v1007_v57, %v1005_v4  ;;  %v1099_v6 = vcombine.high %v1089_v5, %v1089_v5  ;;  %vm1042_vm11 = vcmp.eq.s32.totalorder %v977_v60, 7  ;;  %vm1114_vm3 = vcmp.gt.s32.totalorder %v1616_v12, 2 }
 0x17b   :  { %v1011_v13 = vsel %vm1009_vm6, %v1010_v2, %v1008_v8  ;;  %vm1116_vm5 = vcmp.ge.s32.totalorder %v1616_v12, 2  ;;  %v1227_v48 = vrot.slane %v1220_v38, %v1610_v22  ;;  %v1217_v4 = vcombine.high %v1211_v54, %v1211_v54 }
 0x17c   :  { %v1028_v26 = vsel %vm1012_vm7, %v1027_v61, %v1011_v13  ;;  %v1106_v7 = vrot.slane %v1099_v6, %v1610_v22  ;;  %v1214_v61 = vcombine.high %v1204_v52, %v1204_v52 }
 0x17d   :  { %v1038_v15 = vsel %vm1029_vm8, %v1037_v3, %v1028_v26  ;;  %v1237_v58 = vcombine.high %v1227_v48, %v1227_v48  ;;  %v1234_v2 = vrot.slane %v1227_v48, %v1610_v22 }
 0x17e   :  { %v1041_v25 = vsel %vm1039_vm9, %v1040_v14, %v1038_v15  ;;  %v1112_v30 = vcombine.high %v1106_v7, %v1106_v7 }
 0x17f   :  { %v1044_v10 = vsel %vm1042_vm11, %v1043_v20, %v1041_v25  ;;  %v1244_v5 = vrot.slane %v1237_v58, %v1610_v22  ;;  %v1247_v13 = vcombine.high %v1234_v2, %v1234_v2 }
 0x180   :  { %v1046_v17 = vsel %vm1045_vm10, %v1044_v10, %v977_v60 }
 0x181   :  { %v1048_v44 = vsel %vm1047_vm12, %v1046_v17, 7  ;;  %vm1051_vm13 = vcmp.eq.s32.totalorder %v1046_v17, 1  ;;  %vm1075_vm14 = vcmp.eq.s32.totalorder %v1046_v17, 2  ;;  %vm1078_vm15 = vcmp.eq.s32.totalorder %v1046_v17, 3 }
 0x182   :  { %1049 = vst [vmem:[%s1734_s4 + $0x3] sm:$0x1] %v1048_v44  ;;  %v1074_v46 = vsel %vm1051_vm13, %v1073_v16, %v1483_v19  ;;  %vm1081_vm0 = vcmp.eq.s32.totalorder %v1046_v17, 4  ;;  %vm1098_vm1 = vcmp.eq.s32.totalorder %v1046_v17, 5  ;;  %vm1108_vm2 = vcmp.eq.s32.totalorder %v1046_v17, 6 }
 0x183   :  { %v1077_v11 = vsel %vm1075_vm14, %v1076_v36, %v1074_v46  ;;  %v1168_v19 = vcombine.high %v1158_v23, %v1158_v23  ;;  %vm1111_vm4 = vcmp.eq.s32.totalorder %v1046_v17, 7  ;;  %vm1183_vm12 = vcmp.gt.s32.totalorder %v1616_v12, 1 }
 0x184   :  { %v1080_v27 = vsel %vm1078_vm15, %v1079_v18, %v1077_v11  ;;  %vm1185_vm14 = vcmp.ge.s32.totalorder %v1616_v12, 1  ;;  %v1250_v16 = vcombine.high %v1244_v5, %v1244_v5 }
 0x185   :  { %v1097_v21 = vsel %vm1081_vm0, %v1096_v37, %v1080_v27  ;;  %v1175_v49 = vrot.slane %v1168_v19, %v1610_v22 }
 0x186   :  { %v1107_v31 = vsel %vm1098_vm1, %v1106_v7, %v1097_v21 }
 0x187   :  { %v1110_v35 = vsel %vm1108_vm2, %v1109_v28, %v1107_v31  ;;  %v1181_v56 = vcombine.high %v1175_v49, %v1175_v49 }
 0x188   :  { %v1113_v39 = vsel %vm1111_vm4, %v1112_v30, %v1110_v35 }
 0x189   :  { %v1115_v42 = vsel %vm1114_vm3, %v1113_v39, %v1046_v17 }
 0x18a   :  { %v1117_v40 = vsel %vm1116_vm5, %v1115_v42, 7  ;;  %vm1120_vm6 = vcmp.eq.s32.totalorder %v1115_v42, 1  ;;  %vm1144_vm7 = vcmp.eq.s32.totalorder %v1115_v42, 2  ;;  %vm1147_vm8 = vcmp.eq.s32.totalorder %v1115_v42, 3 }
 0x18b   :  { %1118 = vst [vmem:[%s1734_s4 + $0x2] sm:$0x1] %v1117_v40  ;;  %v1143_v50 = vsel %vm1120_vm6, %v1142_v29, %v1458_v32  ;;  %vm1150_vm9 = vcmp.eq.s32.totalorder %v1115_v42, 4  ;;  %vm1167_vm10 = vcmp.eq.s32.totalorder %v1115_v42, 5  ;;  %vm1177_vm11 = vcmp.eq.s32.totalorder %v1115_v42, 6 }
 0x18c   :  { %v1146_v1 = vsel %vm1144_vm7, %v1145_v34, %v1143_v50  ;;  %vm1180_vm13 = vcmp.eq.s32.totalorder %v1115_v42, 7  ;;  %vm1252_vm5 = vcmp.gt.s32.totalorder %v1616_v12, 0  ;;  %vm1254_vm7 = vcmp.ge.s32.totalorder %v1616_v12, 0 }
 0x18d   :  { %v1149_v53 = vsel %vm1147_vm8, %v1148_v45, %v1146_v1 }
 0x18e   :  { %v1166_v55 = vsel %vm1150_vm9, %v1165_v43, %v1149_v53 }
 0x18f   :  { %v1176_v57 = vsel %vm1167_vm10, %v1175_v49, %v1166_v55 }
 0x190   :  { %v1179_v32 = vsel %vm1177_vm11, %v1178_v63, %v1176_v57 }
 0x191   :  { %v1182_v60 = vsel %vm1180_vm13, %v1181_v56, %v1179_v32 }
 0x192   :  { %v1184_v62 = vsel %vm1183_vm12, %v1182_v60, %v1115_v42 }
 0x193   :  { %v1186_v3 = vsel %vm1185_vm14, %v1184_v62, 7  ;;  %vm1189_vm15 = vcmp.eq.s32.totalorder %v1184_v62, 1  ;;  %vm1213_vm0 = vcmp.eq.s32.totalorder %v1184_v62, 2  ;;  %vm1216_vm1 = vcmp.eq.s32.totalorder %v1184_v62, 3 }
 0x194   :  { %1187 = vst [vmem:[%s1734_s4 + $0x1] sm:$0x1] %v1186_v3  ;;  %v1212_v8 = vsel %vm1189_vm15, %v1211_v54, %v1433_v47  ;;  %vm1219_vm2 = vcmp.eq.s32.totalorder %v1184_v62, 4  ;;  %vm1236_vm3 = vcmp.eq.s32.totalorder %v1184_v62, 5  ;;  %vm1246_vm4 = vcmp.eq.s32.totalorder %v1184_v62, 6 }
 0x195   :  { %v1215_v9 = vsel %vm1213_vm0, %v1214_v61, %v1212_v8  ;;  %vm1249_vm6 = vcmp.eq.s32.totalorder %v1184_v62, 7 }
 0x196   :  { %v1218_v0 = vsel %vm1216_vm1, %v1217_v4, %v1215_v9 }
 0x197   :  { %v1235_v14 = vsel %vm1219_vm2, %v1234_v2, %v1218_v0 }
 0x198   :  { %v1245_v26 = vsel %vm1236_vm3, %v1244_v5, %v1235_v14 }
 0x199   :  { %v1248_v20 = vsel %vm1246_vm4, %v1247_v13, %v1245_v26 }
 0x19a   :  { %v1251_v22 = vsel %vm1249_vm6, %v1250_v16, %v1248_v20 }
 0x19b   :  { %v1253_v15 = vsel %vm1252_vm5, %v1251_v22, %v1184_v62 }
 0x19c   :  { %v1255_v6 = vsel %vm1254_vm7, %v1253_v15, 7 }
 0x19d   :  { %1256 = vst [vmem:[%s1734_s4] sm:$0x1] %v1255_v6 }

</bundles_post_ra>
